<compile_context>
chip_gen: v7x
topology: tpu7x:2x2x1
jax: 0.10.0
libtpu: 0.0.40
codegen_flags: <defaults>
</compile_context>

<pallas_src>
import functools

import jax
import jax.numpy as jnp
from jax.experimental import pallas as pl
from jax.experimental.pallas import tpu as pltpu

BN_EPS = 1e-5
LRELU_SLOPE = 0.2
MAX_TILE_M = 2048  # rows of the patch matrix per grid step (upper bound)


def _round_up(x, m):
    return ((x + m - 1) // m) * m


# ----------------------- Pallas kernels -----------------------


def _matmul_act_kernel(p_ref, w_ref, o_ref, *, act):
    """Full-K matmul tile with fused activation (non-BN layers)."""
    y = jnp.dot(p_ref[...], w_ref[...], preferred_element_type=jnp.float32)
    if act == "lrelu":
        y = jnp.maximum(y, LRELU_SLOPE * y)
    elif act == "sigmoid":
        y = 1.0 / (1.0 + jnp.exp(-y))
    o_ref[...] = y.astype(o_ref.dtype)


def _matmul_stats_kernel(p_ref, w_ref, o_ref, stats_ref):
    """Full-K matmul tile; also emits per-M-tile partial BN stats (pre-norm)."""
    y = jnp.dot(p_ref[...], w_ref[...], preferred_element_type=jnp.float32)
    o_ref[...] = y.astype(o_ref.dtype)
    s1 = jnp.sum(y, axis=0, keepdims=True)          # [1, Cout_pad]
    s2 = jnp.sum(y * y, axis=0, keepdims=True)      # [1, Cout_pad]
    # single lane-dense write of both stat rows
    stats_ref[...] = jnp.concatenate([s1, s2], axis=0)[None]


# ----------------------- JAX glue -----------------------


def _im2col_nhwc(x, kh, kw, stride, pad):
    """x: [N,H,W,C] -> patches [N*Ho*Wo, kh*kw*C] (K order = (kh, kw, cin)).

    Padded border elements are exactly zero (needed by the BN-stats invariant
    and by applying BN+LReLU of the previous layer BEFORE this zero padding).
    """
    n, h, w, c = x.shape
    xp = jnp.pad(x, ((0, 0), (pad, pad), (pad, pad), (0, 0)))
    ho = (h + 2 * pad - kh) // stride + 1
    wo = (w + 2 * pad - kw) // stride + 1
    cols = []
    for di in range(kh):
        for dj in range(kw):
            cols.append(
                xp[:, di:di + stride * ho:stride, dj:dj + stride * wo:stride, :])
    p = jnp.concatenate(cols, axis=-1)                 # [N, Ho, Wo, kh*kw*C]
    return p.reshape(n * ho * wo, kh * kw * c), ho, wo


def _choose_tm(m):
    """Pick (tm, n_tiles).  Single tile for small M; otherwise an even number
    of <= MAX_TILE_M tiles so the 'parallel' M axis balances on 2-TC v7x."""
    m8 = _round_up(m, 8)
    if m8 <= 1024:
        return m8, 1
    ntiles = -(-m8 // MAX_TILE_M)
    if ntiles % 2:
        ntiles += 1
    tm = _round_up(-(-m8 // ntiles), 8)
    return tm, ntiles


def _vmem_limit_bytes(tm, k_pad, cout_pad, out_bytes, with_stats):
    """Tight-ish scoped-VMEM limit derived from actual (double-buffered)
    working set, with headroom.  Well under every chip's physical VMEM."""
    lhs = 2 * tm * k_pad * 2
    rhs = 2 * k_pad * cout_pad * 2
    out = 2 * tm * cout_pad * out_bytes
    st = 2 * 2 * cout_pad * 4 if with_stats else 0
    ws = lhs + rhs + out + st
    return min(2 * ws + (8 << 20), 48 << 20)


def _conv_matmul(patches, wmat, *, act, with_stats, out_dtype):
    """patches [M,K] bf16, wmat [K,Cout] f32.

    Returns (y [m_pad, cout_pad] out_dtype, partial stats or None,
             (m_pad, cout_pad))."""
    m, k = patches.shape
    cout = wmat.shape[1]

    cout_pad = _round_up(cout, 128)
    k_pad = _round_up(k, 128)
    tm, n_tiles = _choose_tm(m)
    m_pad = tm * n_tiles
    out_bytes = jnp.dtype(out_dtype).itemsize

    # Zero-pad (padded rows stay exactly zero -> BN stats unaffected).
    p = jnp.pad(patches, ((0, m_pad - m), (0, k_pad - k)))
    w = jnp.pad(wmat, ((0, k_pad - k), (0, cout_pad - cout))).astype(jnp.bfloat16)

    grid = (n_tiles,)
    in_specs = [
        pl.BlockSpec((tm, k_pad), lambda i: (i, 0)),
        pl.BlockSpec((k_pad, cout_pad), lambda i: (0, 0)),   # resident weight
    ]
    cparams = pltpu.CompilerParams(
        dimension_semantics=("parallel",),
        vmem_limit_bytes=_vmem_limit_bytes(tm, k_pad, cout_pad, out_bytes,
                                           with_stats),
    )

    if with_stats:
        y, stats = pl.pallas_call(
            _matmul_stats_kernel,
            out_shape=(
                jax.ShapeDtypeStruct((m_pad, cout_pad), out_dtype),
                jax.ShapeDtypeStruct((n_tiles, 2, cout_pad), jnp.float32),
            ),
            grid=grid,
            in_specs=in_specs,
            out_specs=(
                pl.BlockSpec((tm, cout_pad), lambda i: (i, 0)),
                pl.BlockSpec((1, 2, cout_pad), lambda i: (i, 0, 0)),
            ),
            compiler_params=cparams,
        )(p, w)
        return y, stats, (m_pad, cout_pad)

    kernel = functools.partial(_matmul_act_kernel, act=act)
    y = pl.pallas_call(
        kernel,
        out_shape=jax.ShapeDtypeStruct((m_pad, cout_pad), out_dtype),
        grid=grid,
        in_specs=in_specs,
        out_specs=pl.BlockSpec((tm, cout_pad), lambda i: (i, 0)),
        compiler_params=cparams,
    )(p, w)
    return y, None, (m_pad, cout_pad)


def conv_block(x, w, gamma=None, beta=None, *, stride, pad, use_bn, act):
    """Conv2d(bias=False) [+BatchNorm2d (training stats)] + activation.

    x: [N,H,W,Cin] NHWC (any float dtype).  w: [Cout,Cin,kh,kw] (PyTorch
    layout).  Returns NHWC (bf16 for BN-less lrelu layers, f32 otherwise).
    """
    n = x.shape[0]
    cout, cin, kh, kw = w.shape

    # bf16 im2col directly: no f32 patch slab, half the HBM traffic.
    patches, ho, wo = _im2col_nhwc(x.astype(jnp.bfloat16), kh, kw, stride, pad)
    m = patches.shape[0]
    # weight -> [kh, kw, cin, cout] -> [K, Cout] matching the patch K ordering
    wmat = jnp.transpose(w, (2, 3, 1, 0)).reshape(kh * kw * cin, cout)

    if use_bn:
        y, stats, (m_pad, cout_pad) = _conv_matmul(
            patches, wmat, act=None, with_stats=True, out_dtype=jnp.bfloat16)
        # Padded M rows are all-zero patches -> zero conv rows -> they add
        # nothing to the partial sums; normalize with the true M.
        s = jnp.sum(stats, axis=0)                      # [2, cout_pad]
        mean = s[0, :cout] / m
        var = s[1, :cout] / m - mean * mean             # biased (training) var
        inv = jax.lax.rsqrt(var + BN_EPS)
        scale = gamma.astype(jnp.float32) * inv         # [cout]
        shift = beta.astype(jnp.float32) - mean * scale
        # BN affine + LeakyReLU as plain jnp: XLA fuses it into the slice /
        # pad / concat that builds the next layer's patch matrix (applied
        # BEFORE the next layer's spatial zero padding -> correct semantics).
        h = y[:m, :cout].astype(jnp.float32).reshape(n, ho, wo, cout)
        h = h * scale + shift
        return jnp.maximum(h, LRELU_SLOPE * h)

    out_dtype = jnp.float32 if act == "sigmoid" else jnp.bfloat16
    y, _, _ = _conv_matmul(patches, wmat, act=act, with_stats=False,
                           out_dtype=out_dtype)
    return y[:m, :cout].reshape(n, ho, wo, cout)


def discriminator_forward(x_nchw, params):
    """DCGAN-128 discriminator.  x: [N, nc, 128, 128] -> [N, 1, 1, 1] f32."""
    (w1,
     w2, g2, b2,
     w3, g3, b3,
     w4, g4, b4,
     w5, g5, b5,
     w6) = params

    x = jnp.transpose(x_nchw, (0, 2, 3, 1))             # NCHW -> NHWC (once)
    h = conv_block(x, w1, stride=2, pad=1, use_bn=False, act="lrelu")
    h = conv_block(h, w2, g2, b2, stride=2, pad=1, use_bn=True, act="lrelu")
    h = conv_block(h, w3, g3, b3, stride=2, pad=1, use_bn=True, act="lrelu")
    h = conv_block(h, w4, g4, b4, stride=2, pad=1, use_bn=True, act="lrelu")
    h = conv_block(h, w5, g5, b5, stride=2, pad=1, use_bn=True, act="lrelu")
    # Final 4x4/valid conv, Cout=1: generic MXU path (Cout padded to 128);
    # M = N so its cost is negligible.
    h = conv_block(h, w6, stride=1, pad=0, use_bn=False, act="sigmoid")
    return jnp.transpose(h, (0, 3, 1, 2))               # back to NCHW


# ----------------------- deterministic parameter init -----------------------


def init_params(key, nc, ndf):
    chans = [nc, ndf, ndf * 2, ndf * 4, ndf * 8, ndf * 16, 1]
    keys = jax.random.split(key, 16)
    ki = iter(range(16))

    def conv_w(cout, cin):
        return 0.02 * jax.random.normal(keys[next(ki)], (cout, cin, 4, 4),
                                        jnp.float32)

    def bn_gb(c):
        g = 1.0 + 0.02 * jax.random.normal(keys[next(ki)], (c,), jnp.float32)
        b = 0.02 * jax.random.normal(keys[next(ki)], (c,), jnp.float32)
        return g, b

    w1 = conv_w(chans[1], chans[0])
    w2 = conv_w(chans[2], chans[1]); g2, b2 = bn_gb(chans[2])
    w3 = conv_w(chans[3], chans[2]); g3, b3 = bn_gb(chans[3])
    w4 = conv_w(chans[4], chans[3]); g4, b4 = bn_gb(chans[4])
    w5 = conv_w(chans[5], chans[4]); g5, b5 = bn_gb(chans[5])
    w6 = conv_w(chans[6], chans[5])
    return (w1, w2, g2, b2, w3, g3, b3, w4, g4, b4, w5, g5, b5, w6)


if __name__ == "__main__":
    # 128x128 spatial is required by the 6-layer stride-2 stack ending in a
    # valid 4x4 conv; keep batch / nc / ndf small.
    NC, NDF, BATCH = 3, 8, 2

    key = jax.random.PRNGKey(0)
    kx, kp = jax.random.split(key)
    x = jax.random.normal(kx, (BATCH, NC, 128, 128), jnp.float32)
    params = init_params(kp, NC, NDF)

    fwd = jax.jit(discriminator_forward)
    out = fwd(x, params)
    out = jax.block_until_ready(out)

    assert out.shape == (BATCH, 1, 1, 1), out.shape
    assert bool(jnp.all(jnp.isfinite(out)))
    assert bool(jnp.all((out >= 0.0) & (out <= 1.0)))  # sigmoid range
    print("KERNEL_OK")
</pallas_src>

<mosaic_0001>
module attributes {stable_mosaic.version = 11 : i64} {
  func.func @_matmul_act_kernel(%arg0: i32, %arg1: memref<2048x128xbf16, #tpu.memory_space<vmem>>, %arg2: memref<128x128xbf16, #tpu.memory_space<vmem>>, %arg3: memref<2048x128xbf16, #tpu.memory_space<vmem>>) attributes {dimension_semantics = [#tpu.dimension_semantics<parallel>], iteration_bounds = array<i64: 4>, scalar_prefetch = 0 : i64, scratch_operands = 0 : i64, tpu.core_type = #tpu.core_type<tc>, window_params = [{transform_indices = @transform_0, window_bounds = array<i64: 2048, 128>}, {pipeline_mode = #tpu.pipeline_mode<synchronous>, transform_indices = @transform_1, window_bounds = array<i64: 128, 128>}, {transform_indices = @transform_2, window_bounds = array<i64: 2048, 128>}]} {
    %c0 = arith.constant 0 : index
    %c0_0 = arith.constant 0 : index
    %0 = vector.load %arg1[%c0, %c0_0] : memref<2048x128xbf16, #tpu.memory_space<vmem>>, vector<2048x128xbf16>
    %c0_1 = arith.constant 0 : index
    %c0_2 = arith.constant 0 : index
    %1 = vector.load %arg2[%c0_1, %c0_2] : memref<128x128xbf16, #tpu.memory_space<vmem>>, vector<128x128xbf16>
    %cst = arith.constant dense<0.000000e+00> : vector<2048x128xf32>
    %2 = tpu.matmul %0, %1, %cst {dimension_numbers = #tpu.dot_dimension_numbers<[1], [0], [0], [1], [0, 0, 1, 1], [], []>} : vector<2048x128xbf16>, vector<128x128xbf16>, vector<2048x128xf32> -> vector<2048x128xf32>
    %cst_3 = arith.constant 2.000000e-01 : f32
    %3 = vector.broadcast %cst_3 : f32 to vector<2048x128xf32>
    %4 = arith.mulf %3, %2 : vector<2048x128xf32>
    %5 = arith.maximumf %2, %4 : vector<2048x128xf32>
    %6 = arith.truncf %5 : vector<2048x128xf32> to vector<2048x128xbf16>
    %c0_4 = arith.constant 0 : index
    %c0_5 = arith.constant 0 : index
    %7 = vector.load %arg3[%c0_4, %c0_5] : memref<2048x128xbf16, #tpu.memory_space<vmem>>, vector<2048x128xbf16>
    tpu.vector_store %arg3[%c0_4, %c0_5], %6 {strides = array<i32>} : memref<2048x128xbf16, #tpu.memory_space<vmem>>, vector<2048x128xbf16>,
    return
  }
  func.func @transform_0(%arg0: i32) -> (i32, i32) {
    %c0_i32 = arith.constant 0 : i32
    %c0_i32_0 = arith.constant 0 : i32
    return %arg0, %c0_i32 : i32, i32
  }
  func.func @transform_1(%arg0: i32) -> (i32, i32) {
    %c0_i32 = arith.constant 0 : i32
    %c0_i32_0 = arith.constant 0 : i32
    %c0_i32_1 = arith.constant 0 : i32
    return %c0_i32, %c0_i32_0 : i32, i32
  }
  func.func @transform_2(%arg0: i32) -> (i32, i32) {
    %c0_i32 = arith.constant 0 : i32
    %c0_i32_0 = arith.constant 0 : i32
    return %arg0, %c0_i32 : i32, i32
  }
}

module attributes {stable_mosaic.version = 11 : i64} {
  func.func @_matmul_stats_kernel(%arg0: i32, %arg1: memref<1024x128xbf16, #tpu.memory_space<vmem>>, %arg2: memref<128x128xbf16, #tpu.memory_space<vmem>>, %arg3: memref<1024x128xbf16, #tpu.memory_space<vmem>>, %arg4: memref<1x2x128xf32, #tpu.memory_space<vmem>>) attributes {dimension_semantics = [#tpu.dimension_semantics<parallel>], iteration_bounds = array<i64: 2>, scalar_prefetch = 0 : i64, scratch_operands = 0 : i64, tpu.core_type = #tpu.core_type<tc>, window_params = [{transform_indices = @transform_0, window_bounds = array<i64: 1024, 128>}, {pipeline_mode = #tpu.pipeline_mode<synchronous>, transform_indices = @transform_1, window_bounds = array<i64: 128, 128>}, {transform_indices = @transform_2, window_bounds = array<i64: 1024, 128>}, {transform_indices = @transform_3, window_bounds = array<i64: 1, 2, 128>}]} {
    %c0 = arith.constant 0 : index
    %c0_0 = arith.constant 0 : index
    %0 = vector.load %arg1[%c0, %c0_0] : memref<1024x128xbf16, #tpu.memory_space<vmem>>, vector<1024x128xbf16>
    %c0_1 = arith.constant 0 : index
    %c0_2 = arith.constant 0 : index
    %1 = vector.load %arg2[%c0_1, %c0_2] : memref<128x128xbf16, #tpu.memory_space<vmem>>, vector<128x128xbf16>
    %cst = arith.constant dense<0.000000e+00> : vector<1024x128xf32>
    %2 = tpu.matmul %0, %1, %cst {dimension_numbers = #tpu.dot_dimension_numbers<[1], [0], [0], [1], [0, 0, 1, 1], [], []>} : vector<1024x128xbf16>, vector<128x128xbf16>, vector<1024x128xf32> -> vector<1024x128xf32>
    %3 = arith.truncf %2 : vector<1024x128xf32> to vector<1024x128xbf16>
    %c0_3 = arith.constant 0 : index
    %c0_4 = arith.constant 0 : index
    %4 = vector.load %arg3[%c0_3, %c0_4] : memref<1024x128xbf16, #tpu.memory_space<vmem>>, vector<1024x128xbf16>
    tpu.vector_store %arg3[%c0_3, %c0_4], %3 {strides = array<i32>} : memref<1024x128xbf16, #tpu.memory_space<vmem>>, vector<1024x128xbf16>,
    %cst_5 = arith.constant dense<0.000000e+00> : vector<128xf32>
    %5 = vector.multi_reduction <add>, %2, %cst_5 [0] : vector<1024x128xf32> to vector<128xf32>
    %6 = vector.shape_cast %5 : vector<128xf32> to vector<1x128xf32>
    %7 = arith.mulf %2, %2 : vector<1024x128xf32>
    %cst_6 = arith.constant dense<0.000000e+00> : vector<128xf32>
    %8 = vector.multi_reduction <add>, %7, %cst_6 [0] : vector<1024x128xf32> to vector<128xf32>
    %9 = vector.shape_cast %8 : vector<128xf32> to vector<1x128xf32>
    %10 = tpu.concatenate %6, %9 in 0 : vector<1x128xf32>, vector<1x128xf32> -> vector<2x128xf32>
    %11 = vector.shape_cast %10 : vector<2x128xf32> to vector<1x2x128xf32>
    %c0_7 = arith.constant 0 : index
    %c0_8 = arith.constant 0 : index
    %c0_9 = arith.constant 0 : index
    %12 = vector.load %arg4[%c0_7, %c0_8, %c0_9] : memref<1x2x128xf32, #tpu.memory_space<vmem>>, vector<1x2x128xf32>
    tpu.vector_store %arg4[%c0_7, %c0_8, %c0_9], %11 {strides = array<i32>} : memref<1x2x128xf32, #tpu.memory_space<vmem>>, vector<1x2x128xf32>,
    return
  }
  func.func @transform_0(%arg0: i32) -> (i32, i32) {
    %c0_i32 = arith.constant 0 : i32
    %c0_i32_0 = arith.constant 0 : i32
    return %arg0, %c0_i32 : i32, i32
  }
  func.func @transform_1(%arg0: i32) -> (i32, i32) {
    %c0_i32 = arith.constant 0 : i32
    %c0_i32_0 = arith.constant 0 : i32
    %c0_i32_1 = arith.constant 0 : i32
    return %c0_i32, %c0_i32_0 : i32, i32
  }
  func.func @transform_2(%arg0: i32) -> (i32, i32) {
    %c0_i32 = arith.constant 0 : i32
    %c0_i32_0 = arith.constant 0 : i32
    return %arg0, %c0_i32 : i32, i32
  }
  func.func @transform_3(%arg0: i32) -> (i32, i32, i32) {
    %c0_i32 = arith.constant 0 : i32
    %c0_i32_0 = arith.constant 0 : i32
    %c0_i32_1 = arith.constant 0 : i32
    return %arg0, %c0_i32, %c0_i32_0 : i32, i32, i32
  }
}

module attributes {stable_mosaic.version = 11 : i64} {
  func.func @_matmul_stats_kernel(%arg0: i32, %arg1: memref<512x256xbf16, #tpu.memory_space<vmem>>, %arg2: memref<256x128xbf16, #tpu.memory_space<vmem>>, %arg3: memref<512x128xbf16, #tpu.memory_space<vmem>>, %arg4: memref<1x2x128xf32, #tpu.memory_space<vmem>>) attributes {dimension_semantics = [#tpu.dimension_semantics<parallel>], iteration_bounds = array<i64: 1>, scalar_prefetch = 0 : i64, scratch_operands = 0 : i64, tpu.core_type = #tpu.core_type<tc>, window_params = [{transform_indices = @transform_0, window_bounds = array<i64: 512, 256>}, {pipeline_mode = #tpu.pipeline_mode<synchronous>, transform_indices = @transform_1, window_bounds = array<i64: 256, 128>}, {transform_indices = @transform_2, window_bounds = array<i64: 512, 128>}, {transform_indices = @transform_3, window_bounds = array<i64: 1, 2, 128>}]} {
    %c0 = arith.constant 0 : index
    %c0_0 = arith.constant 0 : index
    %0 = vector.load %arg1[%c0, %c0_0] : memref<512x256xbf16, #tpu.memory_space<vmem>>, vector<512x256xbf16>
    %c0_1 = arith.constant 0 : index
    %c0_2 = arith.constant 0 : index
    %1 = vector.load %arg2[%c0_1, %c0_2] : memref<256x128xbf16, #tpu.memory_space<vmem>>, vector<256x128xbf16>
    %cst = arith.constant dense<0.000000e+00> : vector<512x128xf32>
    %2 = tpu.matmul %0, %1, %cst {dimension_numbers = #tpu.dot_dimension_numbers<[1], [0], [0], [1], [0, 0, 1, 1], [], []>} : vector<512x256xbf16>, vector<256x128xbf16>, vector<512x128xf32> -> vector<512x128xf32>
    %3 = arith.truncf %2 : vector<512x128xf32> to vector<512x128xbf16>
    %c0_3 = arith.constant 0 : index
    %c0_4 = arith.constant 0 : index
    %4 = vector.load %arg3[%c0_3, %c0_4] : memref<512x128xbf16, #tpu.memory_space<vmem>>, vector<512x128xbf16>
    tpu.vector_store %arg3[%c0_3, %c0_4], %3 {strides = array<i32>} : memref<512x128xbf16, #tpu.memory_space<vmem>>, vector<512x128xbf16>,
    %cst_5 = arith.constant dense<0.000000e+00> : vector<128xf32>
    %5 = vector.multi_reduction <add>, %2, %cst_5 [0] : vector<512x128xf32> to vector<128xf32>
    %6 = vector.shape_cast %5 : vector<128xf32> to vector<1x128xf32>
    %7 = arith.mulf %2, %2 : vector<512x128xf32>
    %cst_6 = arith.constant dense<0.000000e+00> : vector<128xf32>
    %8 = vector.multi_reduction <add>, %7, %cst_6 [0] : vector<512x128xf32> to vector<128xf32>
    %9 = vector.shape_cast %8 : vector<128xf32> to vector<1x128xf32>
    %10 = tpu.concatenate %6, %9 in 0 : vector<1x128xf32>, vector<1x128xf32> -> vector<2x128xf32>
    %11 = vector.shape_cast %10 : vector<2x128xf32> to vector<1x2x128xf32>
    %c0_7 = arith.constant 0 : index
    %c0_8 = arith.constant 0 : index
    %c0_9 = arith.constant 0 : index
    %12 = vector.load %arg4[%c0_7, %c0_8, %c0_9] : memref<1x2x128xf32, #tpu.memory_space<vmem>>, vector<1x2x128xf32>
    tpu.vector_store %arg4[%c0_7, %c0_8, %c0_9], %11 {strides = array<i32>} : memref<1x2x128xf32, #tpu.memory_space<vmem>>, vector<1x2x128xf32>,
    return
  }
  func.func @transform_0(%arg0: i32) -> (i32, i32) {
    %c0_i32 = arith.constant 0 : i32
    %c0_i32_0 = arith.constant 0 : i32
    return %arg0, %c0_i32 : i32, i32
  }
  func.func @transform_1(%arg0: i32) -> (i32, i32) {
    %c0_i32 = arith.constant 0 : i32
    %c0_i32_0 = arith.constant 0 : i32
    %c0_i32_1 = arith.constant 0 : i32
    return %c0_i32, %c0_i32_0 : i32, i32
  }
  func.func @transform_2(%arg0: i32) -> (i32, i32) {
    %c0_i32 = arith.constant 0 : i32
    %c0_i32_0 = arith.constant 0 : i32
    return %arg0, %c0_i32 : i32, i32
  }
  func.func @transform_3(%arg0: i32) -> (i32, i32, i32) {
    %c0_i32 = arith.constant 0 : i32
    %c0_i32_0 = arith.constant 0 : i32
    %c0_i32_1 = arith.constant 0 : i32
    return %arg0, %c0_i32, %c0_i32_0 : i32, i32, i32
  }
}

module attributes {stable_mosaic.version = 11 : i64} {
  func.func @_matmul_stats_kernel(%arg0: i32, %arg1: memref<128x512xbf16, #tpu.memory_space<vmem>>, %arg2: memref<512x128xbf16, #tpu.memory_space<vmem>>, %arg3: memref<128x128xbf16, #tpu.memory_space<vmem>>, %arg4: memref<1x2x128xf32, #tpu.memory_space<vmem>>) attributes {dimension_semantics = [#tpu.dimension_semantics<parallel>], iteration_bounds = array<i64: 1>, scalar_prefetch = 0 : i64, scratch_operands = 0 : i64, tpu.core_type = #tpu.core_type<tc>, window_params = [{transform_indices = @transform_0, window_bounds = array<i64: 128, 512>}, {pipeline_mode = #tpu.pipeline_mode<synchronous>, transform_indices = @transform_1, window_bounds = array<i64: 512, 128>}, {transform_indices = @transform_2, window_bounds = array<i64: 128, 128>}, {transform_indices = @transform_3, window_bounds = array<i64: 1, 2, 128>}]} {
    %c0 = arith.constant 0 : index
    %c0_0 = arith.constant 0 : index
    %0 = vector.load %arg1[%c0, %c0_0] : memref<128x512xbf16, #tpu.memory_space<vmem>>, vector<128x512xbf16>
    %c0_1 = arith.constant 0 : index
    %c0_2 = arith.constant 0 : index
    %1 = vector.load %arg2[%c0_1, %c0_2] : memref<512x128xbf16, #tpu.memory_space<vmem>>, vector<512x128xbf16>
    %cst = arith.constant dense<0.000000e+00> : vector<128x128xf32>
    %2 = tpu.matmul %0, %1, %cst {dimension_numbers = #tpu.dot_dimension_numbers<[1], [0], [0], [1], [0, 0, 1, 1], [], []>} : vector<128x512xbf16>, vector<512x128xbf16>, vector<128x128xf32> -> vector<128x128xf32>
    %3 = arith.truncf %2 : vector<128x128xf32> to vector<128x128xbf16>
    %c0_3 = arith.constant 0 : index
    %c0_4 = arith.constant 0 : index
    %4 = vector.load %arg3[%c0_3, %c0_4] : memref<128x128xbf16, #tpu.memory_space<vmem>>, vector<128x128xbf16>
    tpu.vector_store %arg3[%c0_3, %c0_4], %3 {strides = array<i32>} : memref<128x128xbf16, #tpu.memory_space<vmem>>, vector<128x128xbf16>,
    %cst_5 = arith.constant dense<0.000000e+00> : vector<128xf32>
    %5 = vector.multi_reduction <add>, %2, %cst_5 [0] : vector<128x128xf32> to vector<128xf32>
    %6 = vector.shape_cast %5 : vector<128xf32> to vector<1x128xf32>
    %7 = arith.mulf %2, %2 : vector<128x128xf32>
    %cst_6 = arith.constant dense<0.000000e+00> : vector<128xf32>
    %8 = vector.multi_reduction <add>, %7, %cst_6 [0] : vector<128x128xf32> to vector<128xf32>
    %9 = vector.shape_cast %8 : vector<128xf32> to vector<1x128xf32>
    %10 = tpu.concatenate %6, %9 in 0 : vector<1x128xf32>, vector<1x128xf32> -> vector<2x128xf32>
    %11 = vector.shape_cast %10 : vector<2x128xf32> to vector<1x2x128xf32>
    %c0_7 = arith.constant 0 : index
    %c0_8 = arith.constant 0 : index
    %c0_9 = arith.constant 0 : index
    %12 = vector.load %arg4[%c0_7, %c0_8, %c0_9] : memref<1x2x128xf32, #tpu.memory_space<vmem>>, vector<1x2x128xf32>
    tpu.vector_store %arg4[%c0_7, %c0_8, %c0_9], %11 {strides = array<i32>} : memref<1x2x128xf32, #tpu.memory_space<vmem>>, vector<1x2x128xf32>,
    return
  }
  func.func @transform_0(%arg0: i32) -> (i32, i32) {
    %c0_i32 = arith.constant 0 : i32
    %c0_i32_0 = arith.constant 0 : i32
    return %arg0, %c0_i32 : i32, i32
  }
  func.func @transform_1(%arg0: i32) -> (i32, i32) {
    %c0_i32 = arith.constant 0 : i32
    %c0_i32_0 = arith.constant 0 : i32
    %c0_i32_1 = arith.constant 0 : i32
    return %c0_i32, %c0_i32_0 : i32, i32
  }
  func.func @transform_2(%arg0: i32) -> (i32, i32) {
    %c0_i32 = arith.constant 0 : i32
    %c0_i32_0 = arith.constant 0 : i32
    return %arg0, %c0_i32 : i32, i32
  }
  func.func @transform_3(%arg0: i32) -> (i32, i32, i32) {
    %c0_i32 = arith.constant 0 : i32
    %c0_i32_0 = arith.constant 0 : i32
    %c0_i32_1 = arith.constant 0 : i32
    return %arg0, %c0_i32, %c0_i32_0 : i32, i32, i32
  }
}

module attributes {stable_mosaic.version = 11 : i64} {
  func.func @_matmul_stats_kernel(%arg0: i32, %arg1: memref<32x1024xbf16, #tpu.memory_space<vmem>>, %arg2: memref<1024x128xbf16, #tpu.memory_space<vmem>>, %arg3: memref<32x128xbf16, #tpu.memory_space<vmem>>, %arg4: memref<1x2x128xf32, #tpu.memory_space<vmem>>) attributes {dimension_semantics = [#tpu.dimension_semantics<parallel>], iteration_bounds = array<i64: 1>, scalar_prefetch = 0 : i64, scratch_operands = 0 : i64, tpu.core_type = #tpu.core_type<tc>, window_params = [{transform_indices = @transform_0, window_bounds = array<i64: 32, 1024>}, {pipeline_mode = #tpu.pipeline_mode<synchronous>, transform_indices = @transform_1, window_bounds = array<i64: 1024, 128>}, {transform_indices = @transform_2, window_bounds = array<i64: 32, 128>}, {transform_indices = @transform_3, window_bounds = array<i64: 1, 2, 128>}]} {
    %c0 = arith.constant 0 : index
    %c0_0 = arith.constant 0 : index
    %0 = vector.load %arg1[%c0, %c0_0] : memref<32x1024xbf16, #tpu.memory_space<vmem>>, vector<32x1024xbf16>
    %c0_1 = arith.constant 0 : index
    %c0_2 = arith.constant 0 : index
    %1 = vector.load %arg2[%c0_1, %c0_2] : memref<1024x128xbf16, #tpu.memory_space<vmem>>, vector<1024x128xbf16>
    %cst = arith.constant dense<0.000000e+00> : vector<32x128xf32>
    %2 = tpu.matmul %0, %1, %cst {dimension_numbers = #tpu.dot_dimension_numbers<[1], [0], [0], [1], [0, 0, 1, 1], [], []>} : vector<32x1024xbf16>, vector<1024x128xbf16>, vector<32x128xf32> -> vector<32x128xf32>
    %3 = arith.truncf %2 : vector<32x128xf32> to vector<32x128xbf16>
    %c0_3 = arith.constant 0 : index
    %c0_4 = arith.constant 0 : index
    %4 = vector.load %arg3[%c0_3, %c0_4] : memref<32x128xbf16, #tpu.memory_space<vmem>>, vector<32x128xbf16>
    tpu.vector_store %arg3[%c0_3, %c0_4], %3 {strides = array<i32>} : memref<32x128xbf16, #tpu.memory_space<vmem>>, vector<32x128xbf16>,
    %cst_5 = arith.constant dense<0.000000e+00> : vector<128xf32>
    %5 = vector.multi_reduction <add>, %2, %cst_5 [0] : vector<32x128xf32> to vector<128xf32>
    %6 = vector.shape_cast %5 : vector<128xf32> to vector<1x128xf32>
    %7 = arith.mulf %2, %2 : vector<32x128xf32>
    %cst_6 = arith.constant dense<0.000000e+00> : vector<128xf32>
    %8 = vector.multi_reduction <add>, %7, %cst_6 [0] : vector<32x128xf32> to vector<128xf32>
    %9 = vector.shape_cast %8 : vector<128xf32> to vector<1x128xf32>
    %10 = tpu.concatenate %6, %9 in 0 : vector<1x128xf32>, vector<1x128xf32> -> vector<2x128xf32>
    %11 = vector.shape_cast %10 : vector<2x128xf32> to vector<1x2x128xf32>
    %c0_7 = arith.constant 0 : index
    %c0_8 = arith.constant 0 : index
    %c0_9 = arith.constant 0 : index
    %12 = vector.load %arg4[%c0_7, %c0_8, %c0_9] : memref<1x2x128xf32, #tpu.memory_space<vmem>>, vector<1x2x128xf32>
    tpu.vector_store %arg4[%c0_7, %c0_8, %c0_9], %11 {strides = array<i32>} : memref<1x2x128xf32, #tpu.memory_space<vmem>>, vector<1x2x128xf32>,
    return
  }
  func.func @transform_0(%arg0: i32) -> (i32, i32) {
    %c0_i32 = arith.constant 0 : i32
    %c0_i32_0 = arith.constant 0 : i32
    return %arg0, %c0_i32 : i32, i32
  }
  func.func @transform_1(%arg0: i32) -> (i32, i32) {
    %c0_i32 = arith.constant 0 : i32
    %c0_i32_0 = arith.constant 0 : i32
    %c0_i32_1 = arith.constant 0 : i32
    return %c0_i32, %c0_i32_0 : i32, i32
  }
  func.func @transform_2(%arg0: i32) -> (i32, i32) {
    %c0_i32 = arith.constant 0 : i32
    %c0_i32_0 = arith.constant 0 : i32
    return %arg0, %c0_i32 : i32, i32
  }
  func.func @transform_3(%arg0: i32) -> (i32, i32, i32) {
    %c0_i32 = arith.constant 0 : i32
    %c0_i32_0 = arith.constant 0 : i32
    %c0_i32_1 = arith.constant 0 : i32
    return %arg0, %c0_i32, %c0_i32_0 : i32, i32, i32
  }
}

module attributes {stable_mosaic.version = 11 : i64} {
  func.func @_matmul_act_kernel(%arg0: i32, %arg1: memref<8x2048xbf16, #tpu.memory_space<vmem>>, %arg2: memref<2048x128xbf16, #tpu.memory_space<vmem>>, %arg3: memref<8x128xf32, #tpu.memory_space<vmem>>) attributes {dimension_semantics = [#tpu.dimension_semantics<parallel>], iteration_bounds = array<i64: 1>, scalar_prefetch = 0 : i64, scratch_operands = 0 : i64, tpu.core_type = #tpu.core_type<tc>, window_params = [{transform_indices = @transform_0, window_bounds = array<i64: 8, 2048>}, {pipeline_mode = #tpu.pipeline_mode<synchronous>, transform_indices = @transform_1, window_bounds = array<i64: 2048, 128>}, {transform_indices = @transform_2, window_bounds = array<i64: 8, 128>}]} {
    %c0 = arith.constant 0 : index
    %c0_0 = arith.constant 0 : index
    %0 = vector.load %arg1[%c0, %c0_0] : memref<8x2048xbf16, #tpu.memory_space<vmem>>, vector<8x2048xbf16>
    %c0_1 = arith.constant 0 : index
    %c0_2 = arith.constant 0 : index
    %1 = vector.load %arg2[%c0_1, %c0_2] : memref<2048x128xbf16, #tpu.memory_space<vmem>>, vector<2048x128xbf16>
    %cst = arith.constant dense<0.000000e+00> : vector<8x128xf32>
    %2 = tpu.matmul %0, %1, %cst {dimension_numbers = #tpu.dot_dimension_numbers<[1], [0], [0], [1], [0, 0, 1, 1], [], []>} : vector<8x2048xbf16>, vector<2048x128xbf16>, vector<8x128xf32> -> vector<8x128xf32>
    %cst_3 = arith.constant 0.000000e+00 : f32
    %3 = vector.broadcast %cst_3 : f32 to vector<8x128xf32>
    %4 = arith.subf %3, %2 : vector<8x128xf32>
    %5 = math.exp %4 : vector<8x128xf32>
    %cst_4 = arith.constant 1.000000e+00 : f32
    %6 = vector.broadcast %cst_4 : f32 to vector<8x128xf32>
    %7 = arith.addf %6, %5 : vector<8x128xf32>
    %cst_5 = arith.constant 1.000000e+00 : f32
    %8 = vector.broadcast %cst_5 : f32 to vector<8x128xf32>
    %9 = arith.divf %8, %7 : vector<8x128xf32>
    %c0_6 = arith.constant 0 : index
    %c0_7 = arith.constant 0 : index
    %10 = vector.load %arg3[%c0_6, %c0_7] : memref<8x128xf32, #tpu.memory_space<vmem>>, vector<8x128xf32>
    tpu.vector_store %arg3[%c0_6, %c0_7], %9 {strides = array<i32>} : memref<8x128xf32, #tpu.memory_space<vmem>>, vector<8x128xf32>,
    return
  }
  func.func @transform_0(%arg0: i32) -> (i32, i32) {
    %c0_i32 = arith.constant 0 : i32
    %c0_i32_0 = arith.constant 0 : i32
    return %arg0, %c0_i32 : i32, i32
  }
  func.func @transform_1(%arg0: i32) -> (i32, i32) {
    %c0_i32 = arith.constant 0 : i32
    %c0_i32_0 = arith.constant 0 : i32
    %c0_i32_1 = arith.constant 0 : i32
    return %c0_i32, %c0_i32_0 : i32, i32
  }
  func.func @transform_2(%arg0: i32) -> (i32, i32) {
    %c0_i32 = arith.constant 0 : i32
    %c0_i32_0 = arith.constant 0 : i32
    return %arg0, %c0_i32 : i32, i32
  }
}

</mosaic_0001>

<bundles_post_ra>
// kernel: discriminator_forward.6
= control target key start
LH: loop header
LB: loop body
LE: loop exit
PB: predicated region body
PF: predicated region fallthrough
CT: control target
= control target key end

     0   :  { %s6158_s9 = smov 0   ;;  %s6466_s0 = inlined_call_operand.vmem [shape: bf16[8192,128], index: 0, kind: input, shape index: {}]   ;;  %s6467_s1 = inlined_call_operand.vmem [shape: bf16[128,128], index: 1, kind: input, shape index: {}]   ;;  %s6468_s2 = inlined_call_operand.vmem [shape: bf16[8192,128], index: 2, kind: output, shape index: {}]  }
   0x1 LB: > { %s4141_s10 = sadd.s32 4294967295, %s6141_s9   ;;  %p4145_p0 = scmp.ge.s32.totalorder %s6141_s9, 1  ;;  %s6141_s9 = sphi %s6158_s9, %s12_s9  }
   0x2   : > { %p113_p1 = scmp.lt.s32.totalorder %s6141_s9, 5 }
   0x4   : > { %p114_p2 = pnand %p4145_p0, %p113_p1 }
   0x5   : > { %v5999_v0 = vld [vmem:[%s6467_s1] sm:$0xff] (!%p114_p2)   ;;  %s4146_s13 = sshll.u32 (!%p114_p2), %s4141_s10, 8  ;;  %v6000_v1 = vld [vmem:[%s6467_s1 + $0x8] sm:$0xff] (!%p114_p2)   ;;  %v6001_v2 = vld [vmem:[%s6467_s1 + $0x10] sm:$0xff] (!%p114_p2)  }
   0x6   : > { %117 = sbr.rel (%p114_p2) target bundleno = 509 (0x1fd), region = 28  ;;  %p136_p3 = scmp.lt.s32.totalorder (!%p114_p2), %s4146_s13, 1023  ;;  %5703 = vmatprep.subr.bf16.mxu0 (!%p114_p2), %v5999_v0  ;;  %5975 = vmatprep.subr.bf16.mxu1 (!%p114_p2), %v5999_v0  ;;  %v6002_v3 = vld [vmem:[%s6467_s1 + $0x18] sm:$0xff] (!%p114_p2)   ;;  %v6003_v6 = vld [vmem:[%s6467_s1 + $0x20] sm:$0xff] (!%p114_p2)   ;;  %v6004_v7 = vld [vmem:[%s6467_s1 + $0x28] sm:$0xff] (!%p114_p2)  }
   0x7   : > { %5704 = vmatpush3.bf16.msra.mxu0 (!%p114_p2), %v5999_v0  ;;  %5983 = vmatpush3.bf16.msra.mxu1 (!%p114_p2), %v5999_v0  ;;  %v6005_v8 = vld [vmem:[%s6467_s1 + $0x30] sm:$0xff] (!%p114_p2)   ;;  %v6006_v9 = vld [vmem:[%s6467_s1 + $0x38] sm:$0xff] (!%p114_p2)  }
   0x8   : > { %5705 = vmatprep.subr.bf16.mxu0 (!%p114_p2), %v6000_v1  ;;  %5976 = vmatprep.subr.bf16.mxu1 (!%p114_p2), %v6000_v1 }
   0xb   : > { %5706 = vmatpush3.bf16.msra.mxu0 (!%p114_p2), %v6000_v1  ;;  %5984 = vmatpush3.bf16.msra.mxu1 (!%p114_p2), %v6000_v1 }
   0xc   : > { %5707 = vmatprep.subr.bf16.mxu0 (!%p114_p2), %v6001_v2  ;;  %5977 = vmatprep.subr.bf16.mxu1 (!%p114_p2), %v6001_v2 }
   0xd   : > { %s6470_s13 = smov (!%p136_p3, %s4146_s13), 1023 }
   0xe   : > { %s4147_s18 = sshll.u32 %s6470_s13, 2 }
   0xf   : > { %s6183_s21 = scalar_lea.vmem %s6466_s0, %s4147_s18  ;;  %5708 = vmatpush3.bf16.msra.mxu0 %v6001_v2  ;;  %5985 = vmatpush3.bf16.msra.mxu1 %v6001_v2  ;;  %s6319_s6 = scalar_lea.vmem %s6468_s2, %s4147_s18 }
  0x10   : > { %v6007_v4 = vld [vmem:[%s6183_s21] sm:$0xff]   ;;  %5709 = vmatprep.subr.bf16.mxu0 %v6002_v3  ;;  %5978 = vmatprep.subr.bf16.mxu1 %v6002_v3  ;;  %v6009_v10 = vld [vmem:[%s6183_s21 + $0x8] sm:$0xff]   ;;  %v6011_v12 = vld [vmem:[%s6183_s21 + $0x10] sm:$0xff]  }
  0x11   : > { %v6008_v5 = vld [vmem:[%s6183_s21 + $0x200] sm:$0xff]   ;;  %5719 = vmatprep.mubr.bf16.mxu0 %v6007_v4  ;;  %v6010_v11 = vld [vmem:[%s6183_s21 + $0x208] sm:$0xff]   ;;  %v6012_v13 = vld [vmem:[%s6183_s21 + $0x210] sm:$0xff]  }
  0x12   : > { %5847 = vmatprep.mubr.bf16.mxu1 %v6008_v5  ;;  %v6013_v14 = vld [vmem:[%s6183_s21 + $0x18] sm:$0xff]   ;;  %v6015_v16 = vld [vmem:[%s6183_s21 + $0x20] sm:$0xff]   ;;  %v6017_v18 = vld [vmem:[%s6183_s21 + $0x28] sm:$0xff]  }
  0x13   : > { %5710 = vmatpush3.bf16.msra.mxu0 %v6002_v3  ;;  %5986 = vmatpush3.bf16.msra.mxu1 %v6002_v3  ;;  %v6014_v15 = vld [vmem:[%s6183_s21 + $0x218] sm:$0xff]   ;;  %v6016_v17 = vld [vmem:[%s6183_s21 + $0x220] sm:$0xff]   ;;  %v6018_v19 = vld [vmem:[%s6183_s21 + $0x228] sm:$0xff]  }
  0x14   : > { %5711 = vmatprep.subr.bf16.mxu0 %v6003_v6  ;;  %5979 = vmatprep.subr.bf16.mxu1 %v6003_v6  ;;  %v6019_v20 = vld [vmem:[%s6183_s21 + $0x30] sm:$0xff]   ;;  %v6021_v22 = vld [vmem:[%s6183_s21 + $0x38] sm:$0xff]   ;;  %v6023_v24 = vld [vmem:[%s6183_s21 + $0x40] sm:$0xff]  }
  0x15   : > { %v6020_v21 = vld [vmem:[%s6183_s21 + $0x230] sm:$0xff]   ;;  %v6022_v23 = vld [vmem:[%s6183_s21 + $0x238] sm:$0xff]   ;;  %v6024_v25 = vld [vmem:[%s6183_s21 + $0x240] sm:$0xff]  }
  0x16   : > { %v6025_v26 = vld [vmem:[%s6183_s21 + $0x48] sm:$0xff]   ;;  %v6027_v28 = vld [vmem:[%s6183_s21 + $0x50] sm:$0xff]   ;;  %v6029_v30 = vld [vmem:[%s6183_s21 + $0x58] sm:$0xff]  }
  0x17   : > { %5712 = vmatpush3.bf16.msra.mxu0 %v6003_v6  ;;  %5987 = vmatpush3.bf16.msra.mxu1 %v6003_v6  ;;  %v6026_v27 = vld [vmem:[%s6183_s21 + $0x248] sm:$0xff]   ;;  %v6028_v29 = vld [vmem:[%s6183_s21 + $0x250] sm:$0xff]   ;;  %v6030_v31 = vld [vmem:[%s6183_s21 + $0x258] sm:$0xff]  }
  0x18   : > { %5713 = vmatprep.subr.bf16.mxu0 %v6004_v7  ;;  %5980 = vmatprep.subr.bf16.mxu1 %v6004_v7  ;;  %v6031_v32 = vld [vmem:[%s6183_s21 + $0x60] sm:$0xff]   ;;  %v6033_v34 = vld [vmem:[%s6183_s21 + $0x68] sm:$0xff]   ;;  %v6035_v36 = vld [vmem:[%s6183_s21 + $0x70] sm:$0xff]  }
  0x19   : > { %v6032_v33 = vld [vmem:[%s6183_s21 + $0x260] sm:$0xff]   ;;  %v6034_v35 = vld [vmem:[%s6183_s21 + $0x268] sm:$0xff]   ;;  %v6036_v37 = vld [vmem:[%s6183_s21 + $0x270] sm:$0xff]  }
  0x1a   : > { %v6037_v38 = vld [vmem:[%s6183_s21 + $0x78] sm:$0xff]   ;;  %v6039_v40 = vld [vmem:[%s6183_s21 + $0x80] sm:$0xff]   ;;  %v6041_v42 = vld [vmem:[%s6183_s21 + $0x88] sm:$0xff]  }
  0x1b   : > { %5714 = vmatpush3.bf16.msra.mxu0 %v6004_v7  ;;  %5988 = vmatpush3.bf16.msra.mxu1 %v6004_v7  ;;  %v6038_v39 = vld [vmem:[%s6183_s21 + $0x278] sm:$0xff]   ;;  %v6040_v41 = vld [vmem:[%s6183_s21 + $0x280] sm:$0xff]   ;;  %v6042_v43 = vld [vmem:[%s6183_s21 + $0x288] sm:$0xff]  }
  0x1c   : > { %5715 = vmatprep.subr.bf16.mxu0 %v6005_v8  ;;  %5981 = vmatprep.subr.bf16.mxu1 %v6005_v8  ;;  %v6043_v44 = vld [vmem:[%s6183_s21 + $0x90] sm:$0xff]   ;;  %v6045_v46 = vld [vmem:[%s6183_s21 + $0x98] sm:$0xff]   ;;  %v6047_v48 = vld [vmem:[%s6183_s21 + $0xa0] sm:$0xff]  }
  0x1d   : > { %v6044_v45 = vld [vmem:[%s6183_s21 + $0x290] sm:$0xff]   ;;  %v6046_v47 = vld [vmem:[%s6183_s21 + $0x298] sm:$0xff]   ;;  %v6048_v49 = vld [vmem:[%s6183_s21 + $0x2a0] sm:$0xff]  }
  0x1e   : > { %v6049_v50 = vld [vmem:[%s6183_s21 + $0xa8] sm:$0xff]   ;;  %v6051_v52 = vld [vmem:[%s6183_s21 + $0xb0] sm:$0xff]   ;;  %v6053_v54 = vld [vmem:[%s6183_s21 + $0xb8] sm:$0xff]  }
  0x1f   : > { %5716 = vmatpush3.bf16.msra.mxu0 %v6005_v8  ;;  %5989 = vmatpush3.bf16.msra.mxu1 %v6005_v8  ;;  %v6050_v51 = vld [vmem:[%s6183_s21 + $0x2a8] sm:$0xff]   ;;  %v6052_v53 = vld [vmem:[%s6183_s21 + $0x2b0] sm:$0xff]   ;;  %v6054_v55 = vld [vmem:[%s6183_s21 + $0x2b8] sm:$0xff]  }
  0x20   : > { %5717 = vmatprep.subr.bf16.mxu0 %v6006_v9  ;;  %5982 = vmatprep.subr.bf16.mxu1 %v6006_v9  ;;  %v6055_v56 = vld [vmem:[%s6183_s21 + $0xc0] sm:$0xff]   ;;  %v6057_v58 = vld [vmem:[%s6183_s21 + $0xc8] sm:$0xff]   ;;  %v6059_v60 = vld [vmem:[%s6183_s21 + $0xd0] sm:$0xff]  }
  0x21   : > { %v6056_v57 = vld [vmem:[%s6183_s21 + $0x2c0] sm:$0xff]   ;;  %v6058_v59 = vld [vmem:[%s6183_s21 + $0x2c8] sm:$0xff]   ;;  %v6060_v61 = vld [vmem:[%s6183_s21 + $0x2d0] sm:$0xff]  }
  0x22   : > { %v6061_v62 = vld [vmem:[%s6183_s21 + $0xd8] sm:$0xff]   ;;  %v6063_v0 = vld [vmem:[%s6183_s21 + $0xe0] sm:$0xff]   ;;  %v6065_v2 = vld [vmem:[%s6183_s21 + $0xe8] sm:$0xff]  }
  0x23   : > { %5718 = vmatpush3.bf16.msra.mxu0 %v6006_v9  ;;  %5990 = vmatpush3.bf16.msra.mxu1 %v6006_v9  ;;  %v6062_v63 = vld [vmem:[%s6183_s21 + $0x2d8] sm:$0xff]   ;;  %v6064_v1 = vld [vmem:[%s6183_s21 + $0x2e0] sm:$0xff]   ;;  %v6066_v3 = vld [vmem:[%s6183_s21 + $0x2e8] sm:$0xff]  }
  0x24   : > { %v6067_v4 = vld [vmem:[%s6183_s21 + $0xf0] sm:$0xff]   ;;  %v6069_v6 = vld [vmem:[%s6183_s21 + $0xf8] sm:$0xff]   ;;  %v6071_v8 = vld [vmem:[%s6183_s21 + $0x100] sm:$0xff]  }
  0x25   : > { %v6068_v5 = vld [vmem:[%s6183_s21 + $0x2f0] sm:$0xff]   ;;  %v6070_v7 = vld [vmem:[%s6183_s21 + $0x2f8] sm:$0xff]   ;;  %v6072_v9 = vld [vmem:[%s6183_s21 + $0x300] sm:$0xff]  }
  0x26   : > { %5720 = vmatmul.mubr.bf16.vlgmr.msra.gmra.mrb[0].mxu0 %v6009_v10  ;;  %5848 = vmatmul.mubr.bf16.vlgmr.msra.gmra.mrb[0].mxu1 %v6010_v11  ;;  %v6073_v10 = vld [vmem:[%s6183_s21 + $0x108] sm:$0xff]  }
  0x27   : > { %5723 = vmatprep.mubr.bf16.mxu0 %v6011_v12  ;;  %5851 = vmatprep.mubr.bf16.mxu1 %v6012_v13  ;;  %v6074_v11 = vld [vmem:[%s6183_s21 + $0x308] sm:$0xff]   ;;  %v6075_v12 = vld [vmem:[%s6183_s21 + $0x110] sm:$0xff]  }
  0x28   : > { %v6076_v13 = vld [vmem:[%s6183_s21 + $0x310] sm:$0xff]  }
  0x2e   : > { %5724 = vmatmul.mubr.bf16.gmra.mrb[4].mxu0 %v6013_v14  ;;  %5852 = vmatmul.mubr.bf16.gmra.mrb[4].mxu1 %v6014_v15  ;;  %v6077_v14 = vld [vmem:[%s6183_s21 + $0x118] sm:$0xff]  }
  0x2f   : > { %5727 = vmatprep.mubr.bf16.mxu0 %v6015_v16  ;;  %5855 = vmatprep.mubr.bf16.mxu1 %v6016_v17  ;;  %v6078_v15 = vld [vmem:[%s6183_s21 + $0x318] sm:$0xff]   ;;  %v6079_v16 = vld [vmem:[%s6183_s21 + $0x120] sm:$0xff]  }
  0x30   : > { %v6080_v17 = vld [vmem:[%s6183_s21 + $0x320] sm:$0xff]  }
  0x36   : > { %5728 = vmatmul.mubr.bf16.gmra.mrb[8].mxu0 %v6017_v18  ;;  %5856 = vmatmul.mubr.bf16.gmra.mrb[8].mxu1 %v6018_v19  ;;  %v6081_v18 = vld [vmem:[%s6183_s21 + $0x128] sm:$0xff]  }
  0x37   : > { %5731 = vmatprep.mubr.bf16.mxu0 %v6019_v20  ;;  %5859 = vmatprep.mubr.bf16.mxu1 %v6020_v21  ;;  %v6082_v19 = vld [vmem:[%s6183_s21 + $0x328] sm:$0xff]   ;;  %v6083_v20 = vld [vmem:[%s6183_s21 + $0x130] sm:$0xff]  }
  0x38   : > { %v6084_v21 = vld [vmem:[%s6183_s21 + $0x330] sm:$0xff]  }
  0x3e   : > { %5732 = vmatmul.mubr.bf16.gmra.mrb[12].mxu0 %v6021_v22  ;;  %5860 = vmatmul.mubr.bf16.gmra.mrb[12].mxu1 %v6022_v23  ;;  %v6085_v22 = vld [vmem:[%s6183_s21 + $0x138] sm:$0xff]  }
  0x3f   : > { %5735 = vmatprep.mubr.bf16.mxu0 %v6023_v24  ;;  %5863 = vmatprep.mubr.bf16.mxu1 %v6024_v25  ;;  %v6086_v23 = vld [vmem:[%s6183_s21 + $0x338] sm:$0xff]   ;;  %v6087_v24 = vld [vmem:[%s6183_s21 + $0x140] sm:$0xff]  }
  0x40   : > { %v6088_v25 = vld [vmem:[%s6183_s21 + $0x340] sm:$0xff]  }
  0x46   : > { %5736 = vmatmul.mubr.bf16.gmra.mrb[16].mxu0 %v6025_v26  ;;  %5864 = vmatmul.mubr.bf16.gmra.mrb[16].mxu1 %v6026_v27  ;;  %v6089_v26 = vld [vmem:[%s6183_s21 + $0x148] sm:$0xff]  }
  0x47   : > { %5739 = vmatprep.mubr.bf16.mxu0 %v6027_v28  ;;  %5867 = vmatprep.mubr.bf16.mxu1 %v6028_v29  ;;  %v6090_v27 = vld [vmem:[%s6183_s21 + $0x348] sm:$0xff]   ;;  %v6091_v28 = vld [vmem:[%s6183_s21 + $0x150] sm:$0xff]  }
  0x48   : > { %v6092_v29 = vld [vmem:[%s6183_s21 + $0x350] sm:$0xff]  }
  0x4e   : > { %5740 = vmatmul.mubr.bf16.gmra.mrb[20].mxu0 %v6029_v30  ;;  %5868 = vmatmul.mubr.bf16.gmra.mrb[20].mxu1 %v6030_v31  ;;  %v6093_v30 = vld [vmem:[%s6183_s21 + $0x158] sm:$0xff]  }
  0x4f   : > { %5743 = vmatprep.mubr.bf16.mxu0 %v6031_v32  ;;  %5871 = vmatprep.mubr.bf16.mxu1 %v6032_v33  ;;  %v6094_v31 = vld [vmem:[%s6183_s21 + $0x358] sm:$0xff]   ;;  %v6095_v32 = vld [vmem:[%s6183_s21 + $0x160] sm:$0xff]  }
  0x50   : > { %v6096_v33 = vld [vmem:[%s6183_s21 + $0x360] sm:$0xff]  }
  0x56   : > { %5744 = vmatmul.mubr.bf16.gmra.mrb[24].mxu0 %v6033_v34  ;;  %5872 = vmatmul.mubr.bf16.gmra.mrb[24].mxu1 %v6034_v35  ;;  %v6097_v34 = vld [vmem:[%s6183_s21 + $0x168] sm:$0xff]  }
  0x57   : > { %5747 = vmatprep.mubr.bf16.mxu0 %v6035_v36  ;;  %5875 = vmatprep.mubr.bf16.mxu1 %v6036_v37  ;;  %v6098_v35 = vld [vmem:[%s6183_s21 + $0x368] sm:$0xff]   ;;  %v6099_v36 = vld [vmem:[%s6183_s21 + $0x170] sm:$0xff]  }
  0x58   : > { %v6100_v37 = vld [vmem:[%s6183_s21 + $0x370] sm:$0xff]  }
  0x5e   : > { %5748 = vmatmul.mubr.bf16.gmra.mrb[28].mxu0 %v6037_v38  ;;  %5876 = vmatmul.mubr.bf16.gmra.mrb[28].mxu1 %v6038_v39  ;;  %v6101_v38 = vld [vmem:[%s6183_s21 + $0x178] sm:$0xff]  }
  0x5f   : > { %5751 = vmatprep.mubr.bf16.mxu0 %v6039_v40  ;;  %5879 = vmatprep.mubr.bf16.mxu1 %v6040_v41  ;;  %v6102_v39 = vld [vmem:[%s6183_s21 + $0x378] sm:$0xff]   ;;  %v6103_v40 = vld [vmem:[%s6183_s21 + $0x180] sm:$0xff]  }
  0x60   : > { %v6104_v41 = vld [vmem:[%s6183_s21 + $0x380] sm:$0xff]  }
  0x66   : > { %5752 = vmatmul.mubr.bf16.gmra.mrb[32].mxu0 %v6041_v42  ;;  %5880 = vmatmul.mubr.bf16.gmra.mrb[32].mxu1 %v6042_v43  ;;  %v6105_v42 = vld [vmem:[%s6183_s21 + $0x188] sm:$0xff]  }
  0x67   : > { %5755 = vmatprep.mubr.bf16.mxu0 %v6043_v44  ;;  %5883 = vmatprep.mubr.bf16.mxu1 %v6044_v45  ;;  %v6106_v43 = vld [vmem:[%s6183_s21 + $0x388] sm:$0xff]   ;;  %v6107_v44 = vld [vmem:[%s6183_s21 + $0x190] sm:$0xff]  }
  0x68   : > { %v6108_v45 = vld [vmem:[%s6183_s21 + $0x390] sm:$0xff]  }
  0x6e   : > { %5756 = vmatmul.mubr.bf16.gmra.mrb[36].mxu0 %v6045_v46  ;;  %5884 = vmatmul.mubr.bf16.gmra.mrb[36].mxu1 %v6046_v47  ;;  %v6109_v46 = vld [vmem:[%s6183_s21 + $0x198] sm:$0xff]  }
  0x6f   : > { %5759 = vmatprep.mubr.bf16.mxu0 %v6047_v48  ;;  %5887 = vmatprep.mubr.bf16.mxu1 %v6048_v49  ;;  %v6110_v47 = vld [vmem:[%s6183_s21 + $0x398] sm:$0xff]   ;;  %v6111_v48 = vld [vmem:[%s6183_s21 + $0x1a0] sm:$0xff]  }
  0x70   : > { %v6112_v49 = vld [vmem:[%s6183_s21 + $0x3a0] sm:$0xff]  }
  0x76   : > { %5760 = vmatmul.mubr.bf16.gmra.mrb[40].mxu0 %v6049_v50  ;;  %5888 = vmatmul.mubr.bf16.gmra.mrb[40].mxu1 %v6050_v51  ;;  %v6113_v50 = vld [vmem:[%s6183_s21 + $0x1a8] sm:$0xff]  }
  0x77   : > { %5763 = vmatprep.mubr.bf16.mxu0 %v6051_v52  ;;  %5891 = vmatprep.mubr.bf16.mxu1 %v6052_v53  ;;  %v6114_v51 = vld [vmem:[%s6183_s21 + $0x3a8] sm:$0xff]   ;;  %v6115_v52 = vld [vmem:[%s6183_s21 + $0x1b0] sm:$0xff]  }
  0x78   : > { %v6116_v53 = vld [vmem:[%s6183_s21 + $0x3b0] sm:$0xff]  }
  0x7e   : > { %5764 = vmatmul.mubr.bf16.gmra.mrb[44].mxu0 %v6053_v54  ;;  %5892 = vmatmul.mubr.bf16.gmra.mrb[44].mxu1 %v6054_v55  ;;  %v6117_v54 = vld [vmem:[%s6183_s21 + $0x1b8] sm:$0xff]  }
  0x7f   : > { %5767 = vmatprep.mubr.bf16.mxu0 %v6055_v56  ;;  %5895 = vmatprep.mubr.bf16.mxu1 %v6056_v57  ;;  %v6118_v57 = vld [vmem:[%s6183_s21 + $0x3b8] sm:$0xff]  }
  0x86   : > { %5768 = vmatmul.mubr.bf16.gmra.mrb[48].mxu0 %v6057_v58  ;;  %5896 = vmatmul.mubr.bf16.gmra.mrb[48].mxu1 %v6058_v59  ;;  %v6119_v58 = vld [vmem:[%s6183_s21 + $0x1c0] sm:$0xff]  }
  0x87   : > { %5771 = vmatprep.mubr.bf16.mxu0 %v6059_v60  ;;  %5899 = vmatprep.mubr.bf16.mxu1 %v6060_v61  ;;  %v6120_v59 = vld [vmem:[%s6183_s21 + $0x3c0] sm:$0xff]  }
  0x8e   : > { %5772 = vmatmul.mubr.bf16.gmra.mrb[52].mxu0 %v6061_v62  ;;  %5900 = vmatmul.mubr.bf16.gmra.mrb[52].mxu1 %v6062_v63 }
  0x8f   : > { %5775 = vmatprep.mubr.bf16.mxu0 %v6063_v0  ;;  %5903 = vmatprep.mubr.bf16.mxu1 %v6064_v1 }
  0x96   : > { %5776 = vmatmul.mubr.bf16.gmra.mrb[56].mxu0 %v6065_v2  ;;  %5904 = vmatmul.mubr.bf16.gmra.mrb[56].mxu1 %v6066_v3 }
  0x97   : > { %5779 = vmatprep.mubr.bf16.mxu0 %v6067_v4  ;;  %5907 = vmatprep.mubr.bf16.mxu1 %v6068_v5 }
  0x9e   : > { %5780 = vmatmul.mubr.bf16.gmra.mrb[60].mxu0 %v6069_v6  ;;  %5908 = vmatmul.mubr.bf16.gmra.mrb[60].mxu1 %v6070_v7 }
  0x9f   : > { %5783 = vmatprep.mubr.bf16.mxu0 %v6071_v8  ;;  %5911 = vmatprep.mubr.bf16.mxu1 %v6072_v9 }
  0xa6   : > { %5784 = vmatmul.mubr.bf16.gmra.mrb[64].mxu0 %v6073_v10  ;;  %5912 = vmatmul.mubr.bf16.gmra.mrb[64].mxu1 %v6074_v11 }
  0xa7   : > { %5787 = vmatprep.mubr.bf16.mxu0 %v6075_v12  ;;  %5915 = vmatprep.mubr.bf16.mxu1 %v6076_v13 }
  0xae   : > { %5788 = vmatmul.mubr.bf16.gmra.mrb[68].mxu0 %v6077_v14  ;;  %5916 = vmatmul.mubr.bf16.gmra.mrb[68].mxu1 %v6078_v15 }
  0xaf   : > { %5791 = vmatprep.mubr.bf16.mxu0 %v6079_v16  ;;  %5919 = vmatprep.mubr.bf16.mxu1 %v6080_v17 }
  0xb6   : > { %5792 = vmatmul.mubr.bf16.gmra.mrb[72].mxu0 %v6081_v18  ;;  %5920 = vmatmul.mubr.bf16.gmra.mrb[72].mxu1 %v6082_v19 }
  0xb7   : > { %5795 = vmatprep.mubr.bf16.mxu0 %v6083_v20  ;;  %5923 = vmatprep.mubr.bf16.mxu1 %v6084_v21  ;;  %v6121_v20 = vld [vmem:[%s6183_s21 + $0x1c8] sm:$0xff]  }
  0xbe   : > { %5796 = vmatmul.mubr.bf16.gmra.mrb[76].mxu0 %v6085_v22  ;;  %5924 = vmatmul.mubr.bf16.gmra.mrb[76].mxu1 %v6086_v23 }
  0xbf   : > { %5799 = vmatprep.mubr.bf16.mxu0 %v6087_v24  ;;  %5927 = vmatprep.mubr.bf16.mxu1 %v6088_v25  ;;  %v6122_v25 = vld [vmem:[%s6183_s21 + $0x3c8] sm:$0xff]  }
  0xc6   : > { %5800 = vmatmul.mubr.bf16.gmra.mrb[80].mxu0 %v6089_v26  ;;  %5928 = vmatmul.mubr.bf16.gmra.mrb[80].mxu1 %v6090_v27  ;;  %v6123_v26 = vld [vmem:[%s6183_s21 + $0x1d0] sm:$0xff]  }
  0xc7   : > { %5803 = vmatprep.mubr.bf16.mxu0 %v6091_v28  ;;  %5931 = vmatprep.mubr.bf16.mxu1 %v6092_v29  ;;  %v6124_v27 = vld [vmem:[%s6183_s21 + $0x3d0] sm:$0xff]  }
  0xce   : > { %5804 = vmatmul.mubr.bf16.gmra.mrb[84].mxu0 %v6093_v30  ;;  %5932 = vmatmul.mubr.bf16.gmra.mrb[84].mxu1 %v6094_v31 }
  0xcf   : > { %5807 = vmatprep.mubr.bf16.mxu0 %v6095_v32  ;;  %5935 = vmatprep.mubr.bf16.mxu1 %v6096_v33 }
  0xd6   : > { %5808 = vmatmul.mubr.bf16.gmra.mrb[88].mxu0 %v6097_v34  ;;  %5936 = vmatmul.mubr.bf16.gmra.mrb[88].mxu1 %v6098_v35 }
  0xd7   : > { %5811 = vmatprep.mubr.bf16.mxu0 %v6099_v36  ;;  %5939 = vmatprep.mubr.bf16.mxu1 %v6100_v37 }
  0xde   : > { %5812 = vmatmul.mubr.bf16.gmra.mrb[92].mxu0 %v6101_v38  ;;  %5940 = vmatmul.mubr.bf16.gmra.mrb[92].mxu1 %v6102_v39 }
  0xdf   : > { %5815 = vmatprep.mubr.bf16.mxu0 %v6103_v40  ;;  %5943 = vmatprep.mubr.bf16.mxu1 %v6104_v41 }
  0xe6   : > { %5816 = vmatmul.mubr.bf16.gmra.mrb[96].mxu0 %v6105_v42  ;;  %5944 = vmatmul.mubr.bf16.gmra.mrb[96].mxu1 %v6106_v43 }
  0xe7   : > { %5819 = vmatprep.mubr.bf16.mxu0 %v6107_v44  ;;  %5947 = vmatprep.mubr.bf16.mxu1 %v6108_v45 }
  0xee   : > { %5820 = vmatmul.mubr.bf16.gmra.mrb[100].mxu0 %v6109_v46  ;;  %5948 = vmatmul.mubr.bf16.gmra.mrb[100].mxu1 %v6110_v47 }
  0xef   : > { %5823 = vmatprep.mubr.bf16.mxu0 %v6111_v48  ;;  %5951 = vmatprep.mubr.bf16.mxu1 %v6112_v49 }
  0xf6   : > { %5824 = vmatmul.mubr.bf16.gmra.mrb[104].mxu0 %v6113_v50  ;;  %5952 = vmatmul.mubr.bf16.gmra.mrb[104].mxu1 %v6114_v51 }
  0xf7   : > { %5827 = vmatprep.mubr.bf16.mxu0 %v6115_v52  ;;  %5955 = vmatprep.mubr.bf16.mxu1 %v6116_v53  ;;  %v6125_v52 = vld [vmem:[%s6183_s21 + $0x1d8] sm:$0xff]  }
  0xf9   : > { %v5721_v55 = vpop.f32.mrb[0].mxu0  ;;  %v5849_v56 = vpop.f32.mrb[0].mxu1 }
  0xfa   : > { %v2295_v60 = vmul.f32 0.2, %v5721_v55  ;;  %v2423_v61 = vmul.f32 0.2, %v5849_v56  ;;  %v1270_v62 = vpop.f32.mrb[1].mxu0  ;;  %v1782_v63 = vpop.f32.mrb[1].mxu1 }
  0xfb   : > { %v2293_v0 = vmul.f32 0.2, %v1270_v62  ;;  %v2421_v1 = vmul.f32 0.2, %v1782_v63  ;;  %v5722_v2 = vpop.f32.mrb[2].mxu0  ;;  %v5850_v3 = vpop.f32.mrb[2].mxu1 }
  0xfc   : > { %v2296_v4 = vmul.f32 0.2, %v5722_v2  ;;  %v2424_v5 = vmul.f32 0.2, %v5850_v3  ;;  %v1273_v6 = vpop.f32.mrb[3].mxu0  ;;  %v1785_v7 = vpop.f32.mrb[3].mxu1  ;;  %v2551_v8 = vmax.f32 %v5721_v55, %v2295_v60  ;;  %v2679_v9 = vmax.f32 %v5849_v56, %v2423_v61 }
  0xfd   : > { %v2294_v10 = vmul.f32 0.2, %v1273_v6  ;;  %v2422_v11 = vmul.f32 0.2, %v1785_v7  ;;  %v2549_v12 = vmax.f32 %v1270_v62, %v2293_v0  ;;  %v2677_v15 = vmax.f32 %v1782_v63, %v2421_v1 }
  0xfe   : > { %v2552_v13 = vmax.f32 %v5722_v2, %v2296_v4  ;;  %v2680_v14 = vmax.f32 %v5850_v3, %v2424_v5  ;;  %5828 = vmatmul.mubr.bf16.gmra.mrb[108].mxu0 %v6117_v54  ;;  %5956 = vmatmul.mubr.bf16.gmra.mrb[108].mxu1 %v6118_v57  ;;  %v6126_v57 = vld [vmem:[%s6183_s21 + $0x3d8] sm:$0xff]  }
  0xff   : > { %v2550_v16 = vmax.f32 %v1273_v6, %v2294_v10  ;;  %v2678_v17 = vmax.f32 %v1785_v7, %v2422_v11  ;;  %5831 = vmatprep.mubr.bf16.mxu0 %v6119_v58  ;;  %5959 = vmatprep.mubr.bf16.mxu1 %v6120_v59  ;;  %v6127_v58 = vld [vmem:[%s6183_s21 + $0x1e0] sm:$0xff]  }
 0x100   : > { %v4808_v18 = vpack.c.bf16 %v2552_v13, %v2551_v8  ;;  %v5128_v19 = vpack.c.bf16 %v2680_v14, %v2679_v9  ;;  %v6128_v59 = vld [vmem:[%s6183_s21 + $0x3e0] sm:$0xff]  }
 0x101   : > { %v4803_v21 = vpack.c.bf16 %v2550_v16, %v2549_v12  ;;  %v5123_v22 = vpack.c.bf16 %v2678_v17, %v2677_v15  ;;  %v5725_v23 = vpop.f32.mrb[4].mxu0  ;;  %v5853_v24 = vpop.f32.mrb[4].mxu1 }
 0x102   : > { %5440 = vst [vmem:[%s6319_s6 + $0x8] sm:$0xff] %v4808_v18   ;;  %5504 = vst [vmem:[%s6319_s6 + $0x208] sm:$0xff] %v5128_v19   ;;  %v2299_v28 = vmul.f32 0.2, %v5725_v23  ;;  %v2427_v29 = vmul.f32 0.2, %v5853_v24 }
 0x103   : > { %v1286_v30 = vpop.f32.mrb[5].mxu0  ;;  %v1798_v31 = vpop.f32.mrb[5].mxu1  ;;  %4804 = vst [vmem:[%s6319_s6] sm:$0xff] %v4803_v21   ;;  %5503 = vst [vmem:[%s6319_s6 + $0x200] sm:$0xff] %v5123_v22  }
 0x104   : > { %v2297_v32 = vmul.f32 0.2, %v1286_v30  ;;  %v2425_v33 = vmul.f32 0.2, %v1798_v31  ;;  %v5726_v34 = vpop.f32.mrb[6].mxu0  ;;  %v5854_v35 = vpop.f32.mrb[6].mxu1  ;;  %v2555_v40 = vmax.f32 %v5725_v23, %v2299_v28  ;;  %v2683_v41 = vmax.f32 %v5853_v24, %v2427_v29 }
 0x105   : > { %v2300_v36 = vmul.f32 0.2, %v5726_v34  ;;  %v2428_v37 = vmul.f32 0.2, %v5854_v35  ;;  %v1289_v38 = vpop.f32.mrb[7].mxu0  ;;  %v1801_v39 = vpop.f32.mrb[7].mxu1 }
 0x106   : > { %v2298_v42 = vmul.f32 0.2, %v1289_v38  ;;  %v2426_v43 = vmul.f32 0.2, %v1801_v39  ;;  %v2553_v44 = vmax.f32 %v1286_v30, %v2297_v32  ;;  %5832 = vmatmul.mubr.bf16.gmra.mrb[112].mxu0 %v6121_v20  ;;  %5960 = vmatmul.mubr.bf16.gmra.mrb[112].mxu1 %v6122_v25  ;;  %v2681_v47 = vmax.f32 %v1798_v31, %v2425_v33  ;;  %v6129_v20 = vld [vmem:[%s6183_s21 + $0x1e8] sm:$0xff]  }
 0x107   : > { %v2556_v45 = vmax.f32 %v5726_v34, %v2300_v36  ;;  %v2684_v46 = vmax.f32 %v5854_v35, %v2428_v37  ;;  %5835 = vmatprep.mubr.bf16.mxu0 %v6123_v26  ;;  %5963 = vmatprep.mubr.bf16.mxu1 %v6124_v27  ;;  %v6130_v25 = vld [vmem:[%s6183_s21 + $0x3e8] sm:$0xff]   ;;  %v6131_v26 = vld [vmem:[%s6183_s21 + $0x1f0] sm:$0xff]  }
 0x108   : > { %v2554_v48 = vmax.f32 %v1289_v38, %v2298_v42  ;;  %v2682_v49 = vmax.f32 %v1801_v39, %v2426_v43  ;;  %v6132_v27 = vld [vmem:[%s6183_s21 + $0x3f0] sm:$0xff]  }
 0x109   : > { %v4818_v50 = vpack.c.bf16 %v2556_v45, %v2555_v40  ;;  %v5138_v51 = vpack.c.bf16 %v2684_v46, %v2683_v41  ;;  %v5729_v55 = vpop.f32.mrb[8].mxu0  ;;  %v5857_v56 = vpop.f32.mrb[8].mxu1 }
 0x10a   : > { %v4813_v53 = vpack.c.bf16 %v2554_v48, %v2553_v44  ;;  %v5133_v54 = vpack.c.bf16 %v2682_v49, %v2681_v47  ;;  %v2303_v60 = vmul.f32 0.2, %v5729_v55  ;;  %v2431_v61 = vmul.f32 0.2, %v5857_v56  ;;  %v1302_v62 = vpop.f32.mrb[9].mxu0  ;;  %v1814_v63 = vpop.f32.mrb[9].mxu1 }
 0x10b   : > { %5442 = vst [vmem:[%s6319_s6 + $0x18] sm:$0xff] %v4818_v50   ;;  %5506 = vst [vmem:[%s6319_s6 + $0x218] sm:$0xff] %v5138_v51   ;;  %v2301_v0 = vmul.f32 0.2, %v1302_v62  ;;  %v2429_v1 = vmul.f32 0.2, %v1814_v63 }
 0x10c   : > { %5441 = vst [vmem:[%s6319_s6 + $0x10] sm:$0xff] %v4813_v53   ;;  %5505 = vst [vmem:[%s6319_s6 + $0x210] sm:$0xff] %v5133_v54   ;;  %v5730_v2 = vpop.f32.mrb[10].mxu0  ;;  %v5858_v3 = vpop.f32.mrb[10].mxu1  ;;  %v2559_v8 = vmax.f32 %v5729_v55, %v2303_v60  ;;  %v2687_v9 = vmax.f32 %v5857_v56, %v2431_v61  ;;  %v6133_v56 = vld [vmem:[%s6183_s21 + $0x1f8] sm:$0xff]  }
 0x10d   : > { %v2304_v4 = vmul.f32 0.2, %v5730_v2  ;;  %v2432_v5 = vmul.f32 0.2, %v5858_v3  ;;  %v1305_v6 = vpop.f32.mrb[11].mxu0  ;;  %v1817_v7 = vpop.f32.mrb[11].mxu1  ;;  %v2557_v12 = vmax.f32 %v1302_v62, %v2301_v0  ;;  %v2685_v15 = vmax.f32 %v1814_v63, %v2429_v1 }
 0x10e   : > { %v2302_v10 = vmul.f32 0.2, %v1305_v6  ;;  %v2430_v11 = vmul.f32 0.2, %v1817_v7  ;;  %5836 = vmatmul.mubr.bf16.gmra.mrb[116].mxu0 %v6125_v52  ;;  %5964 = vmatmul.mubr.bf16.gmra.mrb[116].mxu1 %v6126_v57  ;;  %v6134_v57 = vld [vmem:[%s6183_s21 + $0x3f8] sm:$0xff]  }
 0x10f   : > { %v2560_v13 = vmax.f32 %v5730_v2, %v2304_v4  ;;  %v2688_v14 = vmax.f32 %v5858_v3, %v2432_v5  ;;  %5839 = vmatprep.mubr.bf16.mxu0 %v6127_v58  ;;  %5967 = vmatprep.mubr.bf16.mxu1 %v6128_v59 }
 0x110   : > { %v2558_v16 = vmax.f32 %v1305_v6, %v2302_v10  ;;  %v2686_v17 = vmax.f32 %v1817_v7, %v2430_v11 }
 0x111   : > { %v4828_v18 = vpack.c.bf16 %v2560_v13, %v2559_v8  ;;  %v5148_v19 = vpack.c.bf16 %v2688_v14, %v2687_v9  ;;  %v5733_v23 = vpop.f32.mrb[12].mxu0  ;;  %v5861_v24 = vpop.f32.mrb[12].mxu1 }
 0x112   : > { %v4823_v21 = vpack.c.bf16 %v2558_v16, %v2557_v12  ;;  %v5143_v22 = vpack.c.bf16 %v2686_v17, %v2685_v15  ;;  %v2307_v28 = vmul.f32 0.2, %v5733_v23  ;;  %v2435_v29 = vmul.f32 0.2, %v5861_v24  ;;  %v1318_v30 = vpop.f32.mrb[13].mxu0  ;;  %v1830_v31 = vpop.f32.mrb[13].mxu1 }
 0x113   : > { %5444 = vst [vmem:[%s6319_s6 + $0x28] sm:$0xff] %v4828_v18   ;;  %5508 = vst [vmem:[%s6319_s6 + $0x228] sm:$0xff] %v5148_v19   ;;  %v2305_v32 = vmul.f32 0.2, %v1318_v30  ;;  %v2433_v33 = vmul.f32 0.2, %v1830_v31 }
 0x114   : > { %5443 = vst [vmem:[%s6319_s6 + $0x20] sm:$0xff] %v4823_v21   ;;  %5507 = vst [vmem:[%s6319_s6 + $0x220] sm:$0xff] %v5143_v22   ;;  %v5734_v34 = vpop.f32.mrb[14].mxu0  ;;  %v5862_v35 = vpop.f32.mrb[14].mxu1  ;;  %v2563_v40 = vmax.f32 %v5733_v23, %v2307_v28  ;;  %v2691_v41 = vmax.f32 %v5861_v24, %v2435_v29 }
 0x115   : > { %v2308_v36 = vmul.f32 0.2, %v5734_v34  ;;  %v2436_v37 = vmul.f32 0.2, %v5862_v35  ;;  %v1321_v38 = vpop.f32.mrb[15].mxu0  ;;  %v1833_v39 = vpop.f32.mrb[15].mxu1  ;;  %v2561_v44 = vmax.f32 %v1318_v30, %v2305_v32  ;;  %v2689_v47 = vmax.f32 %v1830_v31, %v2433_v33 }
 0x116   : > { %v2306_v42 = vmul.f32 0.2, %v1321_v38  ;;  %v2434_v43 = vmul.f32 0.2, %v1833_v39  ;;  %5840 = vmatmul.mubr.bf16.gmra.mrb[120].mxu0 %v6129_v20  ;;  %5968 = vmatmul.mubr.bf16.gmra.mrb[120].mxu1 %v6130_v25 }
 0x117   : > { %v2564_v45 = vmax.f32 %v5734_v34, %v2308_v36  ;;  %v2692_v46 = vmax.f32 %v5862_v35, %v2436_v37  ;;  %5843 = vmatprep.mubr.bf16.mxu0 %v6131_v26  ;;  %5971 = vmatprep.mubr.bf16.mxu1 %v6132_v27 }
 0x118   : > { %v2562_v48 = vmax.f32 %v1321_v38, %v2306_v42  ;;  %v2690_v49 = vmax.f32 %v1833_v39, %v2434_v43 }
 0x119   : > { %v4838_v50 = vpack.c.bf16 %v2564_v45, %v2563_v40  ;;  %v5158_v51 = vpack.c.bf16 %v2692_v46, %v2691_v41  ;;  %v5737_v54 = vpop.f32.mrb[16].mxu0  ;;  %v5865_v55 = vpop.f32.mrb[16].mxu1 }
 0x11a   : > { %v4833_v52 = vpack.c.bf16 %v2562_v48, %v2561_v44  ;;  %v5153_v53 = vpack.c.bf16 %v2690_v49, %v2689_v47  ;;  %v2311_v58 = vmul.f32 0.2, %v5737_v54  ;;  %v2439_v59 = vmul.f32 0.2, %v5865_v55  ;;  %v1334_v60 = vpop.f32.mrb[17].mxu0  ;;  %v1846_v61 = vpop.f32.mrb[17].mxu1 }
 0x11b   : > { %5446 = vst [vmem:[%s6319_s6 + $0x38] sm:$0xff] %v4838_v50   ;;  %5510 = vst [vmem:[%s6319_s6 + $0x238] sm:$0xff] %v5158_v51   ;;  %v2309_v62 = vmul.f32 0.2, %v1334_v60  ;;  %v2437_v63 = vmul.f32 0.2, %v1846_v61 }
 0x11c   : > { %5445 = vst [vmem:[%s6319_s6 + $0x30] sm:$0xff] %v4833_v52   ;;  %5509 = vst [vmem:[%s6319_s6 + $0x230] sm:$0xff] %v5153_v53   ;;  %v5738_v0 = vpop.f32.mrb[18].mxu0  ;;  %v5866_v1 = vpop.f32.mrb[18].mxu1  ;;  %v2567_v6 = vmax.f32 %v5737_v54, %v2311_v58  ;;  %v2695_v9 = vmax.f32 %v5865_v55, %v2439_v59 }
 0x11d   : > { %v2312_v2 = vmul.f32 0.2, %v5738_v0  ;;  %v2440_v3 = vmul.f32 0.2, %v5866_v1  ;;  %v1337_v4 = vpop.f32.mrb[19].mxu0  ;;  %v1849_v5 = vpop.f32.mrb[19].mxu1  ;;  %v2565_v12 = vmax.f32 %v1334_v60, %v2309_v62  ;;  %v2693_v13 = vmax.f32 %v1846_v61, %v2437_v63 }
 0x11e   : > { %v2310_v7 = vmul.f32 0.2, %v1337_v4  ;;  %v2438_v8 = vmul.f32 0.2, %v1849_v5  ;;  %5844 = vmatmul.mubr.bf16.gmra.mrb[124].mxu0 %v6133_v56  ;;  %5972 = vmatmul.mubr.bf16.gmra.mrb[124].mxu1 %v6134_v57 }
 0x11f   : > { %v2568_v10 = vmax.f32 %v5738_v0, %v2312_v2  ;;  %v2696_v11 = vmax.f32 %v5866_v1, %v2440_v3 }
 0x120   : > { %v2566_v14 = vmax.f32 %v1337_v4, %v2310_v7  ;;  %v2694_v15 = vmax.f32 %v1849_v5, %v2438_v8 }
 0x121   : > { %v4848_v16 = vpack.c.bf16 %v2568_v10, %v2567_v6  ;;  %v5168_v17 = vpack.c.bf16 %v2696_v11, %v2695_v9  ;;  %v5741_v20 = vpop.f32.mrb[20].mxu0  ;;  %v5869_v21 = vpop.f32.mrb[20].mxu1 }
 0x122   : > { %v4843_v18 = vpack.c.bf16 %v2566_v14, %v2565_v12  ;;  %v5163_v19 = vpack.c.bf16 %v2694_v15, %v2693_v13  ;;  %v2315_v22 = vmul.f32 0.2, %v5741_v20  ;;  %v2443_v23 = vmul.f32 0.2, %v5869_v21  ;;  %v1350_v24 = vpop.f32.mrb[21].mxu0  ;;  %v1862_v25 = vpop.f32.mrb[21].mxu1 }
 0x123   : > { %5448 = vst [vmem:[%s6319_s6 + $0x48] sm:$0xff] %v4848_v16   ;;  %5512 = vst [vmem:[%s6319_s6 + $0x248] sm:$0xff] %v5168_v17   ;;  %v2313_v26 = vmul.f32 0.2, %v1350_v24  ;;  %v2441_v27 = vmul.f32 0.2, %v1862_v25 }
 0x124   : > { %5447 = vst [vmem:[%s6319_s6 + $0x40] sm:$0xff] %v4843_v18   ;;  %5511 = vst [vmem:[%s6319_s6 + $0x240] sm:$0xff] %v5163_v19   ;;  %v5742_v28 = vpop.f32.mrb[22].mxu0  ;;  %v5870_v29 = vpop.f32.mrb[22].mxu1  ;;  %v2571_v36 = vmax.f32 %v5741_v20, %v2315_v22  ;;  %v2699_v37 = vmax.f32 %v5869_v21, %v2443_v23 }
 0x125   : > { %v2316_v30 = vmul.f32 0.2, %v5742_v28  ;;  %v2444_v31 = vmul.f32 0.2, %v5870_v29  ;;  %v1353_v32 = vpop.f32.mrb[23].mxu0  ;;  %v1865_v33 = vpop.f32.mrb[23].mxu1  ;;  %v2569_v40 = vmax.f32 %v1350_v24, %v2313_v26  ;;  %v2697_v41 = vmax.f32 %v1862_v25, %v2441_v27 }
 0x126   : > { %v2314_v34 = vmul.f32 0.2, %v1353_v32  ;;  %v2442_v35 = vmul.f32 0.2, %v1865_v33 }
 0x127   : > { %v2572_v38 = vmax.f32 %v5742_v28, %v2316_v30  ;;  %v2700_v39 = vmax.f32 %v5870_v29, %v2444_v31 }
 0x128   : > { %v2570_v42 = vmax.f32 %v1353_v32, %v2314_v34  ;;  %v2698_v43 = vmax.f32 %v1865_v33, %v2442_v35 }
 0x129   : > { %v4858_v44 = vpack.c.bf16 %v2572_v38, %v2571_v36  ;;  %v5178_v45 = vpack.c.bf16 %v2700_v39, %v2699_v37  ;;  %v5745_v48 = vpop.f32.mrb[24].mxu0  ;;  %v5873_v49 = vpop.f32.mrb[24].mxu1 }
 0x12a   : > { %v4853_v46 = vpack.c.bf16 %v2570_v42, %v2569_v40  ;;  %v5173_v47 = vpack.c.bf16 %v2698_v43, %v2697_v41  ;;  %v2319_v50 = vmul.f32 0.2, %v5745_v48  ;;  %v2447_v51 = vmul.f32 0.2, %v5873_v49  ;;  %v1366_v52 = vpop.f32.mrb[25].mxu0  ;;  %v1878_v53 = vpop.f32.mrb[25].mxu1 }
 0x12b   : > { %5450 = vst [vmem:[%s6319_s6 + $0x58] sm:$0xff] %v4858_v44   ;;  %5514 = vst [vmem:[%s6319_s6 + $0x258] sm:$0xff] %v5178_v45   ;;  %v2317_v54 = vmul.f32 0.2, %v1366_v52  ;;  %v2445_v55 = vmul.f32 0.2, %v1878_v53 }
 0x12c   : > { %5449 = vst [vmem:[%s6319_s6 + $0x50] sm:$0xff] %v4853_v46   ;;  %5513 = vst [vmem:[%s6319_s6 + $0x250] sm:$0xff] %v5173_v47   ;;  %v5746_v56 = vpop.f32.mrb[26].mxu0  ;;  %v5874_v57 = vpop.f32.mrb[26].mxu1  ;;  %v2575_v0 = vmax.f32 %v5745_v48, %v2319_v50  ;;  %v2703_v1 = vmax.f32 %v5873_v49, %v2447_v51 }
 0x12d   : > { %v2320_v58 = vmul.f32 0.2, %v5746_v56  ;;  %v2448_v59 = vmul.f32 0.2, %v5874_v57  ;;  %v1369_v60 = vpop.f32.mrb[27].mxu0  ;;  %v1881_v61 = vpop.f32.mrb[27].mxu1  ;;  %v2573_v4 = vmax.f32 %v1366_v52, %v2317_v54  ;;  %v2701_v5 = vmax.f32 %v1878_v53, %v2445_v55 }
 0x12e   : > { %v2318_v62 = vmul.f32 0.2, %v1369_v60  ;;  %v2446_v63 = vmul.f32 0.2, %v1881_v61 }
 0x12f   : > { %v2576_v2 = vmax.f32 %v5746_v56, %v2320_v58  ;;  %v2704_v3 = vmax.f32 %v5874_v57, %v2448_v59 }
 0x130   : > { %v2574_v6 = vmax.f32 %v1369_v60, %v2318_v62  ;;  %v2702_v7 = vmax.f32 %v1881_v61, %v2446_v63 }
 0x131   : > { %v4868_v8 = vpack.c.bf16 %v2576_v2, %v2575_v0  ;;  %v5188_v9 = vpack.c.bf16 %v2704_v3, %v2703_v1  ;;  %v5749_v12 = vpop.f32.mrb[28].mxu0  ;;  %v5877_v13 = vpop.f32.mrb[28].mxu1 }
 0x132   : > { %v4863_v10 = vpack.c.bf16 %v2574_v6, %v2573_v4  ;;  %v5183_v11 = vpack.c.bf16 %v2702_v7, %v2701_v5  ;;  %v2323_v14 = vmul.f32 0.2, %v5749_v12  ;;  %v2451_v15 = vmul.f32 0.2, %v5877_v13  ;;  %v1382_v16 = vpop.f32.mrb[29].mxu0  ;;  %v1894_v17 = vpop.f32.mrb[29].mxu1 }
 0x133   : > { %5452 = vst [vmem:[%s6319_s6 + $0x68] sm:$0xff] %v4868_v8   ;;  %5516 = vst [vmem:[%s6319_s6 + $0x268] sm:$0xff] %v5188_v9   ;;  %v2321_v18 = vmul.f32 0.2, %v1382_v16  ;;  %v2449_v19 = vmul.f32 0.2, %v1894_v17 }
 0x134   : > { %5451 = vst [vmem:[%s6319_s6 + $0x60] sm:$0xff] %v4863_v10   ;;  %5515 = vst [vmem:[%s6319_s6 + $0x260] sm:$0xff] %v5183_v11   ;;  %v5750_v20 = vpop.f32.mrb[30].mxu0  ;;  %v5878_v21 = vpop.f32.mrb[30].mxu1  ;;  %v2579_v28 = vmax.f32 %v5749_v12, %v2323_v14  ;;  %v2707_v29 = vmax.f32 %v5877_v13, %v2451_v15 }
 0x135   : > { %v2324_v22 = vmul.f32 0.2, %v5750_v20  ;;  %v2452_v23 = vmul.f32 0.2, %v5878_v21  ;;  %v1385_v24 = vpop.f32.mrb[31].mxu0  ;;  %v1897_v25 = vpop.f32.mrb[31].mxu1  ;;  %v2577_v32 = vmax.f32 %v1382_v16, %v2321_v18  ;;  %v2705_v33 = vmax.f32 %v1894_v17, %v2449_v19 }
 0x136   : > { %v2322_v26 = vmul.f32 0.2, %v1385_v24  ;;  %v2450_v27 = vmul.f32 0.2, %v1897_v25 }
 0x137   : > { %v2580_v30 = vmax.f32 %v5750_v20, %v2324_v22  ;;  %v2708_v31 = vmax.f32 %v5878_v21, %v2452_v23 }
 0x138   : > { %v2578_v34 = vmax.f32 %v1385_v24, %v2322_v26  ;;  %v2706_v35 = vmax.f32 %v1897_v25, %v2450_v27 }
 0x139   : > { %v4878_v36 = vpack.c.bf16 %v2580_v30, %v2579_v28  ;;  %v5198_v37 = vpack.c.bf16 %v2708_v31, %v2707_v29  ;;  %v5753_v40 = vpop.f32.mrb[32].mxu0  ;;  %v5881_v41 = vpop.f32.mrb[32].mxu1 }
 0x13a   : > { %v4873_v38 = vpack.c.bf16 %v2578_v34, %v2577_v32  ;;  %v5193_v39 = vpack.c.bf16 %v2706_v35, %v2705_v33  ;;  %v2327_v42 = vmul.f32 0.2, %v5753_v40  ;;  %v2455_v43 = vmul.f32 0.2, %v5881_v41  ;;  %v1398_v44 = vpop.f32.mrb[33].mxu0  ;;  %v1910_v45 = vpop.f32.mrb[33].mxu1 }
 0x13b   : > { %5454 = vst [vmem:[%s6319_s6 + $0x78] sm:$0xff] %v4878_v36   ;;  %5518 = vst [vmem:[%s6319_s6 + $0x278] sm:$0xff] %v5198_v37   ;;  %v2325_v46 = vmul.f32 0.2, %v1398_v44  ;;  %v2453_v47 = vmul.f32 0.2, %v1910_v45 }
 0x13c   : > { %5453 = vst [vmem:[%s6319_s6 + $0x70] sm:$0xff] %v4873_v38   ;;  %5517 = vst [vmem:[%s6319_s6 + $0x270] sm:$0xff] %v5193_v39   ;;  %v5754_v48 = vpop.f32.mrb[34].mxu0  ;;  %v5882_v49 = vpop.f32.mrb[34].mxu1  ;;  %v2583_v56 = vmax.f32 %v5753_v40, %v2327_v42  ;;  %v2711_v57 = vmax.f32 %v5881_v41, %v2455_v43 }
 0x13d   : > { %v2328_v50 = vmul.f32 0.2, %v5754_v48  ;;  %v2456_v51 = vmul.f32 0.2, %v5882_v49  ;;  %v1401_v52 = vpop.f32.mrb[35].mxu0  ;;  %v1913_v53 = vpop.f32.mrb[35].mxu1  ;;  %v2581_v60 = vmax.f32 %v1398_v44, %v2325_v46  ;;  %v2709_v61 = vmax.f32 %v1910_v45, %v2453_v47 }
 0x13e   : > { %v2326_v54 = vmul.f32 0.2, %v1401_v52  ;;  %v2454_v55 = vmul.f32 0.2, %v1913_v53 }
 0x13f   : > { %v2584_v58 = vmax.f32 %v5754_v48, %v2328_v50  ;;  %v2712_v59 = vmax.f32 %v5882_v49, %v2456_v51 }
 0x140   : > { %v2582_v62 = vmax.f32 %v1401_v52, %v2326_v54  ;;  %v2710_v63 = vmax.f32 %v1913_v53, %v2454_v55 }
 0x141   : > { %v4888_v0 = vpack.c.bf16 %v2584_v58, %v2583_v56  ;;  %v5208_v1 = vpack.c.bf16 %v2712_v59, %v2711_v57  ;;  %v5757_v4 = vpop.f32.mrb[36].mxu0  ;;  %v5885_v5 = vpop.f32.mrb[36].mxu1 }
 0x142   : > { %v4883_v2 = vpack.c.bf16 %v2582_v62, %v2581_v60  ;;  %v5203_v3 = vpack.c.bf16 %v2710_v63, %v2709_v61  ;;  %v2331_v6 = vmul.f32 0.2, %v5757_v4  ;;  %v2459_v7 = vmul.f32 0.2, %v5885_v5  ;;  %v1414_v8 = vpop.f32.mrb[37].mxu0  ;;  %v1926_v9 = vpop.f32.mrb[37].mxu1 }
 0x143   : > { %5456 = vst [vmem:[%s6319_s6 + $0x88] sm:$0xff] %v4888_v0   ;;  %5520 = vst [vmem:[%s6319_s6 + $0x288] sm:$0xff] %v5208_v1   ;;  %v2329_v10 = vmul.f32 0.2, %v1414_v8  ;;  %v2457_v11 = vmul.f32 0.2, %v1926_v9 }
 0x144   : > { %5455 = vst [vmem:[%s6319_s6 + $0x80] sm:$0xff] %v4883_v2   ;;  %5519 = vst [vmem:[%s6319_s6 + $0x280] sm:$0xff] %v5203_v3   ;;  %v5758_v12 = vpop.f32.mrb[38].mxu0  ;;  %v5886_v13 = vpop.f32.mrb[38].mxu1  ;;  %v2587_v20 = vmax.f32 %v5757_v4, %v2331_v6  ;;  %v2715_v21 = vmax.f32 %v5885_v5, %v2459_v7 }
 0x145   : > { %v2332_v14 = vmul.f32 0.2, %v5758_v12  ;;  %v2460_v15 = vmul.f32 0.2, %v5886_v13  ;;  %v1417_v16 = vpop.f32.mrb[39].mxu0  ;;  %v1929_v17 = vpop.f32.mrb[39].mxu1  ;;  %v2585_v24 = vmax.f32 %v1414_v8, %v2329_v10  ;;  %v2713_v25 = vmax.f32 %v1926_v9, %v2457_v11 }
 0x146   : > { %v2330_v18 = vmul.f32 0.2, %v1417_v16  ;;  %v2458_v19 = vmul.f32 0.2, %v1929_v17 }
 0x147   : > { %v2588_v22 = vmax.f32 %v5758_v12, %v2332_v14  ;;  %v2716_v23 = vmax.f32 %v5886_v13, %v2460_v15 }
 0x148   : > { %v2586_v26 = vmax.f32 %v1417_v16, %v2330_v18  ;;  %v2714_v27 = vmax.f32 %v1929_v17, %v2458_v19 }
 0x149   : > { %v4898_v28 = vpack.c.bf16 %v2588_v22, %v2587_v20  ;;  %v5218_v29 = vpack.c.bf16 %v2716_v23, %v2715_v21  ;;  %v5761_v32 = vpop.f32.mrb[40].mxu0  ;;  %v5889_v33 = vpop.f32.mrb[40].mxu1 }
 0x14a   : > { %v4893_v30 = vpack.c.bf16 %v2586_v26, %v2585_v24  ;;  %v5213_v31 = vpack.c.bf16 %v2714_v27, %v2713_v25  ;;  %v2335_v34 = vmul.f32 0.2, %v5761_v32  ;;  %v2463_v35 = vmul.f32 0.2, %v5889_v33  ;;  %v1430_v36 = vpop.f32.mrb[41].mxu0  ;;  %v1942_v37 = vpop.f32.mrb[41].mxu1 }
 0x14b   : > { %5458 = vst [vmem:[%s6319_s6 + $0x98] sm:$0xff] %v4898_v28   ;;  %5522 = vst [vmem:[%s6319_s6 + $0x298] sm:$0xff] %v5218_v29   ;;  %v2333_v38 = vmul.f32 0.2, %v1430_v36  ;;  %v2461_v39 = vmul.f32 0.2, %v1942_v37 }
 0x14c   : > { %5457 = vst [vmem:[%s6319_s6 + $0x90] sm:$0xff] %v4893_v30   ;;  %5521 = vst [vmem:[%s6319_s6 + $0x290] sm:$0xff] %v5213_v31   ;;  %v5762_v40 = vpop.f32.mrb[42].mxu0  ;;  %v5890_v41 = vpop.f32.mrb[42].mxu1  ;;  %v2591_v48 = vmax.f32 %v5761_v32, %v2335_v34  ;;  %v2719_v49 = vmax.f32 %v5889_v33, %v2463_v35 }
 0x14d   : > { %v2336_v42 = vmul.f32 0.2, %v5762_v40  ;;  %v2464_v43 = vmul.f32 0.2, %v5890_v41  ;;  %v1433_v44 = vpop.f32.mrb[43].mxu0  ;;  %v1945_v45 = vpop.f32.mrb[43].mxu1  ;;  %v2589_v52 = vmax.f32 %v1430_v36, %v2333_v38  ;;  %v2717_v53 = vmax.f32 %v1942_v37, %v2461_v39 }
 0x14e   : > { %v2334_v46 = vmul.f32 0.2, %v1433_v44  ;;  %v2462_v47 = vmul.f32 0.2, %v1945_v45 }
 0x14f   : > { %v2592_v50 = vmax.f32 %v5762_v40, %v2336_v42  ;;  %v2720_v51 = vmax.f32 %v5890_v41, %v2464_v43 }
 0x150   : > { %v2590_v54 = vmax.f32 %v1433_v44, %v2334_v46  ;;  %v2718_v55 = vmax.f32 %v1945_v45, %v2462_v47 }
 0x151   : > { %v4908_v56 = vpack.c.bf16 %v2592_v50, %v2591_v48  ;;  %v5228_v57 = vpack.c.bf16 %v2720_v51, %v2719_v49  ;;  %v5765_v60 = vpop.f32.mrb[44].mxu0  ;;  %v5893_v61 = vpop.f32.mrb[44].mxu1 }
 0x152   : > { %v4903_v58 = vpack.c.bf16 %v2590_v54, %v2589_v52  ;;  %v5223_v59 = vpack.c.bf16 %v2718_v55, %v2717_v53  ;;  %v2339_v62 = vmul.f32 0.2, %v5765_v60  ;;  %v2467_v63 = vmul.f32 0.2, %v5893_v61  ;;  %v1446_v0 = vpop.f32.mrb[45].mxu0  ;;  %v1958_v1 = vpop.f32.mrb[45].mxu1 }
 0x153   : > { %5460 = vst [vmem:[%s6319_s6 + $0xa8] sm:$0xff] %v4908_v56   ;;  %5524 = vst [vmem:[%s6319_s6 + $0x2a8] sm:$0xff] %v5228_v57   ;;  %v2337_v2 = vmul.f32 0.2, %v1446_v0  ;;  %v2465_v3 = vmul.f32 0.2, %v1958_v1 }
 0x154   : > { %5459 = vst [vmem:[%s6319_s6 + $0xa0] sm:$0xff] %v4903_v58   ;;  %5523 = vst [vmem:[%s6319_s6 + $0x2a0] sm:$0xff] %v5223_v59   ;;  %v5766_v4 = vpop.f32.mrb[46].mxu0  ;;  %v5894_v5 = vpop.f32.mrb[46].mxu1  ;;  %v2595_v12 = vmax.f32 %v5765_v60, %v2339_v62  ;;  %v2723_v13 = vmax.f32 %v5893_v61, %v2467_v63 }
 0x155   : > { %v2340_v6 = vmul.f32 0.2, %v5766_v4  ;;  %v2468_v7 = vmul.f32 0.2, %v5894_v5  ;;  %v1449_v8 = vpop.f32.mrb[47].mxu0  ;;  %v1961_v9 = vpop.f32.mrb[47].mxu1  ;;  %v2593_v16 = vmax.f32 %v1446_v0, %v2337_v2  ;;  %v2721_v17 = vmax.f32 %v1958_v1, %v2465_v3 }
 0x156   : > { %v2338_v10 = vmul.f32 0.2, %v1449_v8  ;;  %v2466_v11 = vmul.f32 0.2, %v1961_v9 }
 0x157   : > { %v2596_v14 = vmax.f32 %v5766_v4, %v2340_v6  ;;  %v2724_v15 = vmax.f32 %v5894_v5, %v2468_v7 }
 0x158   : > { %v2594_v18 = vmax.f32 %v1449_v8, %v2338_v10  ;;  %v2722_v19 = vmax.f32 %v1961_v9, %v2466_v11 }
 0x159   : > { %v4918_v20 = vpack.c.bf16 %v2596_v14, %v2595_v12  ;;  %v5238_v21 = vpack.c.bf16 %v2724_v15, %v2723_v13  ;;  %v5769_v24 = vpop.f32.mrb[48].mxu0  ;;  %v5897_v25 = vpop.f32.mrb[48].mxu1 }
 0x15a   : > { %v4913_v22 = vpack.c.bf16 %v2594_v18, %v2593_v16  ;;  %v5233_v23 = vpack.c.bf16 %v2722_v19, %v2721_v17  ;;  %v2343_v26 = vmul.f32 0.2, %v5769_v24  ;;  %v2471_v27 = vmul.f32 0.2, %v5897_v25  ;;  %v1462_v28 = vpop.f32.mrb[49].mxu0  ;;  %v1974_v29 = vpop.f32.mrb[49].mxu1 }
 0x15b   : > { %5462 = vst [vmem:[%s6319_s6 + $0xb8] sm:$0xff] %v4918_v20   ;;  %5526 = vst [vmem:[%s6319_s6 + $0x2b8] sm:$0xff] %v5238_v21   ;;  %v2341_v30 = vmul.f32 0.2, %v1462_v28  ;;  %v2469_v31 = vmul.f32 0.2, %v1974_v29 }
 0x15c   : > { %5461 = vst [vmem:[%s6319_s6 + $0xb0] sm:$0xff] %v4913_v22   ;;  %5525 = vst [vmem:[%s6319_s6 + $0x2b0] sm:$0xff] %v5233_v23   ;;  %v5770_v32 = vpop.f32.mrb[50].mxu0  ;;  %v5898_v33 = vpop.f32.mrb[50].mxu1  ;;  %v2599_v40 = vmax.f32 %v5769_v24, %v2343_v26  ;;  %v2727_v41 = vmax.f32 %v5897_v25, %v2471_v27 }
 0x15d   : > { %v2344_v34 = vmul.f32 0.2, %v5770_v32  ;;  %v2472_v35 = vmul.f32 0.2, %v5898_v33  ;;  %v1465_v36 = vpop.f32.mrb[51].mxu0  ;;  %v1977_v37 = vpop.f32.mrb[51].mxu1  ;;  %v2597_v44 = vmax.f32 %v1462_v28, %v2341_v30  ;;  %v2725_v45 = vmax.f32 %v1974_v29, %v2469_v31 }
 0x15e   : > { %v2342_v38 = vmul.f32 0.2, %v1465_v36  ;;  %v2470_v39 = vmul.f32 0.2, %v1977_v37 }
 0x15f   : > { %v2600_v42 = vmax.f32 %v5770_v32, %v2344_v34  ;;  %v2728_v43 = vmax.f32 %v5898_v33, %v2472_v35 }
 0x160   : > { %v2598_v46 = vmax.f32 %v1465_v36, %v2342_v38  ;;  %v2726_v47 = vmax.f32 %v1977_v37, %v2470_v39 }
 0x161   : > { %v4928_v48 = vpack.c.bf16 %v2600_v42, %v2599_v40  ;;  %v5248_v49 = vpack.c.bf16 %v2728_v43, %v2727_v41  ;;  %v5773_v52 = vpop.f32.mrb[52].mxu0  ;;  %v5901_v53 = vpop.f32.mrb[52].mxu1 }
 0x162   : > { %v4923_v50 = vpack.c.bf16 %v2598_v46, %v2597_v44  ;;  %v5243_v51 = vpack.c.bf16 %v2726_v47, %v2725_v45  ;;  %v2347_v54 = vmul.f32 0.2, %v5773_v52  ;;  %v2475_v55 = vmul.f32 0.2, %v5901_v53  ;;  %v1478_v56 = vpop.f32.mrb[53].mxu0  ;;  %v1990_v57 = vpop.f32.mrb[53].mxu1 }
 0x163   : > { %5464 = vst [vmem:[%s6319_s6 + $0xc8] sm:$0xff] %v4928_v48   ;;  %5528 = vst [vmem:[%s6319_s6 + $0x2c8] sm:$0xff] %v5248_v49   ;;  %v2345_v58 = vmul.f32 0.2, %v1478_v56  ;;  %v2473_v59 = vmul.f32 0.2, %v1990_v57 }
 0x164   : > { %5463 = vst [vmem:[%s6319_s6 + $0xc0] sm:$0xff] %v4923_v50   ;;  %5527 = vst [vmem:[%s6319_s6 + $0x2c0] sm:$0xff] %v5243_v51   ;;  %v5774_v60 = vpop.f32.mrb[54].mxu0  ;;  %v5902_v61 = vpop.f32.mrb[54].mxu1  ;;  %v2603_v4 = vmax.f32 %v5773_v52, %v2347_v54  ;;  %v2731_v5 = vmax.f32 %v5901_v53, %v2475_v55 }
 0x165   : > { %v2348_v62 = vmul.f32 0.2, %v5774_v60  ;;  %v2476_v63 = vmul.f32 0.2, %v5902_v61  ;;  %v1481_v0 = vpop.f32.mrb[55].mxu0  ;;  %v1993_v1 = vpop.f32.mrb[55].mxu1  ;;  %v2601_v8 = vmax.f32 %v1478_v56, %v2345_v58  ;;  %v2729_v9 = vmax.f32 %v1990_v57, %v2473_v59 }
 0x166   : > { %v2346_v2 = vmul.f32 0.2, %v1481_v0  ;;  %v2474_v3 = vmul.f32 0.2, %v1993_v1 }
 0x167   : > { %v2604_v6 = vmax.f32 %v5774_v60, %v2348_v62  ;;  %v2732_v7 = vmax.f32 %v5902_v61, %v2476_v63 }
 0x168   : > { %v2602_v10 = vmax.f32 %v1481_v0, %v2346_v2  ;;  %v2730_v11 = vmax.f32 %v1993_v1, %v2474_v3 }
 0x169   : > { %v4938_v12 = vpack.c.bf16 %v2604_v6, %v2603_v4  ;;  %v5258_v13 = vpack.c.bf16 %v2732_v7, %v2731_v5  ;;  %v5777_v16 = vpop.f32.mrb[56].mxu0  ;;  %v5905_v17 = vpop.f32.mrb[56].mxu1 }
 0x16a   : > { %v4933_v14 = vpack.c.bf16 %v2602_v10, %v2601_v8  ;;  %v5253_v15 = vpack.c.bf16 %v2730_v11, %v2729_v9  ;;  %v2351_v18 = vmul.f32 0.2, %v5777_v16  ;;  %v2479_v19 = vmul.f32 0.2, %v5905_v17  ;;  %v1494_v20 = vpop.f32.mrb[57].mxu0  ;;  %v2006_v21 = vpop.f32.mrb[57].mxu1 }
 0x16b   : > { %5466 = vst [vmem:[%s6319_s6 + $0xd8] sm:$0xff] %v4938_v12   ;;  %5530 = vst [vmem:[%s6319_s6 + $0x2d8] sm:$0xff] %v5258_v13   ;;  %v2349_v22 = vmul.f32 0.2, %v1494_v20  ;;  %v2477_v23 = vmul.f32 0.2, %v2006_v21 }
 0x16c   : > { %5465 = vst [vmem:[%s6319_s6 + $0xd0] sm:$0xff] %v4933_v14   ;;  %5529 = vst [vmem:[%s6319_s6 + $0x2d0] sm:$0xff] %v5253_v15   ;;  %v5778_v24 = vpop.f32.mrb[58].mxu0  ;;  %v5906_v25 = vpop.f32.mrb[58].mxu1  ;;  %v2607_v32 = vmax.f32 %v5777_v16, %v2351_v18  ;;  %v2735_v33 = vmax.f32 %v5905_v17, %v2479_v19 }
 0x16d   : > { %v2352_v26 = vmul.f32 0.2, %v5778_v24  ;;  %v2480_v27 = vmul.f32 0.2, %v5906_v25  ;;  %v1497_v28 = vpop.f32.mrb[59].mxu0  ;;  %v2009_v29 = vpop.f32.mrb[59].mxu1  ;;  %v2605_v36 = vmax.f32 %v1494_v20, %v2349_v22  ;;  %v2733_v37 = vmax.f32 %v2006_v21, %v2477_v23 }
 0x16e   : > { %v2350_v30 = vmul.f32 0.2, %v1497_v28  ;;  %v2478_v31 = vmul.f32 0.2, %v2009_v29 }
 0x16f   : > { %v2608_v34 = vmax.f32 %v5778_v24, %v2352_v26  ;;  %v2736_v35 = vmax.f32 %v5906_v25, %v2480_v27 }
 0x170   : > { %v2606_v38 = vmax.f32 %v1497_v28, %v2350_v30  ;;  %v2734_v39 = vmax.f32 %v2009_v29, %v2478_v31 }
 0x171   : > { %v4948_v40 = vpack.c.bf16 %v2608_v34, %v2607_v32  ;;  %v5268_v41 = vpack.c.bf16 %v2736_v35, %v2735_v33  ;;  %v5781_v44 = vpop.f32.mrb[60].mxu0  ;;  %v5909_v45 = vpop.f32.mrb[60].mxu1 }
 0x172   : > { %v4943_v42 = vpack.c.bf16 %v2606_v38, %v2605_v36  ;;  %v5263_v43 = vpack.c.bf16 %v2734_v39, %v2733_v37  ;;  %v2355_v46 = vmul.f32 0.2, %v5781_v44  ;;  %v2483_v47 = vmul.f32 0.2, %v5909_v45  ;;  %v1510_v48 = vpop.f32.mrb[61].mxu0  ;;  %v2022_v49 = vpop.f32.mrb[61].mxu1 }
 0x173   : > { %5468 = vst [vmem:[%s6319_s6 + $0xe8] sm:$0xff] %v4948_v40   ;;  %5532 = vst [vmem:[%s6319_s6 + $0x2e8] sm:$0xff] %v5268_v41   ;;  %v2353_v50 = vmul.f32 0.2, %v1510_v48  ;;  %v2481_v51 = vmul.f32 0.2, %v2022_v49 }
 0x174   : > { %5467 = vst [vmem:[%s6319_s6 + $0xe0] sm:$0xff] %v4943_v42   ;;  %5531 = vst [vmem:[%s6319_s6 + $0x2e0] sm:$0xff] %v5263_v43   ;;  %v5782_v52 = vpop.f32.mrb[62].mxu0  ;;  %v5910_v53 = vpop.f32.mrb[62].mxu1  ;;  %v2611_v60 = vmax.f32 %v5781_v44, %v2355_v46  ;;  %v2739_v61 = vmax.f32 %v5909_v45, %v2483_v47 }
 0x175   : > { %v2356_v54 = vmul.f32 0.2, %v5782_v52  ;;  %v2484_v55 = vmul.f32 0.2, %v5910_v53  ;;  %v1513_v56 = vpop.f32.mrb[63].mxu0  ;;  %v2025_v57 = vpop.f32.mrb[63].mxu1  ;;  %v2609_v0 = vmax.f32 %v1510_v48, %v2353_v50  ;;  %v2737_v1 = vmax.f32 %v2022_v49, %v2481_v51 }
 0x176   : > { %v2354_v58 = vmul.f32 0.2, %v1513_v56  ;;  %v2482_v59 = vmul.f32 0.2, %v2025_v57 }
 0x177   : > { %v2612_v62 = vmax.f32 %v5782_v52, %v2356_v54  ;;  %v2740_v63 = vmax.f32 %v5910_v53, %v2484_v55 }
 0x178   : > { %v2610_v2 = vmax.f32 %v1513_v56, %v2354_v58  ;;  %v2738_v3 = vmax.f32 %v2025_v57, %v2482_v59 }
 0x179   : > { %v4958_v4 = vpack.c.bf16 %v2612_v62, %v2611_v60  ;;  %v5278_v5 = vpack.c.bf16 %v2740_v63, %v2739_v61  ;;  %v5785_v8 = vpop.f32.mrb[64].mxu0  ;;  %v5913_v9 = vpop.f32.mrb[64].mxu1 }
 0x17a   : > { %v4953_v6 = vpack.c.bf16 %v2610_v2, %v2609_v0  ;;  %v5273_v7 = vpack.c.bf16 %v2738_v3, %v2737_v1  ;;  %v2359_v10 = vmul.f32 0.2, %v5785_v8  ;;  %v2487_v11 = vmul.f32 0.2, %v5913_v9  ;;  %v1526_v12 = vpop.f32.mrb[65].mxu0  ;;  %v2038_v13 = vpop.f32.mrb[65].mxu1 }
 0x17b   : > { %5470 = vst [vmem:[%s6319_s6 + $0xf8] sm:$0xff] %v4958_v4   ;;  %5534 = vst [vmem:[%s6319_s6 + $0x2f8] sm:$0xff] %v5278_v5   ;;  %v2357_v14 = vmul.f32 0.2, %v1526_v12  ;;  %v2485_v15 = vmul.f32 0.2, %v2038_v13 }
 0x17c   : > { %5469 = vst [vmem:[%s6319_s6 + $0xf0] sm:$0xff] %v4953_v6   ;;  %5533 = vst [vmem:[%s6319_s6 + $0x2f0] sm:$0xff] %v5273_v7   ;;  %v5786_v16 = vpop.f32.mrb[66].mxu0  ;;  %v5914_v17 = vpop.f32.mrb[66].mxu1  ;;  %v2615_v24 = vmax.f32 %v5785_v8, %v2359_v10  ;;  %v2743_v25 = vmax.f32 %v5913_v9, %v2487_v11 }
 0x17d   : > { %v2360_v18 = vmul.f32 0.2, %v5786_v16  ;;  %v2488_v19 = vmul.f32 0.2, %v5914_v17  ;;  %v1529_v20 = vpop.f32.mrb[67].mxu0  ;;  %v2041_v21 = vpop.f32.mrb[67].mxu1  ;;  %v2613_v28 = vmax.f32 %v1526_v12, %v2357_v14  ;;  %v2741_v29 = vmax.f32 %v2038_v13, %v2485_v15 }
 0x17e   : > { %v2358_v22 = vmul.f32 0.2, %v1529_v20  ;;  %v2486_v23 = vmul.f32 0.2, %v2041_v21 }
 0x17f   : > { %v2616_v26 = vmax.f32 %v5786_v16, %v2360_v18  ;;  %v2744_v27 = vmax.f32 %v5914_v17, %v2488_v19 }
 0x180   : > { %v2614_v30 = vmax.f32 %v1529_v20, %v2358_v22  ;;  %v2742_v31 = vmax.f32 %v2041_v21, %v2486_v23 }
 0x181   : > { %v4968_v32 = vpack.c.bf16 %v2616_v26, %v2615_v24  ;;  %v5288_v33 = vpack.c.bf16 %v2744_v27, %v2743_v25  ;;  %v5789_v36 = vpop.f32.mrb[68].mxu0  ;;  %v5917_v37 = vpop.f32.mrb[68].mxu1 }
 0x182   : > { %v4963_v34 = vpack.c.bf16 %v2614_v30, %v2613_v28  ;;  %v5283_v35 = vpack.c.bf16 %v2742_v31, %v2741_v29  ;;  %v2363_v38 = vmul.f32 0.2, %v5789_v36  ;;  %v2491_v39 = vmul.f32 0.2, %v5917_v37  ;;  %v1542_v40 = vpop.f32.mrb[69].mxu0  ;;  %v2054_v41 = vpop.f32.mrb[69].mxu1 }
 0x183   : > { %5472 = vst [vmem:[%s6319_s6 + $0x108] sm:$0xff] %v4968_v32   ;;  %5536 = vst [vmem:[%s6319_s6 + $0x308] sm:$0xff] %v5288_v33   ;;  %v2361_v42 = vmul.f32 0.2, %v1542_v40  ;;  %v2489_v43 = vmul.f32 0.2, %v2054_v41 }
 0x184   : > { %5471 = vst [vmem:[%s6319_s6 + $0x100] sm:$0xff] %v4963_v34   ;;  %5535 = vst [vmem:[%s6319_s6 + $0x300] sm:$0xff] %v5283_v35   ;;  %v5790_v44 = vpop.f32.mrb[70].mxu0  ;;  %v5918_v45 = vpop.f32.mrb[70].mxu1  ;;  %v2619_v52 = vmax.f32 %v5789_v36, %v2363_v38  ;;  %v2747_v53 = vmax.f32 %v5917_v37, %v2491_v39 }
 0x185   : > { %v2364_v46 = vmul.f32 0.2, %v5790_v44  ;;  %v2492_v47 = vmul.f32 0.2, %v5918_v45  ;;  %v1545_v48 = vpop.f32.mrb[71].mxu0  ;;  %v2057_v49 = vpop.f32.mrb[71].mxu1  ;;  %v2617_v56 = vmax.f32 %v1542_v40, %v2361_v42  ;;  %v2745_v57 = vmax.f32 %v2054_v41, %v2489_v43 }
 0x186   : > { %v2362_v50 = vmul.f32 0.2, %v1545_v48  ;;  %v2490_v51 = vmul.f32 0.2, %v2057_v49 }
 0x187   : > { %v2620_v54 = vmax.f32 %v5790_v44, %v2364_v46  ;;  %v2748_v55 = vmax.f32 %v5918_v45, %v2492_v47 }
 0x188   : > { %v2618_v58 = vmax.f32 %v1545_v48, %v2362_v50  ;;  %v2746_v59 = vmax.f32 %v2057_v49, %v2490_v51 }
 0x189   : > { %v4978_v60 = vpack.c.bf16 %v2620_v54, %v2619_v52  ;;  %v5298_v61 = vpack.c.bf16 %v2748_v55, %v2747_v53  ;;  %v5793_v0 = vpop.f32.mrb[72].mxu0  ;;  %v5921_v1 = vpop.f32.mrb[72].mxu1 }
 0x18a   : > { %v4973_v62 = vpack.c.bf16 %v2618_v58, %v2617_v56  ;;  %v5293_v63 = vpack.c.bf16 %v2746_v59, %v2745_v57  ;;  %v2367_v2 = vmul.f32 0.2, %v5793_v0  ;;  %v2495_v3 = vmul.f32 0.2, %v5921_v1  ;;  %v1558_v4 = vpop.f32.mrb[73].mxu0  ;;  %v2070_v5 = vpop.f32.mrb[73].mxu1 }
 0x18b   : > { %5474 = vst [vmem:[%s6319_s6 + $0x118] sm:$0xff] %v4978_v60   ;;  %5538 = vst [vmem:[%s6319_s6 + $0x318] sm:$0xff] %v5298_v61   ;;  %v2365_v6 = vmul.f32 0.2, %v1558_v4  ;;  %v2493_v7 = vmul.f32 0.2, %v2070_v5 }
 0x18c   : > { %5473 = vst [vmem:[%s6319_s6 + $0x110] sm:$0xff] %v4973_v62   ;;  %5537 = vst [vmem:[%s6319_s6 + $0x310] sm:$0xff] %v5293_v63   ;;  %v5794_v8 = vpop.f32.mrb[74].mxu0  ;;  %v5922_v9 = vpop.f32.mrb[74].mxu1  ;;  %v2623_v16 = vmax.f32 %v5793_v0, %v2367_v2  ;;  %v2751_v17 = vmax.f32 %v5921_v1, %v2495_v3 }
 0x18d   : > { %v2368_v10 = vmul.f32 0.2, %v5794_v8  ;;  %v2496_v11 = vmul.f32 0.2, %v5922_v9  ;;  %v1561_v12 = vpop.f32.mrb[75].mxu0  ;;  %v2073_v13 = vpop.f32.mrb[75].mxu1  ;;  %v2621_v20 = vmax.f32 %v1558_v4, %v2365_v6  ;;  %v2749_v21 = vmax.f32 %v2070_v5, %v2493_v7 }
 0x18e   : > { %v2366_v14 = vmul.f32 0.2, %v1561_v12  ;;  %v2494_v15 = vmul.f32 0.2, %v2073_v13 }
 0x18f   : > { %v2624_v18 = vmax.f32 %v5794_v8, %v2368_v10  ;;  %v2752_v19 = vmax.f32 %v5922_v9, %v2496_v11 }
 0x190   : > { %v2622_v22 = vmax.f32 %v1561_v12, %v2366_v14  ;;  %v2750_v23 = vmax.f32 %v2073_v13, %v2494_v15 }
 0x191   : > { %v4988_v24 = vpack.c.bf16 %v2624_v18, %v2623_v16  ;;  %v5308_v25 = vpack.c.bf16 %v2752_v19, %v2751_v17  ;;  %v5797_v28 = vpop.f32.mrb[76].mxu0  ;;  %v5925_v29 = vpop.f32.mrb[76].mxu1 }
 0x192   : > { %v4983_v26 = vpack.c.bf16 %v2622_v22, %v2621_v20  ;;  %v5303_v27 = vpack.c.bf16 %v2750_v23, %v2749_v21  ;;  %v2371_v30 = vmul.f32 0.2, %v5797_v28  ;;  %v2499_v31 = vmul.f32 0.2, %v5925_v29  ;;  %v1574_v32 = vpop.f32.mrb[77].mxu0  ;;  %v2086_v33 = vpop.f32.mrb[77].mxu1 }
 0x193   : > { %5476 = vst [vmem:[%s6319_s6 + $0x128] sm:$0xff] %v4988_v24   ;;  %5540 = vst [vmem:[%s6319_s6 + $0x328] sm:$0xff] %v5308_v25   ;;  %v2369_v34 = vmul.f32 0.2, %v1574_v32  ;;  %v2497_v35 = vmul.f32 0.2, %v2086_v33 }
 0x194   : > { %5475 = vst [vmem:[%s6319_s6 + $0x120] sm:$0xff] %v4983_v26   ;;  %5539 = vst [vmem:[%s6319_s6 + $0x320] sm:$0xff] %v5303_v27   ;;  %v5798_v36 = vpop.f32.mrb[78].mxu0  ;;  %v5926_v37 = vpop.f32.mrb[78].mxu1  ;;  %v2627_v44 = vmax.f32 %v5797_v28, %v2371_v30  ;;  %v2755_v45 = vmax.f32 %v5925_v29, %v2499_v31 }
 0x195   : > { %v2372_v38 = vmul.f32 0.2, %v5798_v36  ;;  %v2500_v39 = vmul.f32 0.2, %v5926_v37  ;;  %v1577_v40 = vpop.f32.mrb[79].mxu0  ;;  %v2089_v41 = vpop.f32.mrb[79].mxu1  ;;  %v2625_v48 = vmax.f32 %v1574_v32, %v2369_v34  ;;  %v2753_v49 = vmax.f32 %v2086_v33, %v2497_v35 }
 0x196   : > { %v2370_v42 = vmul.f32 0.2, %v1577_v40  ;;  %v2498_v43 = vmul.f32 0.2, %v2089_v41 }
 0x197   : > { %v2628_v46 = vmax.f32 %v5798_v36, %v2372_v38  ;;  %v2756_v47 = vmax.f32 %v5926_v37, %v2500_v39 }
 0x198   : > { %v2626_v50 = vmax.f32 %v1577_v40, %v2370_v42  ;;  %v2754_v51 = vmax.f32 %v2089_v41, %v2498_v43 }
 0x199   : > { %v4998_v52 = vpack.c.bf16 %v2628_v46, %v2627_v44  ;;  %v5318_v53 = vpack.c.bf16 %v2756_v47, %v2755_v45  ;;  %v5801_v56 = vpop.f32.mrb[80].mxu0  ;;  %v5929_v57 = vpop.f32.mrb[80].mxu1 }
 0x19a   : > { %v4993_v54 = vpack.c.bf16 %v2626_v50, %v2625_v48  ;;  %v5313_v55 = vpack.c.bf16 %v2754_v51, %v2753_v49  ;;  %v2375_v58 = vmul.f32 0.2, %v5801_v56  ;;  %v2503_v59 = vmul.f32 0.2, %v5929_v57  ;;  %v1590_v60 = vpop.f32.mrb[81].mxu0  ;;  %v2102_v61 = vpop.f32.mrb[81].mxu1 }
 0x19b   : > { %5478 = vst [vmem:[%s6319_s6 + $0x138] sm:$0xff] %v4998_v52   ;;  %5542 = vst [vmem:[%s6319_s6 + $0x338] sm:$0xff] %v5318_v53   ;;  %v2373_v62 = vmul.f32 0.2, %v1590_v60  ;;  %v2501_v63 = vmul.f32 0.2, %v2102_v61 }
 0x19c   : > { %5477 = vst [vmem:[%s6319_s6 + $0x130] sm:$0xff] %v4993_v54   ;;  %5541 = vst [vmem:[%s6319_s6 + $0x330] sm:$0xff] %v5313_v55   ;;  %v5802_v0 = vpop.f32.mrb[82].mxu0  ;;  %v5930_v1 = vpop.f32.mrb[82].mxu1  ;;  %v2631_v8 = vmax.f32 %v5801_v56, %v2375_v58  ;;  %v2759_v9 = vmax.f32 %v5929_v57, %v2503_v59 }
 0x19d   : > { %v2376_v2 = vmul.f32 0.2, %v5802_v0  ;;  %v2504_v3 = vmul.f32 0.2, %v5930_v1  ;;  %v1593_v4 = vpop.f32.mrb[83].mxu0  ;;  %v2105_v5 = vpop.f32.mrb[83].mxu1  ;;  %v2629_v12 = vmax.f32 %v1590_v60, %v2373_v62  ;;  %v2757_v13 = vmax.f32 %v2102_v61, %v2501_v63 }
 0x19e   : > { %v2374_v6 = vmul.f32 0.2, %v1593_v4  ;;  %v2502_v7 = vmul.f32 0.2, %v2105_v5 }
 0x19f   : > { %v2632_v10 = vmax.f32 %v5802_v0, %v2376_v2  ;;  %v2760_v11 = vmax.f32 %v5930_v1, %v2504_v3 }
 0x1a0   : > { %v2630_v14 = vmax.f32 %v1593_v4, %v2374_v6  ;;  %v2758_v15 = vmax.f32 %v2105_v5, %v2502_v7 }
 0x1a1   : > { %v5008_v16 = vpack.c.bf16 %v2632_v10, %v2631_v8  ;;  %v5328_v17 = vpack.c.bf16 %v2760_v11, %v2759_v9  ;;  %v5805_v20 = vpop.f32.mrb[84].mxu0  ;;  %v5933_v21 = vpop.f32.mrb[84].mxu1 }
 0x1a2   : > { %v5003_v18 = vpack.c.bf16 %v2630_v14, %v2629_v12  ;;  %v5323_v19 = vpack.c.bf16 %v2758_v15, %v2757_v13  ;;  %v2379_v22 = vmul.f32 0.2, %v5805_v20  ;;  %v2507_v23 = vmul.f32 0.2, %v5933_v21  ;;  %v1606_v24 = vpop.f32.mrb[85].mxu0  ;;  %v2118_v25 = vpop.f32.mrb[85].mxu1 }
 0x1a3   : > { %5480 = vst [vmem:[%s6319_s6 + $0x148] sm:$0xff] %v5008_v16   ;;  %5544 = vst [vmem:[%s6319_s6 + $0x348] sm:$0xff] %v5328_v17   ;;  %v2377_v26 = vmul.f32 0.2, %v1606_v24  ;;  %v2505_v27 = vmul.f32 0.2, %v2118_v25 }
 0x1a4   : > { %5479 = vst [vmem:[%s6319_s6 + $0x140] sm:$0xff] %v5003_v18   ;;  %5543 = vst [vmem:[%s6319_s6 + $0x340] sm:$0xff] %v5323_v19   ;;  %v5806_v28 = vpop.f32.mrb[86].mxu0  ;;  %v5934_v29 = vpop.f32.mrb[86].mxu1  ;;  %v2635_v36 = vmax.f32 %v5805_v20, %v2379_v22  ;;  %v2763_v37 = vmax.f32 %v5933_v21, %v2507_v23 }
 0x1a5   : > { %v2380_v30 = vmul.f32 0.2, %v5806_v28  ;;  %v2508_v31 = vmul.f32 0.2, %v5934_v29  ;;  %v1609_v32 = vpop.f32.mrb[87].mxu0  ;;  %v2121_v33 = vpop.f32.mrb[87].mxu1  ;;  %v2633_v40 = vmax.f32 %v1606_v24, %v2377_v26  ;;  %v2761_v41 = vmax.f32 %v2118_v25, %v2505_v27 }
 0x1a6   : > { %v2378_v34 = vmul.f32 0.2, %v1609_v32  ;;  %v2506_v35 = vmul.f32 0.2, %v2121_v33 }
 0x1a7   : > { %v2636_v38 = vmax.f32 %v5806_v28, %v2380_v30  ;;  %v2764_v39 = vmax.f32 %v5934_v29, %v2508_v31 }
 0x1a8   : > { %v2634_v42 = vmax.f32 %v1609_v32, %v2378_v34  ;;  %v2762_v43 = vmax.f32 %v2121_v33, %v2506_v35 }
 0x1a9   : > { %v5018_v44 = vpack.c.bf16 %v2636_v38, %v2635_v36  ;;  %v5338_v45 = vpack.c.bf16 %v2764_v39, %v2763_v37  ;;  %v5809_v48 = vpop.f32.mrb[88].mxu0  ;;  %v5937_v49 = vpop.f32.mrb[88].mxu1 }
 0x1aa   : > { %v5013_v46 = vpack.c.bf16 %v2634_v42, %v2633_v40  ;;  %v5333_v47 = vpack.c.bf16 %v2762_v43, %v2761_v41  ;;  %v2383_v50 = vmul.f32 0.2, %v5809_v48  ;;  %v2511_v51 = vmul.f32 0.2, %v5937_v49  ;;  %v1622_v52 = vpop.f32.mrb[89].mxu0  ;;  %v2134_v53 = vpop.f32.mrb[89].mxu1 }
 0x1ab   : > { %5482 = vst [vmem:[%s6319_s6 + $0x158] sm:$0xff] %v5018_v44   ;;  %5546 = vst [vmem:[%s6319_s6 + $0x358] sm:$0xff] %v5338_v45   ;;  %v2381_v54 = vmul.f32 0.2, %v1622_v52  ;;  %v2509_v55 = vmul.f32 0.2, %v2134_v53 }
 0x1ac   : > { %5481 = vst [vmem:[%s6319_s6 + $0x150] sm:$0xff] %v5013_v46   ;;  %5545 = vst [vmem:[%s6319_s6 + $0x350] sm:$0xff] %v5333_v47   ;;  %v5810_v56 = vpop.f32.mrb[90].mxu0  ;;  %v5938_v57 = vpop.f32.mrb[90].mxu1  ;;  %v2639_v0 = vmax.f32 %v5809_v48, %v2383_v50  ;;  %v2767_v1 = vmax.f32 %v5937_v49, %v2511_v51 }
 0x1ad   : > { %v2384_v58 = vmul.f32 0.2, %v5810_v56  ;;  %v2512_v59 = vmul.f32 0.2, %v5938_v57  ;;  %v1625_v60 = vpop.f32.mrb[91].mxu0  ;;  %v2137_v61 = vpop.f32.mrb[91].mxu1  ;;  %v2637_v4 = vmax.f32 %v1622_v52, %v2381_v54  ;;  %v2765_v5 = vmax.f32 %v2134_v53, %v2509_v55 }
 0x1ae   : > { %v2382_v62 = vmul.f32 0.2, %v1625_v60  ;;  %v2510_v63 = vmul.f32 0.2, %v2137_v61 }
 0x1af   : > { %v2640_v2 = vmax.f32 %v5810_v56, %v2384_v58  ;;  %v2768_v3 = vmax.f32 %v5938_v57, %v2512_v59 }
 0x1b0   : > { %v2638_v6 = vmax.f32 %v1625_v60, %v2382_v62  ;;  %v2766_v7 = vmax.f32 %v2137_v61, %v2510_v63 }
 0x1b1   : > { %v5028_v8 = vpack.c.bf16 %v2640_v2, %v2639_v0  ;;  %v5348_v9 = vpack.c.bf16 %v2768_v3, %v2767_v1  ;;  %v5813_v12 = vpop.f32.mrb[92].mxu0  ;;  %v5941_v13 = vpop.f32.mrb[92].mxu1 }
 0x1b2   : > { %v5023_v10 = vpack.c.bf16 %v2638_v6, %v2637_v4  ;;  %v5343_v11 = vpack.c.bf16 %v2766_v7, %v2765_v5  ;;  %v2387_v14 = vmul.f32 0.2, %v5813_v12  ;;  %v2515_v15 = vmul.f32 0.2, %v5941_v13  ;;  %v1638_v16 = vpop.f32.mrb[93].mxu0  ;;  %v2150_v17 = vpop.f32.mrb[93].mxu1 }
 0x1b3   : > { %5484 = vst [vmem:[%s6319_s6 + $0x168] sm:$0xff] %v5028_v8   ;;  %5548 = vst [vmem:[%s6319_s6 + $0x368] sm:$0xff] %v5348_v9   ;;  %v2385_v18 = vmul.f32 0.2, %v1638_v16  ;;  %v2513_v19 = vmul.f32 0.2, %v2150_v17 }
 0x1b4   : > { %5483 = vst [vmem:[%s6319_s6 + $0x160] sm:$0xff] %v5023_v10   ;;  %5547 = vst [vmem:[%s6319_s6 + $0x360] sm:$0xff] %v5343_v11   ;;  %v5814_v20 = vpop.f32.mrb[94].mxu0  ;;  %v5942_v21 = vpop.f32.mrb[94].mxu1  ;;  %v2643_v28 = vmax.f32 %v5813_v12, %v2387_v14  ;;  %v2771_v29 = vmax.f32 %v5941_v13, %v2515_v15 }
 0x1b5   : > { %v2388_v22 = vmul.f32 0.2, %v5814_v20  ;;  %v2516_v23 = vmul.f32 0.2, %v5942_v21  ;;  %v1641_v24 = vpop.f32.mrb[95].mxu0  ;;  %v2153_v25 = vpop.f32.mrb[95].mxu1  ;;  %v2641_v32 = vmax.f32 %v1638_v16, %v2385_v18  ;;  %v2769_v33 = vmax.f32 %v2150_v17, %v2513_v19 }
 0x1b6   : > { %v2386_v26 = vmul.f32 0.2, %v1641_v24  ;;  %v2514_v27 = vmul.f32 0.2, %v2153_v25 }
 0x1b7   : > { %v2644_v30 = vmax.f32 %v5814_v20, %v2388_v22  ;;  %v2772_v31 = vmax.f32 %v5942_v21, %v2516_v23 }
 0x1b8   : > { %v2642_v34 = vmax.f32 %v1641_v24, %v2386_v26  ;;  %v2770_v35 = vmax.f32 %v2153_v25, %v2514_v27 }
 0x1b9   : > { %v5038_v36 = vpack.c.bf16 %v2644_v30, %v2643_v28  ;;  %v5358_v37 = vpack.c.bf16 %v2772_v31, %v2771_v29  ;;  %v5817_v40 = vpop.f32.mrb[96].mxu0  ;;  %v5945_v41 = vpop.f32.mrb[96].mxu1 }
 0x1ba   : > { %v5033_v38 = vpack.c.bf16 %v2642_v34, %v2641_v32  ;;  %v5353_v39 = vpack.c.bf16 %v2770_v35, %v2769_v33  ;;  %v2391_v42 = vmul.f32 0.2, %v5817_v40  ;;  %v2519_v43 = vmul.f32 0.2, %v5945_v41  ;;  %v1654_v44 = vpop.f32.mrb[97].mxu0  ;;  %v2166_v45 = vpop.f32.mrb[97].mxu1 }
 0x1bb   : > { %5486 = vst [vmem:[%s6319_s6 + $0x178] sm:$0xff] %v5038_v36   ;;  %5550 = vst [vmem:[%s6319_s6 + $0x378] sm:$0xff] %v5358_v37   ;;  %v2389_v46 = vmul.f32 0.2, %v1654_v44  ;;  %v2517_v47 = vmul.f32 0.2, %v2166_v45 }
 0x1bc   : > { %5485 = vst [vmem:[%s6319_s6 + $0x170] sm:$0xff] %v5033_v38   ;;  %5549 = vst [vmem:[%s6319_s6 + $0x370] sm:$0xff] %v5353_v39   ;;  %v5818_v48 = vpop.f32.mrb[98].mxu0  ;;  %v5946_v49 = vpop.f32.mrb[98].mxu1  ;;  %v2647_v56 = vmax.f32 %v5817_v40, %v2391_v42  ;;  %v2775_v57 = vmax.f32 %v5945_v41, %v2519_v43 }
 0x1bd   : > { %v2392_v50 = vmul.f32 0.2, %v5818_v48  ;;  %v2520_v51 = vmul.f32 0.2, %v5946_v49  ;;  %v1657_v52 = vpop.f32.mrb[99].mxu0  ;;  %v2169_v53 = vpop.f32.mrb[99].mxu1  ;;  %v2645_v60 = vmax.f32 %v1654_v44, %v2389_v46  ;;  %v2773_v61 = vmax.f32 %v2166_v45, %v2517_v47 }
 0x1be   : > { %v2390_v54 = vmul.f32 0.2, %v1657_v52  ;;  %v2518_v55 = vmul.f32 0.2, %v2169_v53 }
 0x1bf   : > { %v2648_v58 = vmax.f32 %v5818_v48, %v2392_v50  ;;  %v2776_v59 = vmax.f32 %v5946_v49, %v2520_v51 }
 0x1c0   : > { %v2646_v62 = vmax.f32 %v1657_v52, %v2390_v54  ;;  %v2774_v63 = vmax.f32 %v2169_v53, %v2518_v55 }
 0x1c1   : > { %v5048_v0 = vpack.c.bf16 %v2648_v58, %v2647_v56  ;;  %v5368_v1 = vpack.c.bf16 %v2776_v59, %v2775_v57  ;;  %v5821_v4 = vpop.f32.mrb[100].mxu0  ;;  %v5949_v5 = vpop.f32.mrb[100].mxu1 }
 0x1c2   : > { %v5043_v2 = vpack.c.bf16 %v2646_v62, %v2645_v60  ;;  %v5363_v3 = vpack.c.bf16 %v2774_v63, %v2773_v61  ;;  %v2395_v6 = vmul.f32 0.2, %v5821_v4  ;;  %v2523_v7 = vmul.f32 0.2, %v5949_v5  ;;  %v1670_v8 = vpop.f32.mrb[101].mxu0  ;;  %v2182_v9 = vpop.f32.mrb[101].mxu1 }
 0x1c3   : > { %5488 = vst [vmem:[%s6319_s6 + $0x188] sm:$0xff] %v5048_v0   ;;  %5552 = vst [vmem:[%s6319_s6 + $0x388] sm:$0xff] %v5368_v1   ;;  %v2393_v10 = vmul.f32 0.2, %v1670_v8  ;;  %v2521_v11 = vmul.f32 0.2, %v2182_v9 }
 0x1c4   : > { %5487 = vst [vmem:[%s6319_s6 + $0x180] sm:$0xff] %v5043_v2   ;;  %5551 = vst [vmem:[%s6319_s6 + $0x380] sm:$0xff] %v5363_v3   ;;  %v5822_v12 = vpop.f32.mrb[102].mxu0  ;;  %v5950_v13 = vpop.f32.mrb[102].mxu1  ;;  %v2651_v20 = vmax.f32 %v5821_v4, %v2395_v6  ;;  %v2779_v21 = vmax.f32 %v5949_v5, %v2523_v7 }
 0x1c5   : > { %v2396_v14 = vmul.f32 0.2, %v5822_v12  ;;  %v2524_v15 = vmul.f32 0.2, %v5950_v13  ;;  %v1673_v16 = vpop.f32.mrb[103].mxu0  ;;  %v2185_v17 = vpop.f32.mrb[103].mxu1  ;;  %v2649_v24 = vmax.f32 %v1670_v8, %v2393_v10  ;;  %v2777_v25 = vmax.f32 %v2182_v9, %v2521_v11 }
 0x1c6   : > { %v2394_v18 = vmul.f32 0.2, %v1673_v16  ;;  %v2522_v19 = vmul.f32 0.2, %v2185_v17 }
 0x1c7   : > { %v2652_v22 = vmax.f32 %v5822_v12, %v2396_v14  ;;  %v2780_v23 = vmax.f32 %v5950_v13, %v2524_v15 }
 0x1c8   : > { %v2650_v26 = vmax.f32 %v1673_v16, %v2394_v18  ;;  %v2778_v27 = vmax.f32 %v2185_v17, %v2522_v19 }
 0x1c9   : > { %v5058_v28 = vpack.c.bf16 %v2652_v22, %v2651_v20  ;;  %v5378_v29 = vpack.c.bf16 %v2780_v23, %v2779_v21  ;;  %v5825_v32 = vpop.f32.mrb[104].mxu0  ;;  %v5953_v33 = vpop.f32.mrb[104].mxu1 }
 0x1ca   : > { %v5053_v30 = vpack.c.bf16 %v2650_v26, %v2649_v24  ;;  %v5373_v31 = vpack.c.bf16 %v2778_v27, %v2777_v25  ;;  %v2399_v34 = vmul.f32 0.2, %v5825_v32  ;;  %v2527_v35 = vmul.f32 0.2, %v5953_v33  ;;  %v1686_v36 = vpop.f32.mrb[105].mxu0  ;;  %v2198_v37 = vpop.f32.mrb[105].mxu1 }
 0x1cb   : > { %5490 = vst [vmem:[%s6319_s6 + $0x198] sm:$0xff] %v5058_v28   ;;  %5554 = vst [vmem:[%s6319_s6 + $0x398] sm:$0xff] %v5378_v29   ;;  %v2397_v38 = vmul.f32 0.2, %v1686_v36  ;;  %v2525_v39 = vmul.f32 0.2, %v2198_v37 }
 0x1cc   : > { %5489 = vst [vmem:[%s6319_s6 + $0x190] sm:$0xff] %v5053_v30   ;;  %5553 = vst [vmem:[%s6319_s6 + $0x390] sm:$0xff] %v5373_v31   ;;  %v5826_v40 = vpop.f32.mrb[106].mxu0  ;;  %v5954_v41 = vpop.f32.mrb[106].mxu1  ;;  %v2655_v48 = vmax.f32 %v5825_v32, %v2399_v34  ;;  %v2783_v49 = vmax.f32 %v5953_v33, %v2527_v35 }
 0x1cd   : > { %v2400_v42 = vmul.f32 0.2, %v5826_v40  ;;  %v2528_v43 = vmul.f32 0.2, %v5954_v41  ;;  %v1689_v44 = vpop.f32.mrb[107].mxu0  ;;  %v2201_v45 = vpop.f32.mrb[107].mxu1  ;;  %v2653_v52 = vmax.f32 %v1686_v36, %v2397_v38  ;;  %v2781_v53 = vmax.f32 %v2198_v37, %v2525_v39 }
 0x1ce   : > { %v2398_v46 = vmul.f32 0.2, %v1689_v44  ;;  %v2526_v47 = vmul.f32 0.2, %v2201_v45 }
 0x1cf   : > { %v2656_v50 = vmax.f32 %v5826_v40, %v2400_v42  ;;  %v2784_v51 = vmax.f32 %v5954_v41, %v2528_v43 }
 0x1d0   : > { %v2654_v54 = vmax.f32 %v1689_v44, %v2398_v46  ;;  %v2782_v55 = vmax.f32 %v2201_v45, %v2526_v47 }
 0x1d1   : > { %v5068_v56 = vpack.c.bf16 %v2656_v50, %v2655_v48  ;;  %v5388_v57 = vpack.c.bf16 %v2784_v51, %v2783_v49  ;;  %v5829_v60 = vpop.f32.mrb[108].mxu0  ;;  %v5957_v61 = vpop.f32.mrb[108].mxu1 }
 0x1d2   : > { %v5063_v58 = vpack.c.bf16 %v2654_v54, %v2653_v52  ;;  %v5383_v59 = vpack.c.bf16 %v2782_v55, %v2781_v53  ;;  %v2403_v62 = vmul.f32 0.2, %v5829_v60  ;;  %v2531_v63 = vmul.f32 0.2, %v5957_v61  ;;  %v1702_v0 = vpop.f32.mrb[109].mxu0  ;;  %v2214_v1 = vpop.f32.mrb[109].mxu1 }
 0x1d3   : > { %5492 = vst [vmem:[%s6319_s6 + $0x1a8] sm:$0xff] %v5068_v56   ;;  %5556 = vst [vmem:[%s6319_s6 + $0x3a8] sm:$0xff] %v5388_v57   ;;  %v2401_v2 = vmul.f32 0.2, %v1702_v0  ;;  %v2529_v3 = vmul.f32 0.2, %v2214_v1 }
 0x1d4   : > { %5491 = vst [vmem:[%s6319_s6 + $0x1a0] sm:$0xff] %v5063_v58   ;;  %5555 = vst [vmem:[%s6319_s6 + $0x3a0] sm:$0xff] %v5383_v59   ;;  %v5830_v4 = vpop.f32.mrb[110].mxu0  ;;  %v5958_v5 = vpop.f32.mrb[110].mxu1  ;;  %v2659_v12 = vmax.f32 %v5829_v60, %v2403_v62  ;;  %v2787_v13 = vmax.f32 %v5957_v61, %v2531_v63 }
 0x1d5   : > { %v2404_v6 = vmul.f32 0.2, %v5830_v4  ;;  %v2532_v7 = vmul.f32 0.2, %v5958_v5  ;;  %v1705_v8 = vpop.f32.mrb[111].mxu0  ;;  %v2217_v9 = vpop.f32.mrb[111].mxu1  ;;  %v2657_v16 = vmax.f32 %v1702_v0, %v2401_v2  ;;  %v2785_v17 = vmax.f32 %v2214_v1, %v2529_v3 }
 0x1d6   : > { %v2402_v10 = vmul.f32 0.2, %v1705_v8  ;;  %v2530_v11 = vmul.f32 0.2, %v2217_v9 }
 0x1d7   : > { %v2660_v14 = vmax.f32 %v5830_v4, %v2404_v6  ;;  %v2788_v15 = vmax.f32 %v5958_v5, %v2532_v7 }
 0x1d8   : > { %v2658_v18 = vmax.f32 %v1705_v8, %v2402_v10  ;;  %v2786_v19 = vmax.f32 %v2217_v9, %v2530_v11 }
 0x1d9   : > { %v5078_v20 = vpack.c.bf16 %v2660_v14, %v2659_v12  ;;  %v5398_v21 = vpack.c.bf16 %v2788_v15, %v2787_v13  ;;  %v5833_v24 = vpop.f32.mrb[112].mxu0  ;;  %v5961_v25 = vpop.f32.mrb[112].mxu1 }
 0x1da   : > { %v5073_v22 = vpack.c.bf16 %v2658_v18, %v2657_v16  ;;  %v5393_v23 = vpack.c.bf16 %v2786_v19, %v2785_v17  ;;  %v2407_v26 = vmul.f32 0.2, %v5833_v24  ;;  %v2535_v27 = vmul.f32 0.2, %v5961_v25  ;;  %v1718_v28 = vpop.f32.mrb[113].mxu0  ;;  %v2230_v29 = vpop.f32.mrb[113].mxu1 }
 0x1db   : > { %5494 = vst [vmem:[%s6319_s6 + $0x1b8] sm:$0xff] %v5078_v20   ;;  %5558 = vst [vmem:[%s6319_s6 + $0x3b8] sm:$0xff] %v5398_v21   ;;  %v2405_v30 = vmul.f32 0.2, %v1718_v28  ;;  %v2533_v31 = vmul.f32 0.2, %v2230_v29 }
 0x1dc   : > { %5493 = vst [vmem:[%s6319_s6 + $0x1b0] sm:$0xff] %v5073_v22   ;;  %5557 = vst [vmem:[%s6319_s6 + $0x3b0] sm:$0xff] %v5393_v23   ;;  %v5834_v32 = vpop.f32.mrb[114].mxu0  ;;  %v5962_v33 = vpop.f32.mrb[114].mxu1  ;;  %v2663_v40 = vmax.f32 %v5833_v24, %v2407_v26  ;;  %v2791_v41 = vmax.f32 %v5961_v25, %v2535_v27 }
 0x1dd   : > { %v2408_v34 = vmul.f32 0.2, %v5834_v32  ;;  %v2536_v35 = vmul.f32 0.2, %v5962_v33  ;;  %v1721_v36 = vpop.f32.mrb[115].mxu0  ;;  %v2233_v37 = vpop.f32.mrb[115].mxu1  ;;  %v2661_v44 = vmax.f32 %v1718_v28, %v2405_v30  ;;  %v2789_v45 = vmax.f32 %v2230_v29, %v2533_v31 }
 0x1de   : > { %v2406_v38 = vmul.f32 0.2, %v1721_v36  ;;  %v2534_v39 = vmul.f32 0.2, %v2233_v37 }
 0x1df   : > { %v2664_v42 = vmax.f32 %v5834_v32, %v2408_v34  ;;  %v2792_v43 = vmax.f32 %v5962_v33, %v2536_v35 }
 0x1e0   : > { %v2662_v46 = vmax.f32 %v1721_v36, %v2406_v38  ;;  %v2790_v47 = vmax.f32 %v2233_v37, %v2534_v39 }
 0x1e1   : > { %v5088_v48 = vpack.c.bf16 %v2664_v42, %v2663_v40  ;;  %v5408_v49 = vpack.c.bf16 %v2792_v43, %v2791_v41  ;;  %v5837_v52 = vpop.f32.mrb[116].mxu0  ;;  %v5965_v53 = vpop.f32.mrb[116].mxu1 }
 0x1e2   : > { %v5083_v50 = vpack.c.bf16 %v2662_v46, %v2661_v44  ;;  %v5403_v51 = vpack.c.bf16 %v2790_v47, %v2789_v45  ;;  %v2411_v54 = vmul.f32 0.2, %v5837_v52  ;;  %v2539_v55 = vmul.f32 0.2, %v5965_v53  ;;  %v1734_v56 = vpop.f32.mrb[117].mxu0  ;;  %v2246_v57 = vpop.f32.mrb[117].mxu1 }
 0x1e3   : > { %5496 = vst [vmem:[%s6319_s6 + $0x1c8] sm:$0xff] %v5088_v48   ;;  %5560 = vst [vmem:[%s6319_s6 + $0x3c8] sm:$0xff] %v5408_v49   ;;  %v2409_v58 = vmul.f32 0.2, %v1734_v56  ;;  %v2537_v59 = vmul.f32 0.2, %v2246_v57 }
 0x1e4   : > { %5495 = vst [vmem:[%s6319_s6 + $0x1c0] sm:$0xff] %v5083_v50   ;;  %5559 = vst [vmem:[%s6319_s6 + $0x3c0] sm:$0xff] %v5403_v51   ;;  %v5838_v60 = vpop.f32.mrb[118].mxu0  ;;  %v5966_v61 = vpop.f32.mrb[118].mxu1  ;;  %v2667_v4 = vmax.f32 %v5837_v52, %v2411_v54  ;;  %v2795_v5 = vmax.f32 %v5965_v53, %v2539_v55 }
 0x1e5   : > { %v2412_v62 = vmul.f32 0.2, %v5838_v60  ;;  %v2540_v63 = vmul.f32 0.2, %v5966_v61  ;;  %v1737_v0 = vpop.f32.mrb[119].mxu0  ;;  %v2249_v1 = vpop.f32.mrb[119].mxu1  ;;  %v2665_v8 = vmax.f32 %v1734_v56, %v2409_v58  ;;  %v2793_v9 = vmax.f32 %v2246_v57, %v2537_v59 }
 0x1e6   : > { %v2410_v2 = vmul.f32 0.2, %v1737_v0  ;;  %v2538_v3 = vmul.f32 0.2, %v2249_v1 }
 0x1e7   : > { %v2668_v6 = vmax.f32 %v5838_v60, %v2412_v62  ;;  %v2796_v7 = vmax.f32 %v5966_v61, %v2540_v63 }
 0x1e8   : > { %v2666_v10 = vmax.f32 %v1737_v0, %v2410_v2  ;;  %v2794_v11 = vmax.f32 %v2249_v1, %v2538_v3 }
 0x1e9   : > { %v5098_v12 = vpack.c.bf16 %v2668_v6, %v2667_v4  ;;  %v5418_v13 = vpack.c.bf16 %v2796_v7, %v2795_v5  ;;  %v5841_v16 = vpop.f32.mrb[120].mxu0  ;;  %v5969_v17 = vpop.f32.mrb[120].mxu1 }
 0x1ea   : > { %v5093_v14 = vpack.c.bf16 %v2666_v10, %v2665_v8  ;;  %v5413_v15 = vpack.c.bf16 %v2794_v11, %v2793_v9  ;;  %v2415_v18 = vmul.f32 0.2, %v5841_v16  ;;  %v2543_v19 = vmul.f32 0.2, %v5969_v17  ;;  %v1750_v20 = vpop.f32.mrb[121].mxu0  ;;  %v2262_v21 = vpop.f32.mrb[121].mxu1 }
 0x1eb   : > { %5498 = vst [vmem:[%s6319_s6 + $0x1d8] sm:$0xff] %v5098_v12   ;;  %5562 = vst [vmem:[%s6319_s6 + $0x3d8] sm:$0xff] %v5418_v13   ;;  %v2413_v22 = vmul.f32 0.2, %v1750_v20  ;;  %v2541_v23 = vmul.f32 0.2, %v2262_v21 }
 0x1ec   : > { %5497 = vst [vmem:[%s6319_s6 + $0x1d0] sm:$0xff] %v5093_v14   ;;  %5561 = vst [vmem:[%s6319_s6 + $0x3d0] sm:$0xff] %v5413_v15   ;;  %v5842_v24 = vpop.f32.mrb[122].mxu0  ;;  %v5970_v25 = vpop.f32.mrb[122].mxu1  ;;  %v2671_v32 = vmax.f32 %v5841_v16, %v2415_v18  ;;  %v2799_v33 = vmax.f32 %v5969_v17, %v2543_v19 }
 0x1ed   : > { %v2416_v26 = vmul.f32 0.2, %v5842_v24  ;;  %v2544_v27 = vmul.f32 0.2, %v5970_v25  ;;  %v1753_v28 = vpop.f32.mrb[123].mxu0  ;;  %v2265_v29 = vpop.f32.mrb[123].mxu1  ;;  %v2669_v36 = vmax.f32 %v1750_v20, %v2413_v22  ;;  %v2797_v37 = vmax.f32 %v2262_v21, %v2541_v23 }
 0x1ee   : > { %v2414_v30 = vmul.f32 0.2, %v1753_v28  ;;  %v2542_v31 = vmul.f32 0.2, %v2265_v29 }
 0x1ef   : > { %v2672_v34 = vmax.f32 %v5842_v24, %v2416_v26  ;;  %v2800_v35 = vmax.f32 %v5970_v25, %v2544_v27 }
 0x1f0   : > { %v2670_v38 = vmax.f32 %v1753_v28, %v2414_v30  ;;  %v2798_v39 = vmax.f32 %v2265_v29, %v2542_v31 }
 0x1f1   : > { %v5108_v40 = vpack.c.bf16 %v2672_v34, %v2671_v32  ;;  %v5428_v41 = vpack.c.bf16 %v2800_v35, %v2799_v33  ;;  %v5845_v44 = vpop.f32.mrb[124].mxu0  ;;  %v5973_v45 = vpop.f32.mrb[124].mxu1 }
 0x1f2   : > { %v5103_v42 = vpack.c.bf16 %v2670_v38, %v2669_v36  ;;  %v5423_v43 = vpack.c.bf16 %v2798_v39, %v2797_v37  ;;  %v2419_v46 = vmul.f32 0.2, %v5845_v44  ;;  %v2547_v47 = vmul.f32 0.2, %v5973_v45  ;;  %v1766_v48 = vpop.f32.mrb[125].mxu0  ;;  %v2278_v49 = vpop.f32.mrb[125].mxu1 }
 0x1f3   : > { %5500 = vst [vmem:[%s6319_s6 + $0x1e8] sm:$0xff] %v5108_v40   ;;  %5564 = vst [vmem:[%s6319_s6 + $0x3e8] sm:$0xff] %v5428_v41   ;;  %v2417_v50 = vmul.f32 0.2, %v1766_v48  ;;  %v2545_v51 = vmul.f32 0.2, %v2278_v49 }
 0x1f4   : > { %5499 = vst [vmem:[%s6319_s6 + $0x1e0] sm:$0xff] %v5103_v42   ;;  %5563 = vst [vmem:[%s6319_s6 + $0x3e0] sm:$0xff] %v5423_v43   ;;  %v5846_v52 = vpop.f32.mrb[126].mxu0  ;;  %v5974_v53 = vpop.f32.mrb[126].mxu1  ;;  %v2675_v60 = vmax.f32 %v5845_v44, %v2419_v46  ;;  %v2803_v61 = vmax.f32 %v5973_v45, %v2547_v47 }
 0x1f5   : > { %v2420_v54 = vmul.f32 0.2, %v5846_v52  ;;  %v2548_v55 = vmul.f32 0.2, %v5974_v53  ;;  %v1769_v56 = vpop.f32.mrb[127].mxu0  ;;  %v2281_v57 = vpop.f32.mrb[127].mxu1  ;;  %v2673_v0 = vmax.f32 %v1766_v48, %v2417_v50  ;;  %v2801_v1 = vmax.f32 %v2278_v49, %v2545_v51 }
 0x1f6   : > { %v2418_v58 = vmul.f32 0.2, %v1769_v56  ;;  %v2546_v59 = vmul.f32 0.2, %v2281_v57 }
 0x1f7   : > { %v2676_v62 = vmax.f32 %v5846_v52, %v2420_v54  ;;  %v2804_v63 = vmax.f32 %v5974_v53, %v2548_v55 }
 0x1f8   : > { %v2674_v2 = vmax.f32 %v1769_v56, %v2418_v58  ;;  %v2802_v3 = vmax.f32 %v2281_v57, %v2546_v59 }
 0x1f9   : > { %v5118_v4 = vpack.c.bf16 %v2676_v62, %v2675_v60  ;;  %v5438_v5 = vpack.c.bf16 %v2804_v63, %v2803_v61 }
 0x1fa   : > { %v5113_v6 = vpack.c.bf16 %v2674_v2, %v2673_v0  ;;  %v5433_v7 = vpack.c.bf16 %v2802_v3, %v2801_v1 }
 0x1fb   : > { %5502 = vst [vmem:[%s6319_s6 + $0x1f8] sm:$0xff] %v5118_v4   ;;  %5566 = vst [vmem:[%s6319_s6 + $0x3f8] sm:$0xff] %v5438_v5  }
 0x1fc   : > { %5501 = vst [vmem:[%s6319_s6 + $0x1f0] sm:$0xff] %v5113_v6   ;;  %5565 = vst [vmem:[%s6319_s6 + $0x3f0] sm:$0xff] %v5433_v7  }
 0x1fd PF: > { %s12_s9 = sadd.s32 1, %s6141_s9  }
 0x1fe   : > { %p9_p4 = scmp.ge.s32.totalorder %s12_s9, 6  }
 0x200   :  { %11 = sbr.rel (!%p9_p4) target bundleno = 1 (0x1), region = 58 }

// kernel: discriminator_forward.7
= control target key start
LH: loop header
LB: loop body
LE: loop exit
PB: predicated region body
PF: predicated region fallthrough
CT: control target
= control target key end

     0   :  { %s3494_s12 = smov 0   ;;  %s4066_s0 = inlined_call_operand.vmem [shape: bf16[2048,128], index: 0, kind: input, shape index: {}]   ;;  %s4067_s1 = inlined_call_operand.vmem [shape: bf16[128,128], index: 1, kind: input, shape index: {}]   ;;  %s4068_s2 = inlined_call_operand.vmem [shape: bf16[2048,128], index: 2, kind: output, shape index: {0}]   ;;  %s4069_s3 = inlined_call_operand.vmem [shape: f32[2,2,128], index: 3, kind: output, shape index: {1}]  }
   0x1 LB: > { %s3500_s13 = sadd.s32 4294967295, %s3472_s12   ;;  %p2435_p0 = scmp.ge.s32.totalorder %s3472_s12, 1  ;;  %s3472_s12 = sphi %s3494_s12, %s14_s12  }
   0x2   : > { %p141_p1 = scmp.lt.s32.totalorder %s3472_s12, 3 }
   0x4   : > { %p142_p2 = pnand %p2435_p0, %p141_p1 }
   0x6   : > { %145 = sbr.rel (%p142_p2) target bundleno = 531 (0x213), region = 28 }
   0xd   : > { %v3394_v0 = vld [vmem:[%s4067_s1] sm:$0xff]   ;;  %s2436_s16 = sshll.u32 %s3500_s13, 7  ;;  %v3395_v1 = vld [vmem:[%s4067_s1 + $0x8] sm:$0xff]   ;;  %v3396_v2 = vld [vmem:[%s4067_s1 + $0x10] sm:$0xff]   ;;  %p181_p4 = scmp.lt.s32.totalorder %s3500_s13, 1  ;;  %vm2341_vm0 = vcmask 1040384  }
   0xe   : > { %p170_p3 = scmp.lt.s32.totalorder %s2436_s16, 255  ;;  %3226 = vmatprep.subr.bf16.mxu0 %v3394_v0  ;;  %3370 = vmatprep.subr.bf16.mxu1 %v3394_v0  ;;  %v3397_v3 = vld [vmem:[%s4067_s1 + $0x18] sm:$0xff]   ;;  %v3398_v5 = vld [vmem:[%s4067_s1 + $0x20] sm:$0xff]   ;;  %v3399_v6 = vld [vmem:[%s4067_s1 + $0x28] sm:$0xff]  }
   0xf   : > { %3227 = vmatpush3.bf16.msra.mxu0 %v3394_v0  ;;  %3378 = vmatpush3.bf16.msra.mxu1 %v3394_v0  ;;  %v3400_v7 = vld [vmem:[%s4067_s1 + $0x30] sm:$0xff]   ;;  %v3401_v8 = vld [vmem:[%s4067_s1 + $0x38] sm:$0xff]   ;;  %s4133_s13 = smov (!%p181_p4, %s3500_s13), 1 }
  0x10   : > { %s4131_s16 = smov (!%p170_p3, %s2436_s16), 255  ;;  %3228 = vmatprep.subr.bf16.mxu0 %v3395_v1  ;;  %3371 = vmatprep.subr.bf16.mxu1 %v3395_v1  ;;  %s2440_s11 = sshll.u32 %s4133_s13, 1 }
  0x11   : > { %s2437_s21 = sshll.u32 %s4131_s16, 2  ;;  %s184_s16 = scalar_lea.vmem %s4069_s3, %s2440_s11 }
  0x12   : > { %s3522_s24 = scalar_lea.vmem %s4066_s0, %s2437_s21  ;;  %s3608_s10 = scalar_lea.vmem %s4068_s2, %s2437_s21 }
  0x13   : > { %3229 = vmatpush3.bf16.msra.mxu0 %v3395_v1  ;;  %3379 = vmatpush3.bf16.msra.mxu1 %v3395_v1  ;;  %v3402_v4 = vld [vmem:[%s3522_s24] sm:$0xff]   ;;  %v3403_v9 = vld [vmem:[%s3522_s24 + $0x8] sm:$0xff]   ;;  %v3404_v10 = vld [vmem:[%s3522_s24 + $0x10] sm:$0xff]  }
  0x14   : > { %3230 = vmatprep.subr.bf16.mxu0 %v3396_v2  ;;  %3372 = vmatprep.subr.bf16.mxu1 %v3396_v2  ;;  %v3405_v11 = vld [vmem:[%s3522_s24 + $0x18] sm:$0xff]   ;;  %v3406_v12 = vld [vmem:[%s3522_s24 + $0x20] sm:$0xff]   ;;  %v3435_v14 = vld [vmem:[%s3522_s24 + $0x108] sm:$0xff]  }
  0x15   : > { %3242 = vmatprep.mubr.bf16.mxu0 %v3402_v4  ;;  %v3434_v13 = vld [vmem:[%s3522_s24 + $0x100] sm:$0xff]   ;;  %v3436_v15 = vld [vmem:[%s3522_s24 + $0x110] sm:$0xff]   ;;  %v3407_v16 = vld [vmem:[%s3522_s24 + $0x28] sm:$0xff]  }
  0x16   : > { %3306 = vmatprep.mubr.bf16.mxu1 %v3434_v13  ;;  %v3408_v17 = vld [vmem:[%s3522_s24 + $0x30] sm:$0xff]   ;;  %v3437_v18 = vld [vmem:[%s3522_s24 + $0x118] sm:$0xff]   ;;  %v3438_v19 = vld [vmem:[%s3522_s24 + $0x120] sm:$0xff]  }
  0x17   : > { %3231 = vmatpush3.bf16.msra.mxu0 %v3396_v2  ;;  %3380 = vmatpush3.bf16.msra.mxu1 %v3396_v2  ;;  %v3409_v20 = vld [vmem:[%s3522_s24 + $0x38] sm:$0xff]   ;;  %v3410_v21 = vld [vmem:[%s3522_s24 + $0x40] sm:$0xff]   ;;  %v3439_v22 = vld [vmem:[%s3522_s24 + $0x128] sm:$0xff]  }
  0x18   : > { %3232 = vmatprep.subr.bf16.mxu0 %v3397_v3  ;;  %3373 = vmatprep.subr.bf16.mxu1 %v3397_v3  ;;  %v3440_v23 = vld [vmem:[%s3522_s24 + $0x130] sm:$0xff]   ;;  %v3411_v24 = vld [vmem:[%s3522_s24 + $0x48] sm:$0xff]   ;;  %v3441_v26 = vld [vmem:[%s3522_s24 + $0x138] sm:$0xff]  }
  0x19   : > { %v3412_v25 = vld [vmem:[%s3522_s24 + $0x50] sm:$0xff]   ;;  %v3442_v27 = vld [vmem:[%s3522_s24 + $0x140] sm:$0xff]   ;;  %v3413_v28 = vld [vmem:[%s3522_s24 + $0x58] sm:$0xff]  }
  0x1a   : > { %v3414_v29 = vld [vmem:[%s3522_s24 + $0x60] sm:$0xff]   ;;  %v3443_v30 = vld [vmem:[%s3522_s24 + $0x148] sm:$0xff]   ;;  %v3444_v31 = vld [vmem:[%s3522_s24 + $0x150] sm:$0xff]  }
  0x1b   : > { %3233 = vmatpush3.bf16.msra.mxu0 %v3397_v3  ;;  %3381 = vmatpush3.bf16.msra.mxu1 %v3397_v3  ;;  %v3415_v32 = vld [vmem:[%s3522_s24 + $0x68] sm:$0xff]   ;;  %v3416_v33 = vld [vmem:[%s3522_s24 + $0x70] sm:$0xff]   ;;  %v3445_v34 = vld [vmem:[%s3522_s24 + $0x158] sm:$0xff]  }
  0x1c   : > { %3234 = vmatprep.subr.bf16.mxu0 %v3398_v5  ;;  %3374 = vmatprep.subr.bf16.mxu1 %v3398_v5  ;;  %v3446_v35 = vld [vmem:[%s3522_s24 + $0x160] sm:$0xff]   ;;  %v3417_v36 = vld [vmem:[%s3522_s24 + $0x78] sm:$0xff]   ;;  %v3447_v38 = vld [vmem:[%s3522_s24 + $0x168] sm:$0xff]  }
  0x1d   : > { %v3418_v37 = vld [vmem:[%s3522_s24 + $0x80] sm:$0xff]   ;;  %v3448_v39 = vld [vmem:[%s3522_s24 + $0x170] sm:$0xff]   ;;  %v3419_v40 = vld [vmem:[%s3522_s24 + $0x88] sm:$0xff]  }
  0x1e   : > { %v3420_v41 = vld [vmem:[%s3522_s24 + $0x90] sm:$0xff]   ;;  %v3449_v42 = vld [vmem:[%s3522_s24 + $0x178] sm:$0xff]   ;;  %v3450_v43 = vld [vmem:[%s3522_s24 + $0x180] sm:$0xff]  }
  0x1f   : > { %3235 = vmatpush3.bf16.msra.mxu0 %v3398_v5  ;;  %3382 = vmatpush3.bf16.msra.mxu1 %v3398_v5  ;;  %v3421_v44 = vld [vmem:[%s3522_s24 + $0x98] sm:$0xff]   ;;  %v3422_v45 = vld [vmem:[%s3522_s24 + $0xa0] sm:$0xff]   ;;  %v3451_v46 = vld [vmem:[%s3522_s24 + $0x188] sm:$0xff]  }
  0x20   : > { %3236 = vmatprep.subr.bf16.mxu0 %v3399_v6  ;;  %3375 = vmatprep.subr.bf16.mxu1 %v3399_v6  ;;  %v3452_v47 = vld [vmem:[%s3522_s24 + $0x190] sm:$0xff]   ;;  %v3423_v48 = vld [vmem:[%s3522_s24 + $0xa8] sm:$0xff]   ;;  %v3453_v50 = vld [vmem:[%s3522_s24 + $0x198] sm:$0xff]  }
  0x21   : > { %v3424_v49 = vld [vmem:[%s3522_s24 + $0xb0] sm:$0xff]   ;;  %v3454_v51 = vld [vmem:[%s3522_s24 + $0x1a0] sm:$0xff]   ;;  %v3425_v52 = vld [vmem:[%s3522_s24 + $0xb8] sm:$0xff]  }
  0x22   : > { %v3426_v53 = vld [vmem:[%s3522_s24 + $0xc0] sm:$0xff]   ;;  %v3455_v54 = vld [vmem:[%s3522_s24 + $0x1a8] sm:$0xff]   ;;  %v3456_v55 = vld [vmem:[%s3522_s24 + $0x1b0] sm:$0xff]  }
  0x23   : > { %3237 = vmatpush3.bf16.msra.mxu0 %v3399_v6  ;;  %3383 = vmatpush3.bf16.msra.mxu1 %v3399_v6  ;;  %v3427_v56 = vld [vmem:[%s3522_s24 + $0xc8] sm:$0xff]   ;;  %v3428_v57 = vld [vmem:[%s3522_s24 + $0xd0] sm:$0xff]   ;;  %v3457_v58 = vld [vmem:[%s3522_s24 + $0x1b8] sm:$0xff]  }
  0x24   : > { %3238 = vmatprep.subr.bf16.mxu0 %v3400_v7  ;;  %3376 = vmatprep.subr.bf16.mxu1 %v3400_v7  ;;  %v3458_v59 = vld [vmem:[%s3522_s24 + $0x1c0] sm:$0xff]   ;;  %v3429_v60 = vld [vmem:[%s3522_s24 + $0xd8] sm:$0xff]   ;;  %v3459_v62 = vld [vmem:[%s3522_s24 + $0x1c8] sm:$0xff]  }
  0x25   : > { %v3430_v61 = vld [vmem:[%s3522_s24 + $0xe0] sm:$0xff]   ;;  %v3460_v63 = vld [vmem:[%s3522_s24 + $0x1d0] sm:$0xff]   ;;  %v3431_v0 = vld [vmem:[%s3522_s24 + $0xe8] sm:$0xff]  }
  0x26   : > { %v3432_v1 = vld [vmem:[%s3522_s24 + $0xf0] sm:$0xff]   ;;  %v3461_v2 = vld [vmem:[%s3522_s24 + $0x1d8] sm:$0xff]   ;;  %v3462_v3 = vld [vmem:[%s3522_s24 + $0x1e0] sm:$0xff]  }
  0x27   : > { %3239 = vmatpush3.bf16.msra.mxu0 %v3400_v7  ;;  %3384 = vmatpush3.bf16.msra.mxu1 %v3400_v7  ;;  %v3433_v4 = vld [vmem:[%s3522_s24 + $0xf8] sm:$0xff]   ;;  %v3463_v5 = vld [vmem:[%s3522_s24 + $0x1e8] sm:$0xff]   ;;  %v3464_v6 = vld [vmem:[%s3522_s24 + $0x1f0] sm:$0xff]  }
  0x28   : > { %3240 = vmatprep.subr.bf16.mxu0 %v3401_v8  ;;  %3377 = vmatprep.subr.bf16.mxu1 %v3401_v8  ;;  %v3465_v7 = vld [vmem:[%s3522_s24 + $0x1f8] sm:$0xff]  }
  0x2b   : > { %3241 = vmatpush3.bf16.msra.mxu0 %v3401_v8  ;;  %3385 = vmatpush3.bf16.msra.mxu1 %v3401_v8 }
  0x2e   : > { %3243 = vmatmul.mubr.bf16.vlgmr.msra.gmra.mrb[0].mxu0 %v3403_v9  ;;  %3307 = vmatmul.mubr.bf16.vlgmr.msra.gmra.mrb[0].mxu1 %v3435_v14 }
  0x2f   : > { %3246 = vmatprep.mubr.bf16.mxu0 %v3404_v10  ;;  %3310 = vmatprep.mubr.bf16.mxu1 %v3436_v15 }
  0x36   : > { %3247 = vmatmul.mubr.bf16.gmra.mrb[4].mxu0 %v3405_v11  ;;  %3311 = vmatmul.mubr.bf16.gmra.mrb[4].mxu1 %v3437_v18 }
  0x37   : > { %3250 = vmatprep.mubr.bf16.mxu0 %v3406_v12  ;;  %3314 = vmatprep.mubr.bf16.mxu1 %v3438_v19 }
  0x3e   : > { %3251 = vmatmul.mubr.bf16.gmra.mrb[8].mxu0 %v3407_v16  ;;  %3315 = vmatmul.mubr.bf16.gmra.mrb[8].mxu1 %v3439_v22 }
  0x3f   : > { %3254 = vmatprep.mubr.bf16.mxu0 %v3408_v17  ;;  %3318 = vmatprep.mubr.bf16.mxu1 %v3440_v23 }
  0x46   : > { %3255 = vmatmul.mubr.bf16.gmra.mrb[12].mxu0 %v3409_v20  ;;  %3319 = vmatmul.mubr.bf16.gmra.mrb[12].mxu1 %v3441_v26 }
  0x47   : > { %3258 = vmatprep.mubr.bf16.mxu0 %v3410_v21  ;;  %3322 = vmatprep.mubr.bf16.mxu1 %v3442_v27 }
  0x4e   : > { %3259 = vmatmul.mubr.bf16.gmra.mrb[16].mxu0 %v3411_v24  ;;  %3323 = vmatmul.mubr.bf16.gmra.mrb[16].mxu1 %v3443_v30 }
  0x4f   : > { %3262 = vmatprep.mubr.bf16.mxu0 %v3412_v25  ;;  %3326 = vmatprep.mubr.bf16.mxu1 %v3444_v31 }
  0x56   : > { %3263 = vmatmul.mubr.bf16.gmra.mrb[20].mxu0 %v3413_v28  ;;  %3327 = vmatmul.mubr.bf16.gmra.mrb[20].mxu1 %v3445_v34 }
  0x57   : > { %3266 = vmatprep.mubr.bf16.mxu0 %v3414_v29  ;;  %3330 = vmatprep.mubr.bf16.mxu1 %v3446_v35 }
  0x5e   : > { %3267 = vmatmul.mubr.bf16.gmra.mrb[24].mxu0 %v3415_v32  ;;  %3331 = vmatmul.mubr.bf16.gmra.mrb[24].mxu1 %v3447_v38 }
  0x5f   : > { %3270 = vmatprep.mubr.bf16.mxu0 %v3416_v33  ;;  %3334 = vmatprep.mubr.bf16.mxu1 %v3448_v39 }
  0x66   : > { %3271 = vmatmul.mubr.bf16.gmra.mrb[28].mxu0 %v3417_v36  ;;  %3335 = vmatmul.mubr.bf16.gmra.mrb[28].mxu1 %v3449_v42 }
  0x67   : > { %3274 = vmatprep.mubr.bf16.mxu0 %v3418_v37  ;;  %3338 = vmatprep.mubr.bf16.mxu1 %v3450_v43 }
  0x6e   : > { %3275 = vmatmul.mubr.bf16.gmra.mrb[32].mxu0 %v3419_v40  ;;  %3339 = vmatmul.mubr.bf16.gmra.mrb[32].mxu1 %v3451_v46 }
  0x6f   : > { %3278 = vmatprep.mubr.bf16.mxu0 %v3420_v41  ;;  %3342 = vmatprep.mubr.bf16.mxu1 %v3452_v47 }
  0x76   : > { %3279 = vmatmul.mubr.bf16.gmra.mrb[36].mxu0 %v3421_v44  ;;  %3343 = vmatmul.mubr.bf16.gmra.mrb[36].mxu1 %v3453_v50 }
  0x77   : > { %3282 = vmatprep.mubr.bf16.mxu0 %v3422_v45  ;;  %3346 = vmatprep.mubr.bf16.mxu1 %v3454_v51 }
  0x7e   : > { %3283 = vmatmul.mubr.bf16.gmra.mrb[40].mxu0 %v3423_v48  ;;  %3347 = vmatmul.mubr.bf16.gmra.mrb[40].mxu1 %v3455_v54 }
  0x7f   : > { %3286 = vmatprep.mubr.bf16.mxu0 %v3424_v49  ;;  %3350 = vmatprep.mubr.bf16.mxu1 %v3456_v55 }
  0x86   : > { %3287 = vmatmul.mubr.bf16.gmra.mrb[44].mxu0 %v3425_v52  ;;  %3351 = vmatmul.mubr.bf16.gmra.mrb[44].mxu1 %v3457_v58 }
  0x87   : > { %3290 = vmatprep.mubr.bf16.mxu0 %v3426_v53  ;;  %3354 = vmatprep.mubr.bf16.mxu1 %v3458_v59 }
  0x8e   : > { %3291 = vmatmul.mubr.bf16.gmra.mrb[48].mxu0 %v3427_v56  ;;  %3355 = vmatmul.mubr.bf16.gmra.mrb[48].mxu1 %v3459_v62 }
  0x8f   : > { %3294 = vmatprep.mubr.bf16.mxu0 %v3428_v57  ;;  %3358 = vmatprep.mubr.bf16.mxu1 %v3460_v63 }
  0x96   : > { %3295 = vmatmul.mubr.bf16.gmra.mrb[52].mxu0 %v3429_v60  ;;  %3359 = vmatmul.mubr.bf16.gmra.mrb[52].mxu1 %v3461_v2 }
  0x97   : > { %3298 = vmatprep.mubr.bf16.mxu0 %v3430_v61  ;;  %3362 = vmatprep.mubr.bf16.mxu1 %v3462_v3 }
  0x9e   : > { %3299 = vmatmul.mubr.bf16.gmra.mrb[56].mxu0 %v3431_v0  ;;  %3363 = vmatmul.mubr.bf16.gmra.mrb[56].mxu1 %v3463_v5 }
  0x9f   : > { %3302 = vmatprep.mubr.bf16.mxu0 %v3432_v1  ;;  %3366 = vmatprep.mubr.bf16.mxu1 %v3464_v6 }
  0xa6   : > { %3303 = vmatmul.mubr.bf16.gmra.mrb[60].mxu0 %v3433_v4  ;;  %3367 = vmatmul.mubr.bf16.gmra.mrb[60].mxu1 %v3465_v7 }
 0x101   : > { %v3244_v8 = vpop.f32.mrb[0].mxu0  ;;  %v3612_v25 = vpop.f32.mrb[0].mxu1 }
 0x102   : > { %v796_v9 = vpop.f32.mrb[1].mxu0  ;;  %v2082_v17 = vmul.f32 %v3244_v8, %v3244_v8  ;;  %v3614_v30 = vpop.f32.mrb[1].mxu1 }
 0x103   : > { %v3245_v10 = vpop.f32.mrb[2].mxu0  ;;  %v2080_v13 = vmul.f32 %v796_v9, %v796_v9  ;;  %v3616_v33 = vpop.f32.mrb[2].mxu1 }
 0x104   : > { %v2779_v11 = vpack.c.bf16 %v3245_v10, %v3244_v8  ;;  %v799_v12 = vpop.f32.mrb[3].mxu0  ;;  %v2083_v20 = vmul.f32 %v3245_v10, %v3245_v10  ;;  %v3618_v38 = vpop.f32.mrb[3].mxu1  ;;  %v2939_v39 = vpack.c.bf16 %v3616_v33, %v3612_v25 }
 0x105   : > { %v2774_v14 = vpack.c.bf16 %v799_v12, %v796_v9  ;;  %v1947_v15 = vadd.f32 %v799_v12, %v796_v9  ;;  %v2081_v16 = vmul.f32 %v799_v12, %v799_v12  ;;  %v2934_v40 = vpack.c.bf16 %v3618_v38, %v3614_v30 }
 0x106   : > { %3091 = vst [vmem:[%s3608_s10 + $0x8] sm:$0xff] %v2779_v11   ;;  %3123 = vst [vmem:[%s3608_s10 + $0x108] sm:$0xff] %v2939_v39  }
 0x107   : > { %2775 = vst [vmem:[%s3608_s10] sm:$0xff] %v2774_v14   ;;  %v1948_v18 = vadd.f32 %v3244_v8, %v1947_v15  ;;  %v2208_v19 = vadd.f32 %v2081_v16, %v2080_v13  ;;  %3122 = vst [vmem:[%s3608_s10 + $0x100] sm:$0xff] %v2934_v40  }
 0x109   : > { %v2209_v21 = vadd.f32 %v2208_v19, %v2082_v17  ;;  %v3248_v22 = vpop.f32.mrb[4].mxu0  ;;  %v1949_v23 = vadd.f32 %v3245_v10, %v1948_v18  ;;  %v3628_v49 = vpop.f32.mrb[4].mxu1 }
 0x10a   : > { %v812_v24 = vpop.f32.mrb[5].mxu0  ;;  %v2086_v41 = vmul.f32 %v3248_v22, %v3248_v22  ;;  %v3630_v54 = vpop.f32.mrb[5].mxu1 }
 0x10b   : > { %v1950_v26 = vadd.f32 %v1949_v23, %v812_v24  ;;  %v2084_v27 = vmul.f32 %v812_v24, %v812_v24  ;;  %v2210_v28 = vadd.f32 %v2209_v21, %v2083_v20  ;;  %v3249_v29 = vpop.f32.mrb[6].mxu0  ;;  %v3632_v57 = vpop.f32.mrb[6].mxu1 }
 0x10c   : > { %v2789_v31 = vpack.c.bf16 %v3249_v29, %v3248_v22  ;;  %v815_v32 = vpop.f32.mrb[7].mxu0  ;;  %v2087_v44 = vmul.f32 %v3249_v29, %v3249_v29  ;;  %v3634_v62 = vpop.f32.mrb[7].mxu1  ;;  %v2949_v63 = vpack.c.bf16 %v3632_v57, %v3628_v49 }
 0x10d   : > { %v2211_v34 = vadd.f32 %v2210_v28, %v2084_v27  ;;  %v2784_v35 = vpack.c.bf16 %v815_v32, %v812_v24  ;;  %v1951_v36 = vadd.f32 %v1950_v26, %v815_v32  ;;  %v2085_v37 = vmul.f32 %v815_v32, %v815_v32 }
 0x10e   : > { %3093 = vst [vmem:[%s3608_s10 + $0x18] sm:$0xff] %v2789_v31   ;;  %v2944_v0 = vpack.c.bf16 %v3634_v62, %v3630_v54  ;;  %3125 = vst [vmem:[%s3608_s10 + $0x118] sm:$0xff] %v2949_v63  }
 0x10f   : > { %3092 = vst [vmem:[%s3608_s10 + $0x10] sm:$0xff] %v2784_v35   ;;  %v1952_v42 = vadd.f32 %v3248_v22, %v1951_v36  ;;  %v2212_v43 = vadd.f32 %v2211_v34, %v2085_v37 }
 0x110   : > { %3124 = vst [vmem:[%s3608_s10 + $0x110] sm:$0xff] %v2944_v0  }
 0x111   : > { %v2213_v45 = vadd.f32 %v2212_v43, %v2086_v41  ;;  %v3252_v46 = vpop.f32.mrb[8].mxu0  ;;  %v1953_v47 = vadd.f32 %v3249_v29, %v1952_v42  ;;  %v3644_v9 = vpop.f32.mrb[8].mxu1 }
 0x112   : > { %v828_v48 = vpop.f32.mrb[9].mxu0  ;;  %v2090_v1 = vmul.f32 %v3252_v46, %v3252_v46  ;;  %v3646_v14 = vpop.f32.mrb[9].mxu1 }
 0x113   : > { %v1954_v50 = vadd.f32 %v1953_v47, %v828_v48  ;;  %v2088_v51 = vmul.f32 %v828_v48, %v828_v48  ;;  %v2214_v52 = vadd.f32 %v2213_v45, %v2087_v44  ;;  %v3253_v53 = vpop.f32.mrb[10].mxu0  ;;  %v3648_v17 = vpop.f32.mrb[10].mxu1 }
 0x114   : > { %v2799_v55 = vpack.c.bf16 %v3253_v53, %v3252_v46  ;;  %v831_v56 = vpop.f32.mrb[11].mxu0  ;;  %v2091_v4 = vmul.f32 %v3253_v53, %v3253_v53  ;;  %v3650_v22 = vpop.f32.mrb[11].mxu1  ;;  %v2959_v23 = vpack.c.bf16 %v3648_v17, %v3644_v9 }
 0x115   : > { %v2215_v58 = vadd.f32 %v2214_v52, %v2088_v51  ;;  %v2794_v59 = vpack.c.bf16 %v831_v56, %v828_v48  ;;  %v1955_v60 = vadd.f32 %v1954_v50, %v831_v56  ;;  %v2089_v61 = vmul.f32 %v831_v56, %v831_v56 }
 0x116   : > { %3095 = vst [vmem:[%s3608_s10 + $0x28] sm:$0xff] %v2799_v55   ;;  %v2954_v24 = vpack.c.bf16 %v3650_v22, %v3646_v14  ;;  %3127 = vst [vmem:[%s3608_s10 + $0x128] sm:$0xff] %v2959_v23  }
 0x117   : > { %3094 = vst [vmem:[%s3608_s10 + $0x20] sm:$0xff] %v2794_v59   ;;  %v1956_v2 = vadd.f32 %v3252_v46, %v1955_v60  ;;  %v2216_v3 = vadd.f32 %v2215_v58, %v2089_v61 }
 0x118   : > { %3126 = vst [vmem:[%s3608_s10 + $0x120] sm:$0xff] %v2954_v24  }
 0x119   : > { %v2217_v5 = vadd.f32 %v2216_v3, %v2090_v1  ;;  %v3256_v6 = vpop.f32.mrb[12].mxu0  ;;  %v1957_v7 = vadd.f32 %v3253_v53, %v1956_v2  ;;  %v3660_v36 = vpop.f32.mrb[12].mxu1 }
 0x11a   : > { %v844_v8 = vpop.f32.mrb[13].mxu0  ;;  %v2094_v26 = vmul.f32 %v3256_v6, %v3256_v6  ;;  %v3662_v42 = vpop.f32.mrb[13].mxu1 }
 0x11b   : > { %v1958_v10 = vadd.f32 %v1957_v7, %v844_v8  ;;  %v2092_v11 = vmul.f32 %v844_v8, %v844_v8  ;;  %v2218_v12 = vadd.f32 %v2217_v5, %v2091_v4  ;;  %v3257_v13 = vpop.f32.mrb[14].mxu0  ;;  %v3664_v45 = vpop.f32.mrb[14].mxu1 }
 0x11c   : > { %v2809_v15 = vpack.c.bf16 %v3257_v13, %v3256_v6  ;;  %v847_v16 = vpop.f32.mrb[15].mxu0  ;;  %v2095_v29 = vmul.f32 %v3257_v13, %v3257_v13  ;;  %v3666_v51 = vpop.f32.mrb[15].mxu1  ;;  %v2969_v52 = vpack.c.bf16 %v3664_v45, %v3660_v36 }
 0x11d   : > { %v2219_v18 = vadd.f32 %v2218_v12, %v2092_v11  ;;  %v2804_v19 = vpack.c.bf16 %v847_v16, %v844_v8  ;;  %v1959_v20 = vadd.f32 %v1958_v10, %v847_v16  ;;  %v2093_v21 = vmul.f32 %v847_v16, %v847_v16 }
 0x11e   : > { %3097 = vst [vmem:[%s3608_s10 + $0x38] sm:$0xff] %v2809_v15   ;;  %v2964_v53 = vpack.c.bf16 %v3666_v51, %v3662_v42  ;;  %3129 = vst [vmem:[%s3608_s10 + $0x138] sm:$0xff] %v2969_v52  }
 0x11f   : > { %3096 = vst [vmem:[%s3608_s10 + $0x30] sm:$0xff] %v2804_v19   ;;  %v1960_v27 = vadd.f32 %v3256_v6, %v1959_v20  ;;  %v2220_v28 = vadd.f32 %v2219_v18, %v2093_v21 }
 0x120   : > { %3128 = vst [vmem:[%s3608_s10 + $0x130] sm:$0xff] %v2964_v53  }
 0x121   : > { %v2221_v31 = vadd.f32 %v2220_v28, %v2094_v26  ;;  %v3260_v32 = vpop.f32.mrb[16].mxu0  ;;  %v1961_v34 = vadd.f32 %v3257_v13, %v1960_v27  ;;  %v3676_v1 = vpop.f32.mrb[16].mxu1 }
 0x122   : > { %v860_v35 = vpop.f32.mrb[17].mxu0  ;;  %v2098_v55 = vmul.f32 %v3260_v32, %v3260_v32  ;;  %v3678_v6 = vpop.f32.mrb[17].mxu1 }
 0x123   : > { %v1962_v37 = vadd.f32 %v1961_v34, %v860_v35  ;;  %v2096_v39 = vmul.f32 %v860_v35, %v860_v35  ;;  %v2222_v40 = vadd.f32 %v2221_v31, %v2095_v29  ;;  %v3261_v41 = vpop.f32.mrb[18].mxu0  ;;  %v3680_v10 = vpop.f32.mrb[18].mxu1 }
 0x124   : > { %v2819_v43 = vpack.c.bf16 %v3261_v41, %v3260_v32  ;;  %v863_v44 = vpop.f32.mrb[19].mxu0  ;;  %v2099_v59 = vmul.f32 %v3261_v41, %v3261_v41  ;;  %v3682_v16 = vpop.f32.mrb[19].mxu1  ;;  %v2979_v18 = vpack.c.bf16 %v3680_v10, %v3676_v1 }
 0x125   : > { %v2223_v46 = vadd.f32 %v2222_v40, %v2096_v39  ;;  %v2814_v47 = vpack.c.bf16 %v863_v44, %v860_v35  ;;  %v1963_v48 = vadd.f32 %v1962_v37, %v863_v44  ;;  %v2097_v50 = vmul.f32 %v863_v44, %v863_v44 }
 0x126   : > { %3099 = vst [vmem:[%s3608_s10 + $0x48] sm:$0xff] %v2819_v43   ;;  %v2974_v19 = vpack.c.bf16 %v3682_v16, %v3678_v6  ;;  %3131 = vst [vmem:[%s3608_s10 + $0x148] sm:$0xff] %v2979_v18  }
 0x127   : > { %3098 = vst [vmem:[%s3608_s10 + $0x40] sm:$0xff] %v2814_v47   ;;  %v1964_v56 = vadd.f32 %v3260_v32, %v1963_v48  ;;  %v2224_v58 = vadd.f32 %v2223_v46, %v2097_v50 }
 0x128   : > { %3130 = vst [vmem:[%s3608_s10 + $0x140] sm:$0xff] %v2974_v19  }
 0x129   : > { %v2225_v60 = vadd.f32 %v2224_v58, %v2098_v55  ;;  %v3264_v61 = vpop.f32.mrb[20].mxu0  ;;  %v1965_v63 = vadd.f32 %v3261_v41, %v1964_v56  ;;  %v3692_v31 = vpop.f32.mrb[20].mxu1 }
 0x12a   : > { %v876_v0 = vpop.f32.mrb[21].mxu0  ;;  %v2102_v20 = vmul.f32 %v3264_v61, %v3264_v61  ;;  %v3694_v39 = vpop.f32.mrb[21].mxu1 }
 0x12b   : > { %v1966_v2 = vadd.f32 %v1965_v63, %v876_v0  ;;  %v2100_v3 = vmul.f32 %v876_v0, %v876_v0  ;;  %v2226_v4 = vadd.f32 %v2225_v60, %v2099_v59  ;;  %v3265_v5 = vpop.f32.mrb[22].mxu0  ;;  %v3696_v43 = vpop.f32.mrb[22].mxu1 }
 0x12c   : > { %v2829_v7 = vpack.c.bf16 %v3265_v5, %v3264_v61  ;;  %v879_v8 = vpop.f32.mrb[23].mxu0  ;;  %v2103_v24 = vmul.f32 %v3265_v5, %v3265_v5  ;;  %v3698_v50 = vpop.f32.mrb[23].mxu1  ;;  %v2989_v52 = vpack.c.bf16 %v3696_v43, %v3692_v31 }
 0x12d   : > { %v2227_v11 = vadd.f32 %v2226_v4, %v2100_v3  ;;  %v2824_v12 = vpack.c.bf16 %v879_v8, %v876_v0  ;;  %v1967_v13 = vadd.f32 %v1966_v2, %v879_v8  ;;  %v2101_v15 = vmul.f32 %v879_v8, %v879_v8 }
 0x12e   : > { %3101 = vst [vmem:[%s3608_s10 + $0x58] sm:$0xff] %v2829_v7   ;;  %v2984_v53 = vpack.c.bf16 %v3698_v50, %v3694_v39  ;;  %3133 = vst [vmem:[%s3608_s10 + $0x158] sm:$0xff] %v2989_v52  }
 0x12f   : > { %3100 = vst [vmem:[%s3608_s10 + $0x50] sm:$0xff] %v2824_v12   ;;  %v1968_v21 = vadd.f32 %v3264_v61, %v1967_v13  ;;  %v2228_v23 = vadd.f32 %v2227_v11, %v2101_v15 }
 0x130   : > { %3132 = vst [vmem:[%s3608_s10 + $0x150] sm:$0xff] %v2984_v53  }
 0x131   : > { %v2229_v26 = vadd.f32 %v2228_v23, %v2102_v20  ;;  %v3268_v27 = vpop.f32.mrb[24].mxu0  ;;  %v1969_v28 = vadd.f32 %v3265_v5, %v1968_v21  ;;  %v3708_v2 = vpop.f32.mrb[24].mxu1 }
 0x132   : > { %v892_v29 = vpop.f32.mrb[25].mxu0  ;;  %v2106_v55 = vmul.f32 %v3268_v27, %v3268_v27  ;;  %v3710_v8 = vpop.f32.mrb[25].mxu1 }
 0x133   : > { %v1970_v32 = vadd.f32 %v1969_v28, %v892_v29  ;;  %v2104_v34 = vmul.f32 %v892_v29, %v892_v29  ;;  %v2230_v35 = vadd.f32 %v2229_v26, %v2103_v24  ;;  %v3269_v37 = vpop.f32.mrb[26].mxu0  ;;  %v3712_v13 = vpop.f32.mrb[26].mxu1 }
 0x134   : > { %v2839_v40 = vpack.c.bf16 %v3269_v37, %v3268_v27  ;;  %v895_v41 = vpop.f32.mrb[27].mxu0  ;;  %v2107_v59 = vmul.f32 %v3269_v37, %v3269_v37  ;;  %v3714_v21 = vpop.f32.mrb[27].mxu1  ;;  %v2999_v23 = vpack.c.bf16 %v3712_v13, %v3708_v2 }
 0x135   : > { %v2231_v44 = vadd.f32 %v2230_v35, %v2104_v34  ;;  %v2834_v46 = vpack.c.bf16 %v895_v41, %v892_v29  ;;  %v1971_v47 = vadd.f32 %v1970_v32, %v895_v41  ;;  %v2105_v48 = vmul.f32 %v895_v41, %v895_v41 }
 0x136   : > { %3103 = vst [vmem:[%s3608_s10 + $0x68] sm:$0xff] %v2839_v40   ;;  %v2994_v24 = vpack.c.bf16 %v3714_v21, %v3710_v8  ;;  %3135 = vst [vmem:[%s3608_s10 + $0x168] sm:$0xff] %v2999_v23  }
 0x137   : > { %3102 = vst [vmem:[%s3608_s10 + $0x60] sm:$0xff] %v2834_v46   ;;  %v1972_v56 = vadd.f32 %v3268_v27, %v1971_v47  ;;  %v2232_v58 = vadd.f32 %v2231_v44, %v2105_v48 }
 0x138   : > { %3134 = vst [vmem:[%s3608_s10 + $0x160] sm:$0xff] %v2994_v24  }
 0x139   : > { %v2233_v60 = vadd.f32 %v2232_v58, %v2106_v55  ;;  %v3272_v61 = vpop.f32.mrb[28].mxu0  ;;  %v1973_v63 = vadd.f32 %v3269_v37, %v1972_v56  ;;  %v3724_v40 = vpop.f32.mrb[28].mxu1 }
 0x13a   : > { %v908_v0 = vpop.f32.mrb[29].mxu0  ;;  %v2110_v26 = vmul.f32 %v3272_v61, %v3272_v61  ;;  %v3726_v48 = vpop.f32.mrb[29].mxu1 }
 0x13b   : > { %v1974_v3 = vadd.f32 %v1973_v63, %v908_v0  ;;  %v2108_v4 = vmul.f32 %v908_v0, %v908_v0  ;;  %v2234_v5 = vadd.f32 %v2233_v60, %v2107_v59  ;;  %v3273_v7 = vpop.f32.mrb[30].mxu0  ;;  %v3728_v55 = vpop.f32.mrb[30].mxu1 }
 0x13c   : > { %v2849_v11 = vpack.c.bf16 %v3273_v7, %v3272_v61  ;;  %v911_v12 = vpop.f32.mrb[31].mxu0  ;;  %v2111_v29 = vmul.f32 %v3273_v7, %v3273_v7  ;;  %v3009_v63 = vpack.c.bf16 %v3728_v55, %v3724_v40 }
 0x13d   : > { %v2235_v15 = vadd.f32 %v2234_v5, %v2108_v4  ;;  %v2844_v18 = vpack.c.bf16 %v911_v12, %v908_v0  ;;  %v1975_v19 = vadd.f32 %v1974_v3, %v911_v12  ;;  %v2109_v20 = vmul.f32 %v911_v12, %v911_v12 }
 0x13e   : > { %3105 = vst [vmem:[%s3608_s10 + $0x78] sm:$0xff] %v2849_v11   ;;  %3137 = vst [vmem:[%s3608_s10 + $0x178] sm:$0xff] %v3009_v63  }
 0x13f   : > { %3104 = vst [vmem:[%s3608_s10 + $0x70] sm:$0xff] %v2844_v18   ;;  %v1976_v27 = vadd.f32 %v3272_v61, %v1975_v19  ;;  %v2236_v28 = vadd.f32 %v2235_v15, %v2109_v20  ;;  %v3730_v61 = vpop.f32.mrb[31].mxu1 }
 0x140   : > { %v3004_v0 = vpack.c.bf16 %v3730_v61, %v3726_v48 }
 0x141   : > { %v2237_v32 = vadd.f32 %v2236_v28, %v2110_v26  ;;  %v3276_v34 = vpop.f32.mrb[32].mxu0  ;;  %v1977_v35 = vadd.f32 %v3273_v7, %v1976_v27  ;;  %v3740_v19 = vpop.f32.mrb[32].mxu1 }
 0x142   : > { %v924_v37 = vpop.f32.mrb[33].mxu0  ;;  %v2114_v3 = vmul.f32 %v3276_v34, %v3276_v34  ;;  %3136 = vst [vmem:[%s3608_s10 + $0x170] sm:$0xff] %v3004_v0   ;;  %v3742_v27 = vpop.f32.mrb[33].mxu1 }
 0x143   : > { %v1978_v41 = vadd.f32 %v1977_v35, %v924_v37  ;;  %v2112_v44 = vmul.f32 %v924_v37, %v924_v37  ;;  %v2238_v46 = vadd.f32 %v2237_v32, %v2111_v29  ;;  %v3277_v47 = vpop.f32.mrb[34].mxu0  ;;  %v3744_v32 = vpop.f32.mrb[34].mxu1 }
 0x144   : > { %v2859_v52 = vpack.c.bf16 %v3277_v47, %v3276_v34  ;;  %v927_v53 = vpop.f32.mrb[35].mxu0  ;;  %v2115_v7 = vmul.f32 %v3277_v47, %v3277_v47 }
 0x145   : > { %v2239_v56 = vadd.f32 %v2238_v46, %v2112_v44  ;;  %v2854_v58 = vpack.c.bf16 %v927_v53, %v924_v37  ;;  %v1979_v59 = vadd.f32 %v1978_v41, %v927_v53  ;;  %v2113_v60 = vmul.f32 %v927_v53, %v927_v53  ;;  %v3746_v44 = vpop.f32.mrb[35].mxu1 }
 0x146   : > { %3107 = vst [vmem:[%s3608_s10 + $0x88] sm:$0xff] %v2859_v52   ;;  %v3019_v46 = vpack.c.bf16 %v3744_v32, %v3740_v19 }
 0x147   : > { %3106 = vst [vmem:[%s3608_s10 + $0x80] sm:$0xff] %v2854_v58   ;;  %v1980_v4 = vadd.f32 %v3276_v34, %v1979_v59  ;;  %v2240_v5 = vadd.f32 %v2239_v56, %v2113_v60 }
 0x148   : > { %3139 = vst [vmem:[%s3608_s10 + $0x188] sm:$0xff] %v3019_v46  }
 0x149   : > { %v2241_v11 = vadd.f32 %v2240_v5, %v2114_v3  ;;  %v3280_v12 = vpop.f32.mrb[36].mxu0  ;;  %v1981_v15 = vadd.f32 %v3277_v47, %v1980_v4  ;;  %v3014_v47 = vpack.c.bf16 %v3746_v44, %v3742_v27  ;;  %v3756_v3 = vpop.f32.mrb[36].mxu1 }
 0x14a   : > { %v940_v18 = vpop.f32.mrb[37].mxu0  ;;  %v2118_v52 = vmul.f32 %v3280_v12, %v3280_v12 }
 0x14b   : > { %v1982_v20 = vadd.f32 %v1981_v15, %v940_v18  ;;  %v2116_v23 = vmul.f32 %v940_v18, %v940_v18  ;;  %v2242_v24 = vadd.f32 %v2241_v11, %v2115_v7  ;;  %v3281_v26 = vpop.f32.mrb[38].mxu0  ;;  %3138 = vst [vmem:[%s3608_s10 + $0x180] sm:$0xff] %v3014_v47   ;;  %v3758_v15 = vpop.f32.mrb[37].mxu1 }
 0x14c   : > { %v2869_v28 = vpack.c.bf16 %v3281_v26, %v3280_v12  ;;  %v943_v29 = vpop.f32.mrb[39].mxu0  ;;  %v2119_v58 = vmul.f32 %v3281_v26, %v3281_v26 }
 0x14d   : > { %v2243_v34 = vadd.f32 %v2242_v24, %v2116_v23  ;;  %v2864_v35 = vpack.c.bf16 %v943_v29, %v940_v18  ;;  %v1983_v37 = vadd.f32 %v1982_v20, %v943_v29  ;;  %v2117_v41 = vmul.f32 %v943_v29, %v943_v29  ;;  %v3760_v20 = vpop.f32.mrb[38].mxu1 }
 0x14e   : > { %3109 = vst [vmem:[%s3608_s10 + $0x98] sm:$0xff] %v2869_v28   ;;  %v3762_v29 = vpop.f32.mrb[39].mxu1 }
 0x14f   : > { %3108 = vst [vmem:[%s3608_s10 + $0x90] sm:$0xff] %v2864_v35   ;;  %v1984_v53 = vadd.f32 %v3280_v12, %v1983_v37  ;;  %v2244_v56 = vadd.f32 %v2243_v34, %v2117_v41  ;;  %v3029_v34 = vpack.c.bf16 %v3760_v20, %v3756_v3  ;;  %v3024_v35 = vpack.c.bf16 %v3762_v29, %v3758_v15 }
 0x151   : > { %v2245_v59 = vadd.f32 %v2244_v56, %v2118_v52  ;;  %v3284_v60 = vpop.f32.mrb[40].mxu0  ;;  %v1985_v63 = vadd.f32 %v3281_v26, %v1984_v53  ;;  %3141 = vst [vmem:[%s3608_s10 + $0x198] sm:$0xff] %v3029_v34   ;;  %3140 = vst [vmem:[%s3608_s10 + $0x190] sm:$0xff] %v3024_v35  }
 0x152   : > { %v956_v0 = vpop.f32.mrb[41].mxu0  ;;  %v2122_v37 = vmul.f32 %v3284_v60, %v3284_v60 }
 0x153   : > { %v1986_v4 = vadd.f32 %v1985_v63, %v956_v0  ;;  %v2120_v5 = vmul.f32 %v956_v0, %v956_v0  ;;  %v2246_v7 = vadd.f32 %v2245_v59, %v2119_v58  ;;  %v3285_v11 = vpop.f32.mrb[42].mxu0  ;;  %v3772_v59 = vpop.f32.mrb[40].mxu1 }
 0x154   : > { %v2879_v12 = vpack.c.bf16 %v3285_v11, %v3284_v60  ;;  %v959_v18 = vpop.f32.mrb[43].mxu0  ;;  %v2123_v47 = vmul.f32 %v3285_v11, %v3285_v11  ;;  %4100 = vst [vmem:[#allocation2_spill] sm:$0xff] %v3772_v59 }
 0x155   : > { %v2247_v23 = vadd.f32 %v2246_v7, %v2120_v5  ;;  %v2874_v24 = vpack.c.bf16 %v959_v18, %v956_v0  ;;  %v1987_v26 = vadd.f32 %v1986_v4, %v959_v18  ;;  %v2121_v28 = vmul.f32 %v959_v18, %v959_v18  ;;  %v3774_v7 = vpop.f32.mrb[41].mxu1 }
 0x156   : > { %3111 = vst [vmem:[%s3608_s10 + $0xa8] sm:$0xff] %v2879_v12   ;;  %v3776_v18 = vpop.f32.mrb[42].mxu1 }
 0x157   : > { %3110 = vst [vmem:[%s3608_s10 + $0xa0] sm:$0xff] %v2874_v24   ;;  %v1988_v41 = vadd.f32 %v3284_v60, %v1987_v26  ;;  %v2248_v46 = vadd.f32 %v2247_v23, %v2121_v28  ;;  %4101 = vst [vmem:[#allocation3_spill] sm:$0xff] %v3776_v18  ;;  %v3778_v28 = vpop.f32.mrb[43].mxu1  ;;  %v3039_v34 = vpack.c.bf16 %v3776_v18, %v3772_v59 }
 0x158   : > { %4102 = vst [vmem:[#allocation4_spill] sm:$0xff] %v3778_v28  ;;  %v3034_v35 = vpack.c.bf16 %v3778_v28, %v3774_v7 }
 0x159   : > { %v2249_v52 = vadd.f32 %v2248_v46, %v2122_v37  ;;  %v3288_v53 = vpop.f32.mrb[44].mxu0  ;;  %v1989_v56 = vadd.f32 %v3285_v11, %v1988_v41  ;;  %3143 = vst [vmem:[%s3608_s10 + $0x1a8] sm:$0xff] %v3039_v34  }
 0x15a   : > { %v972_v58 = vpop.f32.mrb[45].mxu0  ;;  %v2126_v37 = vmul.f32 %v3288_v53, %v3288_v53  ;;  %3142 = vst [vmem:[%s3608_s10 + $0x1a0] sm:$0xff] %v3034_v35  }
 0x15b   : > { %v1990_v63 = vadd.f32 %v1989_v56, %v972_v58  ;;  %v2124_v0 = vmul.f32 %v972_v58, %v972_v58  ;;  %v2250_v4 = vadd.f32 %v2249_v52, %v2123_v47  ;;  %v3289_v5 = vpop.f32.mrb[46].mxu0 }
 0x15c   : > { %v2889_v60 = vpack.c.bf16 %v3289_v5, %v3288_v53  ;;  %v975_v12 = vpop.f32.mrb[47].mxu0  ;;  %v2127_v47 = vmul.f32 %v3289_v5, %v3289_v5 }
 0x15d   : > { %v2251_v23 = vadd.f32 %v2250_v4, %v2124_v0  ;;  %v2884_v24 = vpack.c.bf16 %v975_v12, %v972_v58  ;;  %v1991_v11 = vadd.f32 %v1990_v63, %v975_v12  ;;  %v2125_v26 = vmul.f32 %v975_v12, %v975_v12  ;;  %v3788_v0 = vpop.f32.mrb[44].mxu1 }
 0x15e   : > { %3113 = vst [vmem:[%s3608_s10 + $0xb8] sm:$0xff] %v2889_v60   ;;  %4103 = vst [vmem:[#allocation5_spill] sm:$0xff] %v3788_v0  ;;  %v3790_v59 = vpop.f32.mrb[45].mxu1 }
 0x15f   : > { %3112 = vst [vmem:[%s3608_s10 + $0xb0] sm:$0xff] %v2884_v24   ;;  %v1992_v41 = vadd.f32 %v3288_v53, %v1991_v11  ;;  %v2252_v46 = vadd.f32 %v2251_v23, %v2125_v26  ;;  %4104 = vst [vmem:[#allocation6_spill] sm:$0xff] %v3790_v59  ;;  %v3792_v24 = vpop.f32.mrb[46].mxu1 }
 0x160   : > { %4105 = vst [vmem:[#allocation7_spill] sm:$0xff] %v3792_v24  ;;  %v3794_v35 = vpop.f32.mrb[47].mxu1 }
 0x161   : > { %v2253_v52 = vadd.f32 %v2252_v46, %v2126_v37  ;;  %v3292_v56 = vpop.f32.mrb[48].mxu0  ;;  %v1993_v58 = vadd.f32 %v3289_v5, %v1992_v41  ;;  %4106 = vst [vmem:[#allocation8_spill] sm:$0xff] %v3794_v35  ;;  %v3049_v37 = vpack.c.bf16 %v3792_v24, %v3788_v0  ;;  %v3044_v41 = vpack.c.bf16 %v3794_v35, %v3790_v59 }
 0x162   : > { %v988_v63 = vpop.f32.mrb[49].mxu0  ;;  %v2130_v46 = vmul.f32 %v3292_v56, %v3292_v56 }
 0x163   : > { %v1994_v4 = vadd.f32 %v1993_v58, %v988_v63  ;;  %v2128_v60 = vmul.f32 %v988_v63, %v988_v63  ;;  %v2254_v12 = vadd.f32 %v2253_v52, %v2127_v47  ;;  %v3293_v18 = vpop.f32.mrb[50].mxu0  ;;  %3145 = vst [vmem:[%s3608_s10 + $0x1b8] sm:$0xff] %v3049_v37   ;;  %3144 = vst [vmem:[%s3608_s10 + $0x1b0] sm:$0xff] %v3044_v41  }
 0x164   : > { %v2899_v53 = vpack.c.bf16 %v3293_v18, %v3292_v56  ;;  %v991_v23 = vpop.f32.mrb[51].mxu0  ;;  %v2131_v58 = vmul.f32 %v3293_v18, %v3293_v18 }
 0x165   : > { %v2255_v11 = vadd.f32 %v2254_v12, %v2128_v60  ;;  %v2894_v26 = vpack.c.bf16 %v991_v23, %v988_v63  ;;  %v1995_v5 = vadd.f32 %v1994_v4, %v991_v23  ;;  %v2129_v34 = vmul.f32 %v991_v23, %v991_v23  ;;  %v3804_v23 = vpop.f32.mrb[48].mxu1 }
 0x166   : > { %3115 = vst [vmem:[%s3608_s10 + $0xc8] sm:$0xff] %v2899_v53   ;;  %4107 = vst [vmem:[#allocation9_spill] sm:$0xff] %v3804_v23  ;;  %v3806_v35 = vpop.f32.mrb[49].mxu1 }
 0x167   : > { %3114 = vst [vmem:[%s3608_s10 + $0xc0] sm:$0xff] %v2894_v26   ;;  %v1996_v47 = vadd.f32 %v3292_v56, %v1995_v5  ;;  %v2256_v52 = vadd.f32 %v2255_v11, %v2129_v34  ;;  %4108 = vst [vmem:[#allocation10_spill] sm:$0xff] %v3806_v35  ;;  %v3808_v26 = vpop.f32.mrb[50].mxu1 }
 0x168   : > { %4109 = vst [vmem:[#allocation11_spill] sm:$0xff] %v3808_v26  ;;  %v3810_v41 = vpop.f32.mrb[51].mxu1 }
 0x169   : > { %v2257_v60 = vadd.f32 %v2256_v52, %v2130_v46  ;;  %v3296_v63 = vpop.f32.mrb[52].mxu0  ;;  %v1997_v4 = vadd.f32 %v3293_v18, %v1996_v47  ;;  %4110 = vst [vmem:[#allocation12_spill] sm:$0xff] %v3810_v41  ;;  %v3059_v46 = vpack.c.bf16 %v3808_v26, %v3804_v23  ;;  %v3054_v47 = vpack.c.bf16 %v3810_v41, %v3806_v35 }
 0x16a   : > { %v1004_v12 = vpop.f32.mrb[53].mxu0  ;;  %v2134_v52 = vmul.f32 %v3296_v63, %v3296_v63 }
 0x16b   : > { %v1998_v53 = vadd.f32 %v1997_v4, %v1004_v12  ;;  %v2132_v28 = vmul.f32 %v1004_v12, %v1004_v12  ;;  %v2258_v24 = vadd.f32 %v2257_v60, %v2131_v58  ;;  %v3297_v0 = vpop.f32.mrb[54].mxu0  ;;  %3147 = vst [vmem:[%s3608_s10 + $0x1c8] sm:$0xff] %v3059_v46   ;;  %3146 = vst [vmem:[%s3608_s10 + $0x1c0] sm:$0xff] %v3054_v47  }
 0x16c   : > { %v2909_v56 = vpack.c.bf16 %v3297_v0, %v3296_v63  ;;  %v1007_v11 = vpop.f32.mrb[55].mxu0  ;;  %v2135_v4 = vmul.f32 %v3297_v0, %v3297_v0 }
 0x16d   : > { %v2259_v5 = vadd.f32 %v2258_v24, %v2132_v28  ;;  %v2904_v34 = vpack.c.bf16 %v1007_v11, %v1004_v12  ;;  %v1999_v18 = vadd.f32 %v1998_v53, %v1007_v11  ;;  %v2133_v37 = vmul.f32 %v1007_v11, %v1007_v11  ;;  %v3820_v11 = vpop.f32.mrb[52].mxu1 }
 0x16e   : > { %3117 = vst [vmem:[%s3608_s10 + $0xd8] sm:$0xff] %v2909_v56   ;;  %4111 = vst [vmem:[#allocation13_spill] sm:$0xff] %v3820_v11  ;;  %v3822_v41 = vpop.f32.mrb[53].mxu1 }
 0x16f   : > { %3116 = vst [vmem:[%s3608_s10 + $0xd0] sm:$0xff] %v2904_v34   ;;  %v2000_v58 = vadd.f32 %v3296_v63, %v1999_v18  ;;  %v2260_v60 = vadd.f32 %v2259_v5, %v2133_v37  ;;  %v3824_v34 = vpop.f32.mrb[54].mxu1 }
 0x170   : > { %4112 = vst [vmem:[#allocation14_spill] sm:$0xff] %v3824_v34  ;;  %v3826_v47 = vpop.f32.mrb[55].mxu1 }
 0x171   : > { %v2261_v28 = vadd.f32 %v2260_v60, %v2134_v52  ;;  %v3300_v24 = vpop.f32.mrb[56].mxu0  ;;  %v2001_v12 = vadd.f32 %v3297_v0, %v2000_v58  ;;  %4113 = vst [vmem:[#allocation15_spill] sm:$0xff] %v3826_v47  ;;  %v3069_v52 = vpack.c.bf16 %v3824_v34, %v3820_v11  ;;  %v3064_v58 = vpack.c.bf16 %v3826_v47, %v3822_v41 }
 0x172   : > { %v1020_v53 = vpop.f32.mrb[57].mxu0  ;;  %v2138_v60 = vmul.f32 %v3300_v24, %v3300_v24 }
 0x173   : > { %v2002_v56 = vadd.f32 %v2001_v12, %v1020_v53  ;;  %v2136_v59 = vmul.f32 %v1020_v53, %v1020_v53  ;;  %v2262_v26 = vadd.f32 %v2261_v28, %v2135_v4  ;;  %v3301_v23 = vpop.f32.mrb[58].mxu0  ;;  %3149 = vst [vmem:[%s3608_s10 + $0x1d8] sm:$0xff] %v3069_v52   ;;  %3148 = vst [vmem:[%s3608_s10 + $0x1d0] sm:$0xff] %v3064_v58  }
 0x174   : > { %v2919_v63 = vpack.c.bf16 %v3301_v23, %v3300_v24  ;;  %v1023_v5 = vpop.f32.mrb[59].mxu0  ;;  %v2139_v12 = vmul.f32 %v3301_v23, %v3301_v23 }
 0x175   : > { %v2263_v18 = vadd.f32 %v2262_v26, %v2136_v59  ;;  %v2914_v37 = vpack.c.bf16 %v1023_v5, %v1020_v53  ;;  %v2003_v0 = vadd.f32 %v2002_v56, %v1023_v5  ;;  %v2137_v46 = vmul.f32 %v1023_v5, %v1023_v5  ;;  %v3836_v5 = vpop.f32.mrb[56].mxu1 }
 0x176   : > { %3119 = vst [vmem:[%s3608_s10 + $0xe8] sm:$0xff] %v2919_v63   ;;  %v3838_v47 = vpop.f32.mrb[57].mxu1 }
 0x177   : > { %3118 = vst [vmem:[%s3608_s10 + $0xe0] sm:$0xff] %v2914_v37   ;;  %v2004_v4 = vadd.f32 %v3300_v24, %v2003_v0  ;;  %v2264_v28 = vadd.f32 %v2263_v18, %v2137_v46  ;;  %v3840_v37 = vpop.f32.mrb[58].mxu1 }
 0x178   : > { %4114 = vst [vmem:[#allocation16_spill] sm:$0xff] %v3840_v37  ;;  %v3842_v58 = vpop.f32.mrb[59].mxu1 }
 0x179   : > { %v2265_v59 = vadd.f32 %v2264_v28, %v2138_v60  ;;  %v3304_v26 = vpop.f32.mrb[60].mxu0  ;;  %v2005_v53 = vadd.f32 %v3301_v23, %v2004_v4  ;;  %v3079_v60 = vpack.c.bf16 %v3840_v37, %v3836_v5  ;;  %v3074_v4 = vpack.c.bf16 %v3842_v58, %v3838_v47 }
 0x17a   : > { %v1036_v56 = vpop.f32.mrb[61].mxu0  ;;  %v2142_v28 = vmul.f32 %v3304_v26, %v3304_v26 }
 0x17b   : > { %v2006_v63 = vadd.f32 %v2005_v53, %v1036_v56  ;;  %v2140_v35 = vmul.f32 %v1036_v56, %v1036_v56  ;;  %v2266_v34 = vadd.f32 %v2265_v59, %v2139_v12  ;;  %v3305_v11 = vpop.f32.mrb[62].mxu0  ;;  %3151 = vst [vmem:[%s3608_s10 + $0x1e8] sm:$0xff] %v3079_v60   ;;  %3150 = vst [vmem:[%s3608_s10 + $0x1e0] sm:$0xff] %v3074_v4  }
 0x17c   : > { %v2929_v24 = vpack.c.bf16 %v3305_v11, %v3304_v26  ;;  %v1039_v18 = vpop.f32.mrb[63].mxu0  ;;  %v2143_v53 = vmul.f32 %v3305_v11, %v3305_v11 }
 0x17d   : > { %v2267_v0 = vadd.f32 %v2266_v34, %v2140_v35  ;;  %v2924_v46 = vpack.c.bf16 %v1039_v18, %v1036_v56  ;;  %v2007_v23 = vadd.f32 %v2006_v63, %v1039_v18  ;;  %v2141_v52 = vmul.f32 %v1039_v18, %v1039_v18  ;;  %v3854_v63 = vpop.f32.mrb[60].mxu1 }
 0x17e   : > { %3121 = vst [vmem:[%s3608_s10 + $0xf8] sm:$0xff] %v2929_v24   ;;  %v2144_v56 = vmul.f32 %v3614_v30, %v3614_v30  ;;  %v3857_v37 = vpop.f32.mrb[61].mxu1 }
 0x17f   : > { %3120 = vst [vmem:[%s3608_s10 + $0xf0] sm:$0xff] %v2924_v46   ;;  %v2008_v12 = vadd.f32 %v3304_v26, %v2007_v23  ;;  %v2268_v59 = vadd.f32 %v2267_v0, %v2141_v52  ;;  %v3859_v46 = vpop.f32.mrb[62].mxu1 }
 0x180   : > { %v3089_v23 = vpack.c.bf16 %v3859_v46, %v3854_v63  ;;  %v3866_v52 = vpop.f32.mrb[63].mxu1 }
 0x181   : > { %v2009_v35 = vadd.f32 %v3305_v11, %v2008_v12  ;;  %v2269_v34 = vadd.f32 %v2268_v59, %v2142_v28  ;;  %v2145_v11 = vmul.f32 %v3618_v38, %v3618_v38  ;;  %v3084_v60 = vpack.c.bf16 %v3866_v52, %v3857_v37 }
 0x182   : > { %3153 = vst [vmem:[%s3608_s10 + $0x1f8] sm:$0xff] %v3089_v23   ;;  %v2147_v12 = vmul.f32 %v3616_v33, %v3616_v33 }
 0x183   : > { %v2270_v24 = vadd.f32 %v2269_v34, %v2143_v53  ;;  %v2010_v18 = vadd.f32 %v2009_v35, %v3614_v30  ;;  %v2146_v30 = vmul.f32 %v3612_v25, %v3612_v25  ;;  %3152 = vst [vmem:[%s3608_s10 + $0x1f0] sm:$0xff] %v3084_v60   ;;  %v2148_v53 = vmul.f32 %v3630_v54, %v3630_v54 }
 0x185   : > { %v2271_v26 = vadd.f32 %v2270_v24, %v2144_v56  ;;  %v2011_v0 = vadd.f32 %v2010_v18, %v3618_v38  ;;  %v2150_v18 = vmul.f32 %v3628_v49, %v3628_v49 }
 0x187   : > { %v2012_v4 = vadd.f32 %v3612_v25, %v2011_v0  ;;  %v2272_v28 = vadd.f32 %v2271_v26, %v2145_v11  ;;  %v2149_v25 = vmul.f32 %v3634_v62, %v3634_v62 }
 0x189   : > { %v2273_v38 = vadd.f32 %v2272_v28, %v2146_v30  ;;  %v2013_v59 = vadd.f32 %v3616_v33, %v2012_v4  ;;  %v2151_v33 = vmul.f32 %v3632_v57, %v3632_v57  ;;  %v2153_v28 = vmul.f32 %v3650_v22, %v3650_v22 }
 0x18b   : > { %v2014_v35 = vadd.f32 %v2013_v59, %v3630_v54  ;;  %v2274_v34 = vadd.f32 %v2273_v38, %v2147_v12  ;;  %v2152_v54 = vmul.f32 %v3646_v14, %v3646_v14 }
 0x18d   : > { %v2275_v56 = vadd.f32 %v2274_v34, %v2148_v53  ;;  %v2015_v24 = vadd.f32 %v2014_v35, %v3634_v62 }
 0x18f   : > { %v2016_v26 = vadd.f32 %v3628_v49, %v2015_v24  ;;  %v2276_v0 = vadd.f32 %v2275_v56, %v2149_v25  ;;  %v2154_v49 = vmul.f32 %v3644_v9, %v3644_v9  ;;  %v2157_v24 = vmul.f32 %v3666_v51, %v3666_v51 }
 0x191   : > { %v2277_v11 = vadd.f32 %v2276_v0, %v2150_v18  ;;  %v2017_v23 = vadd.f32 %v3632_v57, %v2016_v26  ;;  %v2155_v57 = vmul.f32 %v3648_v17, %v3648_v17 }
 0x193   : > { %v2018_v60 = vadd.f32 %v2017_v23, %v3646_v14  ;;  %v2278_v30 = vadd.f32 %v2277_v11, %v2151_v33  ;;  %v2156_v14 = vmul.f32 %v3662_v42, %v3662_v42 }
 0x195   : > { %v2279_v4 = vadd.f32 %v2278_v30, %v2152_v54  ;;  %v2019_v62 = vadd.f32 %v2018_v60, %v3650_v22  ;;  %v2161_v54 = vmul.f32 %v3682_v16, %v3682_v16 }
 0x197   : > { %v2020_v12 = vadd.f32 %v3644_v9, %v2019_v62  ;;  %v2280_v38 = vadd.f32 %v2279_v4, %v2153_v28  ;;  %v2158_v9 = vmul.f32 %v3660_v36, %v3660_v36 }
 0x199   : > { %v2281_v59 = vadd.f32 %v2280_v38, %v2154_v49  ;;  %v2021_v53 = vadd.f32 %v3648_v17, %v2020_v12  ;;  %v2159_v17 = vmul.f32 %v3664_v45, %v3664_v45  ;;  %v2165_v38 = vmul.f32 %v3698_v50, %v3698_v50 }
 0x19b   : > { %v2022_v35 = vadd.f32 %v2021_v53, %v3662_v42  ;;  %v2282_v34 = vadd.f32 %v2281_v59, %v2155_v57  ;;  %v2160_v42 = vmul.f32 %v3678_v6, %v3678_v6 }
 0x19d   : > { %v2283_v56 = vadd.f32 %v2282_v34, %v2156_v14  ;;  %v2023_v22 = vadd.f32 %v2022_v35, %v3666_v51 }
 0x19f   : > { %v2024_v25 = vadd.f32 %v3660_v36, %v2023_v22  ;;  %v2284_v18 = vadd.f32 %v2283_v56, %v2157_v24  ;;  %v2162_v36 = vmul.f32 %v3676_v1, %v3676_v1  ;;  %v2169_v22 = vmul.f32 %v3714_v21, %v3714_v21 }
 0x1a1   : > { %v2285_v26 = vadd.f32 %v2284_v18, %v2158_v9  ;;  %v2025_v0 = vadd.f32 %v3664_v45, %v2024_v25  ;;  %v2163_v45 = vmul.f32 %v3680_v10, %v3680_v10 }
 0x1a3   : > { %v2026_v33 = vadd.f32 %v2025_v0, %v3678_v6  ;;  %v2286_v11 = vadd.f32 %v2285_v26, %v2159_v17  ;;  %v2164_v6 = vmul.f32 %v3694_v39, %v3694_v39 }
 0x1a5   : > { %v2287_v23 = vadd.f32 %v2286_v11, %v2160_v42  ;;  %v2027_v51 = vadd.f32 %v2026_v33, %v3682_v16  ;;  %v2173_v42 = vmul.f32 %v3730_v61, %v3730_v61 }
 0x1a7   : > { %v2028_v60 = vadd.f32 %v3676_v1, %v2027_v51  ;;  %v2288_v30 = vadd.f32 %v2287_v23, %v2161_v54  ;;  %v2166_v1 = vmul.f32 %v3692_v31, %v3692_v31 }
 0x1a9   : > { %v2289_v4 = vadd.f32 %v2288_v30, %v2162_v36  ;;  %v2029_v62 = vadd.f32 %v3680_v10, %v2028_v60  ;;  %v2167_v10 = vmul.f32 %v3696_v43, %v3696_v43  ;;  %v2177_v30 = vmul.f32 %v3746_v44, %v3746_v44 }
 0x1ab   : > { %v2030_v28 = vadd.f32 %v2029_v62, %v3694_v39  ;;  %v2290_v49 = vadd.f32 %v2289_v4, %v2163_v45  ;;  %v2168_v39 = vmul.f32 %v3710_v8, %v3710_v8 }
 0x1ad   : > { %v2291_v12 = vadd.f32 %v2290_v49, %v2164_v6  ;;  %v2031_v16 = vadd.f32 %v2030_v28, %v3698_v50 }
 0x1af   : > { %v2032_v57 = vadd.f32 %v3692_v31, %v2031_v16  ;;  %v2292_v59 = vadd.f32 %v2291_v12, %v2165_v38  ;;  %v2170_v31 = vmul.f32 %v3708_v2, %v3708_v2  ;;  %v2181_v16 = vmul.f32 %v3762_v29, %v3762_v29 }
 0x1b1   : > { %v2293_v53 = vadd.f32 %v2292_v59, %v2166_v1  ;;  %v2033_v14 = vadd.f32 %v3696_v43, %v2032_v57  ;;  %v2171_v43 = vmul.f32 %v3712_v13, %v3712_v13 }
 0x1b3   : > { %v2034_v35 = vadd.f32 %v2033_v14, %v3710_v8  ;;  %v2294_v34 = vadd.f32 %v2293_v53, %v2167_v10  ;;  %v2172_v8 = vmul.f32 %v3726_v48, %v3726_v48 }
 0x1b5   : > { %v2295_v56 = vadd.f32 %v2294_v34, %v2168_v39  ;;  %v2035_v50 = vadd.f32 %v2034_v35, %v3714_v21 }
 0x1b7   : > { %v2036_v24 = vadd.f32 %v3708_v2, %v2035_v50  ;;  %v2296_v9 = vadd.f32 %v2295_v56, %v2169_v22  ;;  %v2174_v2 = vmul.f32 %v3724_v40, %v3724_v40  ;;  %v4117_v22 = vld [vmem:[#allocation3_spill] sm:$0xff] }
 0x1b9   : > { %v2297_v25 = vadd.f32 %v2296_v9, %v2170_v31  ;;  %v2037_v18 = vadd.f32 %v3712_v13, %v2036_v24  ;;  %v2175_v13 = vmul.f32 %v3728_v55, %v3728_v55 }
 0x1bb   : > { %v2038_v17 = vadd.f32 %v2037_v18, %v3726_v48  ;;  %v2298_v26 = vadd.f32 %v2297_v25, %v2171_v43  ;;  %v2176_v48 = vmul.f32 %v3742_v27, %v3742_v27 }
 0x1bd   : > { %v2299_v0 = vadd.f32 %v2298_v26, %v2172_v8  ;;  %v2039_v21 = vadd.f32 %v2038_v17, %v3730_v61  ;;  %v4119_v8 = vld [vmem:[#allocation8_spill] sm:$0xff] }
 0x1be   : > { %v2189_v26 = vmul.f32 %v4119_v8, %v4119_v8 }
 0x1bf   : > { %v2040_v33 = vadd.f32 %v3724_v40, %v2039_v21  ;;  %v2300_v11 = vadd.f32 %v2299_v0, %v2173_v42  ;;  %v2178_v40 = vmul.f32 %v3740_v19, %v3740_v19  ;;  %v4120_v0 = vld [vmem:[#allocation5_spill] sm:$0xff] }
 0x1c0   : > { %v2190_v21 = vmul.f32 %v4120_v0, %v4120_v0 }
 0x1c1   : > { %v2301_v23 = vadd.f32 %v2300_v11, %v2174_v2  ;;  %v2041_v51 = vadd.f32 %v3728_v55, %v2040_v33  ;;  %v2179_v55 = vmul.f32 %v3744_v32, %v3744_v32  ;;  %v4121_v33 = vld [vmem:[#allocation7_spill] sm:$0xff] }
 0x1c2   : > { %v2191_v11 = vmul.f32 %v4121_v33, %v4121_v33 }
 0x1c3   : > { %v2042_v54 = vadd.f32 %v2041_v51, %v3742_v27  ;;  %v2302_v36 = vadd.f32 %v2301_v23, %v2175_v13  ;;  %v2180_v27 = vmul.f32 %v3758_v15, %v3758_v15  ;;  %v4122_v51 = vld [vmem:[#allocation10_spill] sm:$0xff] }
 0x1c5   : > { %v2303_v60 = vadd.f32 %v2302_v36, %v2176_v48  ;;  %v2043_v61 = vadd.f32 %v2042_v54, %v3746_v44  ;;  %v2192_v48 = vmul.f32 %v4122_v51, %v4122_v51 }
 0x1c7   : > { %v2044_v45 = vadd.f32 %v3740_v19, %v2043_v61  ;;  %v2304_v4 = vadd.f32 %v2303_v60, %v2177_v30  ;;  %v2182_v19 = vmul.f32 %v3756_v3, %v3756_v3  ;;  %v4123_v61 = vld [vmem:[#allocation12_spill] sm:$0xff] }
 0x1c9   : > { %v2305_v62 = vadd.f32 %v2304_v4, %v2178_v40  ;;  %v2045_v6 = vadd.f32 %v3744_v32, %v2044_v45  ;;  %v2183_v32 = vmul.f32 %v3760_v20, %v3760_v20  ;;  %v2193_v40 = vmul.f32 %v4123_v61, %v4123_v61  ;;  %v4124_v45 = vld [vmem:[#allocation9_spill] sm:$0xff] }
 0x1ca   : > { %v2194_v4 = vmul.f32 %v4124_v45, %v4124_v45 }
 0x1cb   : > { %v2046_v28 = vadd.f32 %v2045_v6, %v3758_v15  ;;  %v2306_v49 = vadd.f32 %v2305_v62, %v2179_v55  ;;  %v2184_v15 = vmul.f32 %v3774_v7, %v3774_v7  ;;  %v4125_v6 = vld [vmem:[#allocation11_spill] sm:$0xff] }
 0x1cd   : > { %v2307_v12 = vadd.f32 %v2306_v49, %v2180_v27  ;;  %v2047_v44 = vadd.f32 %v2046_v28, %v3762_v29  ;;  %v4115_v29 = vld [vmem:[#allocation4_spill] sm:$0xff]  ;;  %v2195_v27 = vmul.f32 %v4125_v6, %v4125_v6 }
 0x1ce   : > { %v2185_v35 = vmul.f32 %v4115_v29, %v4115_v29 }
 0x1cf   : > { %v2048_v38 = vadd.f32 %v3756_v3, %v2047_v44  ;;  %v2308_v1 = vadd.f32 %v2307_v12, %v2181_v16  ;;  %v4116_v3 = vld [vmem:[#allocation2_spill] sm:$0xff]  ;;  %v2196_v12 = vmul.f32 %v3822_v41, %v3822_v41 }
 0x1d0   : > { %v2186_v34 = vmul.f32 %v4116_v3, %v4116_v3 }
 0x1d1   : > { %v2309_v57 = vadd.f32 %v2308_v1, %v2182_v19  ;;  %v2049_v59 = vadd.f32 %v3760_v20, %v2048_v38  ;;  %v2187_v20 = vmul.f32 %v4117_v22, %v4117_v22  ;;  %v4126_v38 = vld [vmem:[#allocation15_spill] sm:$0xff] }
 0x1d3   : > { %v2050_v10 = vadd.f32 %v2049_v59, %v3774_v7  ;;  %v2310_v53 = vadd.f32 %v2309_v57, %v2183_v32  ;;  %v4118_v7 = vld [vmem:[#allocation6_spill] sm:$0xff]  ;;  %v2197_v32 = vmul.f32 %v4126_v38, %v4126_v38  ;;  %v4127_v57 = vld [vmem:[#allocation13_spill] sm:$0xff] }
 0x1d4   : > { %v2188_v9 = vmul.f32 %v4118_v7, %v4118_v7  ;;  %v2198_v59 = vmul.f32 %v4127_v57, %v4127_v57 }
 0x1d5   : > { %v2311_v14 = vadd.f32 %v2310_v53, %v2184_v15  ;;  %v2051_v39 = vadd.f32 %v2050_v10, %v4115_v29  ;;  %v4128_v53 = vld [vmem:[#allocation14_spill] sm:$0xff] }
 0x1d7   : > { %v2052_v56 = vadd.f32 %v4116_v3, %v2051_v39  ;;  %v2312_v50 = vadd.f32 %v2311_v14, %v2185_v35  ;;  %v2199_v14 = vmul.f32 %v4128_v53, %v4128_v53 }
 0x1d9   : > { %v2313_v31 = vadd.f32 %v2312_v50, %v2186_v34  ;;  %v2053_v24 = vadd.f32 %v4117_v22, %v2052_v56  ;;  %v2201_v50 = vmul.f32 %v3842_v58, %v3842_v58  ;;  %v2202_v22 = vmul.f32 %v3836_v5, %v3836_v5 }
 0x1db   : > { %v2054_v43 = vadd.f32 %v2053_v24, %v4118_v7  ;;  %v2314_v25 = vadd.f32 %v2313_v31, %v2187_v20  ;;  %v4129_v24 = vld [vmem:[#allocation16_spill] sm:$0xff] }
 0x1dc   : > { %v2203_v7 = vmul.f32 %v4129_v24, %v4129_v24 }
 0x1dd   : > { %v2315_v18 = vadd.f32 %v2314_v25, %v2188_v9  ;;  %v2055_v17 = vadd.f32 %v2054_v43, %v4119_v8  ;;  %v2204_v43 = vmul.f32 %v3857_v37, %v3857_v37 }
 0x1df   : > { %v2056_v42 = vadd.f32 %v4120_v0, %v2055_v17  ;;  %v2316_v2 = vadd.f32 %v2315_v18, %v2189_v26  ;;  %v2206_v17 = vmul.f32 %v3854_v63, %v3854_v63 }
 0x1e1   : > { %v2317_v13 = vadd.f32 %v2316_v2, %v2190_v21  ;;  %v2057_v23 = vadd.f32 %v4121_v33, %v2056_v42  ;;  %v2207_v21 = vmul.f32 %v3859_v46, %v3859_v46 }
 0x1e3   : > { %v2058_v54 = vadd.f32 %v2057_v23, %v4122_v51  ;;  %v2318_v36 = vadd.f32 %v2317_v13, %v2191_v11 }
 0x1e5   : > { %v2319_v60 = vadd.f32 %v2318_v36, %v2192_v48  ;;  %v2059_v30 = vadd.f32 %v2058_v54, %v4123_v61 }
 0x1e7   : > { %v2060_v55 = vadd.f32 %v4124_v45, %v2059_v30  ;;  %v2320_v62 = vadd.f32 %v2319_v60, %v2193_v40 }
 0x1e9   : > { %v2321_v28 = vadd.f32 %v2320_v62, %v2194_v4  ;;  %v2061_v49 = vadd.f32 %v4125_v6, %v2060_v55 }
 0x1eb   : > { %v2062_v44 = vadd.f32 %v2061_v49, %v3822_v41  ;;  %v2322_v16 = vadd.f32 %v2321_v28, %v2195_v27  ;;  %v2200_v41 = vmul.f32 %v3838_v47, %v3838_v47 }
 0x1ed   : > { %v2323_v19 = vadd.f32 %v2322_v16, %v2196_v12  ;;  %v2063_v1 = vadd.f32 %v2062_v44, %v4126_v38 }
 0x1ef   : > { %v2064_v15 = vadd.f32 %v4127_v57, %v2063_v1  ;;  %v2324_v10 = vadd.f32 %v2323_v19, %v2197_v32 }
 0x1f1   : > { %v2325_v29 = vadd.f32 %v2324_v10, %v2198_v59  ;;  %v2065_v39 = vadd.f32 %v4128_v53, %v2064_v15 }
 0x1f3   : > { %v2066_v35 = vadd.f32 %v2065_v39, %v3838_v47  ;;  %v2326_v3 = vadd.f32 %v2325_v29, %v2199_v14 }
 0x1f5   : > { %v2327_v34 = vadd.f32 %v2326_v3, %v2200_v41  ;;  %v2067_v56 = vadd.f32 %v2066_v35, %v3842_v58 }
 0x1f7   : > { %v2068_v20 = vadd.f32 %v3836_v5, %v2067_v56  ;;  %v2328_v31 = vadd.f32 %v2327_v34, %v2201_v50  ;;  %v2205_v5 = vmul.f32 %v3866_v52, %v3866_v52 }
 0x1f9   : > { %v2329_v9 = vadd.f32 %v2328_v31, %v2202_v22  ;;  %v2069_v47 = vadd.f32 %v4129_v24, %v2068_v20 }
 0x1fb   : > { %v2070_v25 = vadd.f32 %v2069_v47, %v3857_v37  ;;  %v2330_v18 = vadd.f32 %v2329_v9, %v2203_v7 }
 0x1fd   : > { %v2331_v58 = vadd.f32 %v2330_v18, %v2204_v43  ;;  %v2071_v8 = vadd.f32 %v2070_v25, %v3866_v52 }
 0x1ff   : > { %v2072_v26 = vadd.f32 %v3854_v63, %v2071_v8  ;;  %v2332_v0 = vadd.f32 %v2331_v58, %v2205_v5 }
 0x201   : > { %v2073_v42 = vadd.f32 %v3859_v46, %v2072_v26  ;;  %v2333_v37 = vadd.f32 %v2332_v0, %v2206_v17 }
 0x203   : > { %v2074_v2 = vrot.slane %v2073_v42, 4  ;;  %v2334_v33 = vadd.f32 %v2333_v37, %v2207_v21 }
 0x205   : > { %v2075_v11 = vadd.f32 %v2074_v2, %v2073_v42  ;;  %v2335_v13 = vrot.slane %v2334_v33, 4 }
 0x207   : > { %v2076_v23 = vrot.slane %v2075_v11, 2  ;;  %v2336_v51 = vadd.f32 %v2335_v13, %v2334_v33 }
 0x209   : > { %v2077_v52 = vadd.f32 %v2076_v23, %v2075_v11  ;;  %v2337_v48 = vrot.slane %v2336_v51, 2 }
 0x20b   : > { %v2078_v54 = vrot.slane %v2077_v52, 1  ;;  %v2338_v36 = vadd.f32 %v2337_v48, %v2336_v51 }
 0x20d   : > { %v2339_v63 = vrot.slane %v2338_v36, 1  ;;  %v2079_v46 = vadd.f32 %v2078_v54, %v2077_v52 }
 0x20f   : > { %v2340_v60 = vadd.f32 %v2339_v63, %v2338_v36 }
 0x211   : > { %v2342_v61 = vsel %vm2341_vm0, %v2079_v46, %v2340_v60 }
 0x212   : > { %2343 = vst [vmem:[%s184_s16] sm:$0x3] %v2342_v61 }
 0x213 PF: > { %s14_s12 = sadd.s32 1, %s3472_s12  }
 0x214   : > { %p11_p5 = scmp.ge.s32.totalorder %s14_s12, 4  }
 0x216   :  { %13 = sbr.rel (!%p11_p5) target bundleno = 1 (0x1), region = 70 }

// kernel: discriminator_forward.8
= control target key start
LH: loop header
LB: loop body
LE: loop exit
PB: predicated region body
PF: predicated region fallthrough
CT: control target
= control target key end

     0   :  { %v1892_v0 = vmov 0   ;;  %vm1337_vm0 = vcmask 1040384   ;;  %s2476_s1 = inlined_call_operand.vmem [shape: bf16[256,128], index: 1, kind: input, shape index: {}]   ;;  %s2477_s0 = inlined_call_operand.vmem [shape: bf16[512,256], index: 0, kind: input, shape index: {}]   ;;  %s2478_s2 = inlined_call_operand.vmem [shape: bf16[512,128], index: 2, kind: output, shape index: {0}]   ;;  %s2479_s3 = inlined_call_operand.vmem [shape: f32[1,2,128], index: 3, kind: output, shape index: {1}]  }
   0x1   :  { %526 = vmatprep.subr.bf16.mxu0 %v1892_v0  ;;  %v1780_v1 = vld [vmem:[%s2476_s1] sm:$0xff]   ;;  %1747 = vmatprep.subr.bf16.mxu1 %v1892_v0  ;;  %v1781_v2 = vld [vmem:[%s2476_s1 + $0x8] sm:$0xff]   ;;  %v1782_v3 = vld [vmem:[%s2476_s1 + $0x10] sm:$0xff]  }
   0x2   :  { %527 = vmatpush1.bf16.msra.mxu0 %v1780_v1  ;;  %1763 = vmatpush1.bf16.msra.mxu1 %v1780_v1  ;;  %v1783_v4 = vld [vmem:[%s2476_s1 + $0x18] sm:$0xff]   ;;  %v1784_v5 = vld [vmem:[%s2476_s1 + $0x20] sm:$0xff]   ;;  %v1785_v7 = vld [vmem:[%s2476_s1 + $0x28] sm:$0xff]  }
   0x3   :  { %528 = vmatprep.subr.bf16.mxu0 %v1892_v0  ;;  %1748 = vmatprep.subr.bf16.mxu1 %v1892_v0  ;;  %v1798_v6 = vld [vmem:[%s2477_s0 + $0x4] ss:$8 sps:$4 sm:$0xff]   ;;  %v1786_v8 = vld [vmem:[%s2476_s1 + $0x30] sm:$0xff]   ;;  %v1787_v9 = vld [vmem:[%s2476_s1 + $0x38] sm:$0xff]  }
   0x4   :  { %558 = vmatprep.mubr.bf16.mxu0 %v1798_v6  ;;  %v1822_v10 = vld [vmem:[%s2477_s0 + $0x104] ss:$8 sps:$4 sm:$0xff]   ;;  %v1790_v13 = vld [vmem:[%s2476_s1 + $0x50] sm:$0xff]   ;;  %v1791_v14 = vld [vmem:[%s2476_s1 + $0x58] sm:$0xff]  }
   0x5   :  { %686 = vmatprep.mubr.bf16.mxu1 %v1822_v10  ;;  %v1788_v11 = vld [vmem:[%s2476_s1 + $0x40] sm:$0xff]   ;;  %v1789_v12 = vld [vmem:[%s2476_s1 + $0x48] sm:$0xff]   ;;  %v1794_v17 = vld [vmem:[%s2476_s1 + $0x70] sm:$0xff]  }
   0x6   :  { %529 = vmatpush1.bf16.msra.mxu0 %v1781_v2  ;;  %1764 = vmatpush1.bf16.msra.mxu1 %v1781_v2  ;;  %v1792_v15 = vld [vmem:[%s2476_s1 + $0x60] sm:$0xff]   ;;  %v1793_v16 = vld [vmem:[%s2476_s1 + $0x68] sm:$0xff]   ;;  %v1795_v18 = vld [vmem:[%s2476_s1 + $0x78] sm:$0xff]  }
   0x7   :  { %530 = vmatprep.subr.bf16.mxu0 %v1892_v0  ;;  %1749 = vmatprep.subr.bf16.mxu1 %v1892_v0  ;;  %v1796_v19 = vld [vmem:[%s2477_s0] ss:$8 sps:$4 sm:$0xff]   ;;  %v1799_v21 = vld [vmem:[%s2477_s0 + $0x14] ss:$8 sps:$4 sm:$0xff]   ;;  %v1801_v23 = vld [vmem:[%s2477_s0 + $0x10] ss:$8 sps:$4 sm:$0xff]  }
   0x8   :  { %v1820_v20 = vld [vmem:[%s2477_s0 + $0x100] ss:$8 sps:$4 sm:$0xff]   ;;  %v1826_v22 = vld [vmem:[%s2477_s0 + $0x114] ss:$8 sps:$4 sm:$0xff]   ;;  %v1828_v24 = vld [vmem:[%s2477_s0 + $0x110] ss:$8 sps:$4 sm:$0xff]  }
   0x9   :  { %v1802_v25 = vld [vmem:[%s2477_s0 + $0x24] ss:$8 sps:$4 sm:$0xff]   ;;  %v1804_v27 = vld [vmem:[%s2477_s0 + $0x20] ss:$8 sps:$4 sm:$0xff]   ;;  %v1805_v29 = vld [vmem:[%s2477_s0 + $0x34] ss:$8 sps:$4 sm:$0xff]  }
   0xa   :  { %531 = vmatpush1.bf16.msra.mxu0 %v1782_v3  ;;  %1765 = vmatpush1.bf16.msra.mxu1 %v1782_v3  ;;  %v1832_v26 = vld [vmem:[%s2477_s0 + $0x124] ss:$8 sps:$4 sm:$0xff]   ;;  %v1834_v28 = vld [vmem:[%s2477_s0 + $0x120] ss:$8 sps:$4 sm:$0xff]   ;;  %v1838_v30 = vld [vmem:[%s2477_s0 + $0x134] ss:$8 sps:$4 sm:$0xff]  }
   0xb   :  { %532 = vmatprep.subr.bf16.mxu0 %v1892_v0  ;;  %1750 = vmatprep.subr.bf16.mxu1 %v1892_v0  ;;  %v1807_v31 = vld [vmem:[%s2477_s0 + $0x30] ss:$8 sps:$4 sm:$0xff]   ;;  %v1808_v33 = vld [vmem:[%s2477_s0 + $0x44] ss:$8 sps:$4 sm:$0xff]   ;;  %v1810_v35 = vld [vmem:[%s2477_s0 + $0x40] ss:$8 sps:$4 sm:$0xff]  }
   0xc   :  { %v1840_v32 = vld [vmem:[%s2477_s0 + $0x130] ss:$8 sps:$4 sm:$0xff]   ;;  %v1844_v34 = vld [vmem:[%s2477_s0 + $0x144] ss:$8 sps:$4 sm:$0xff]   ;;  %v1846_v36 = vld [vmem:[%s2477_s0 + $0x140] ss:$8 sps:$4 sm:$0xff]  }
   0xd   :  { %v1811_v37 = vld [vmem:[%s2477_s0 + $0x54] ss:$8 sps:$4 sm:$0xff]   ;;  %v1813_v39 = vld [vmem:[%s2477_s0 + $0x50] ss:$8 sps:$4 sm:$0xff]   ;;  %v1814_v41 = vld [vmem:[%s2477_s0 + $0x64] ss:$8 sps:$4 sm:$0xff]  }
   0xe   :  { %533 = vmatpush1.bf16.msra.mxu0 %v1783_v4  ;;  %1766 = vmatpush1.bf16.msra.mxu1 %v1783_v4  ;;  %v1850_v38 = vld [vmem:[%s2477_s0 + $0x154] ss:$8 sps:$4 sm:$0xff]   ;;  %v1852_v40 = vld [vmem:[%s2477_s0 + $0x150] ss:$8 sps:$4 sm:$0xff]   ;;  %v1856_v42 = vld [vmem:[%s2477_s0 + $0x164] ss:$8 sps:$4 sm:$0xff]  }
   0xf   :  { %534 = vmatprep.subr.bf16.mxu0 %v1892_v0  ;;  %1751 = vmatprep.subr.bf16.mxu1 %v1892_v0  ;;  %v1816_v43 = vld [vmem:[%s2477_s0 + $0x60] ss:$8 sps:$4 sm:$0xff]   ;;  %v1817_v45 = vld [vmem:[%s2477_s0 + $0x74] ss:$8 sps:$4 sm:$0xff]   ;;  %v1819_v47 = vld [vmem:[%s2477_s0 + $0x70] ss:$8 sps:$4 sm:$0xff]  }
  0x10   :  { %v1858_v44 = vld [vmem:[%s2477_s0 + $0x160] ss:$8 sps:$4 sm:$0xff]   ;;  %v1862_v46 = vld [vmem:[%s2477_s0 + $0x174] ss:$8 sps:$4 sm:$0xff]   ;;  %v1864_v48 = vld [vmem:[%s2477_s0 + $0x170] ss:$8 sps:$4 sm:$0xff]  }
  0x11   :  { %v1823_v49 = vld [vmem:[%s2477_s0 + $0x84] ss:$8 sps:$4 sm:$0xff]   ;;  %v1825_v51 = vld [vmem:[%s2477_s0 + $0x80] ss:$8 sps:$4 sm:$0xff]   ;;  %v1829_v53 = vld [vmem:[%s2477_s0 + $0x94] ss:$8 sps:$4 sm:$0xff]  }
  0x12   :  { %535 = vmatpush1.bf16.msra.mxu0 %v1784_v5  ;;  %1767 = vmatpush1.bf16.msra.mxu1 %v1784_v5  ;;  %v1868_v50 = vld [vmem:[%s2477_s0 + $0x184] ss:$8 sps:$4 sm:$0xff]   ;;  %v1870_v52 = vld [vmem:[%s2477_s0 + $0x180] ss:$8 sps:$4 sm:$0xff]   ;;  %v1871_v54 = vld [vmem:[%s2477_s0 + $0x194] ss:$8 sps:$4 sm:$0xff]  }
  0x13   :  { %536 = vmatprep.subr.bf16.mxu0 %v1892_v0  ;;  %1752 = vmatprep.subr.bf16.mxu1 %v1892_v0  ;;  %v1831_v55 = vld [vmem:[%s2477_s0 + $0x90] ss:$8 sps:$4 sm:$0xff]   ;;  %v1835_v57 = vld [vmem:[%s2477_s0 + $0xa4] ss:$8 sps:$4 sm:$0xff]   ;;  %v1837_v59 = vld [vmem:[%s2477_s0 + $0xa0] ss:$8 sps:$4 sm:$0xff]  }
  0x14   :  { %v1873_v56 = vld [vmem:[%s2477_s0 + $0x190] ss:$8 sps:$4 sm:$0xff]   ;;  %v1874_v58 = vld [vmem:[%s2477_s0 + $0x1a4] ss:$8 sps:$4 sm:$0xff]   ;;  %v1876_v60 = vld [vmem:[%s2477_s0 + $0x1a0] ss:$8 sps:$4 sm:$0xff]  }
  0x15   :  { %v1841_v61 = vld [vmem:[%s2477_s0 + $0xb4] ss:$8 sps:$4 sm:$0xff]   ;;  %v1843_v63 = vld [vmem:[%s2477_s0 + $0xb0] ss:$8 sps:$4 sm:$0xff]   ;;  %v1847_v1 = vld [vmem:[%s2477_s0 + $0xc4] ss:$8 sps:$4 sm:$0xff]  }
  0x16   :  { %537 = vmatpush1.bf16.msra.mxu0 %v1785_v7  ;;  %1768 = vmatpush1.bf16.msra.mxu1 %v1785_v7  ;;  %v1877_v62 = vld [vmem:[%s2477_s0 + $0x1b4] ss:$8 sps:$4 sm:$0xff]   ;;  %v1880_v2 = vld [vmem:[%s2477_s0 + $0x1c4] ss:$8 sps:$4 sm:$0xff]   ;;  %v1849_v3 = vld [vmem:[%s2477_s0 + $0xc0] ss:$8 sps:$4 sm:$0xff]  }
  0x17   :  { %538 = vmatprep.subr.bf16.mxu0 %v1892_v0  ;;  %1753 = vmatprep.subr.bf16.mxu1 %v1892_v0  ;;  %v1882_v4 = vld [vmem:[%s2477_s0 + $0x1c0] ss:$8 sps:$4 sm:$0xff]   ;;  %v1853_v5 = vld [vmem:[%s2477_s0 + $0xd4] ss:$8 sps:$4 sm:$0xff]   ;;  %v1855_v7 = vld [vmem:[%s2477_s0 + $0xd0] ss:$8 sps:$4 sm:$0xff]  }
  0x18   :  { %v1883_v6 = vld [vmem:[%s2477_s0 + $0x1d4] ss:$8 sps:$4 sm:$0xff]   ;;  %v1886_v10 = vld [vmem:[%s2477_s0 + $0x1e4] ss:$8 sps:$4 sm:$0xff]  }
  0x1a   :  { %539 = vmatpush1.bf16.msra.mxu0 %v1786_v8  ;;  %1769 = vmatpush1.bf16.msra.mxu1 %v1786_v8  ;;  %v1885_v8 = vld [vmem:[%s2477_s0 + $0x1d0] ss:$8 sps:$4 sm:$0xff]  }
  0x1b   :  { %540 = vmatprep.subr.bf16.mxu0 %v1892_v0  ;;  %1754 = vmatprep.subr.bf16.mxu1 %v1892_v0 }
  0x1e   :  { %541 = vmatpush1.bf16.msra.mxu0 %v1787_v9  ;;  %1770 = vmatpush1.bf16.msra.mxu1 %v1787_v9  ;;  %v1859_v9 = vld [vmem:[%s2477_s0 + $0xe4] ss:$8 sps:$4 sm:$0xff]  }
  0x1f   :  { %542 = vmatprep.subr.bf16.mxu0 %v1892_v0  ;;  %1755 = vmatprep.subr.bf16.mxu1 %v1892_v0 }
  0x22   :  { %543 = vmatpush1.bf16.msra.mxu0 %v1788_v11  ;;  %1771 = vmatpush1.bf16.msra.mxu1 %v1788_v11  ;;  %v1861_v11 = vld [vmem:[%s2477_s0 + $0xe0] ss:$8 sps:$4 sm:$0xff]  }
  0x23   :  { %544 = vmatprep.subr.bf16.mxu0 %v1892_v0  ;;  %1756 = vmatprep.subr.bf16.mxu1 %v1892_v0 }
  0x26   :  { %545 = vmatpush1.bf16.msra.mxu0 %v1789_v12  ;;  %1772 = vmatpush1.bf16.msra.mxu1 %v1789_v12  ;;  %v1888_v12 = vld [vmem:[%s2477_s0 + $0x1e0] ss:$8 sps:$4 sm:$0xff]  }
  0x27   :  { %546 = vmatprep.subr.bf16.mxu0 %v1892_v0  ;;  %1757 = vmatprep.subr.bf16.mxu1 %v1892_v0 }
  0x2a   :  { %547 = vmatpush1.bf16.msra.mxu0 %v1790_v13  ;;  %1773 = vmatpush1.bf16.msra.mxu1 %v1790_v13  ;;  %v1865_v13 = vld [vmem:[%s2477_s0 + $0xf4] ss:$8 sps:$4 sm:$0xff]  }
  0x2b   :  { %548 = vmatprep.subr.bf16.mxu0 %v1892_v0  ;;  %1758 = vmatprep.subr.bf16.mxu1 %v1892_v0 }
  0x2e   :  { %549 = vmatpush1.bf16.msra.mxu0 %v1791_v14  ;;  %1774 = vmatpush1.bf16.msra.mxu1 %v1791_v14  ;;  %v1889_v14 = vld [vmem:[%s2477_s0 + $0x1f4] ss:$8 sps:$4 sm:$0xff]  }
  0x2f   :  { %550 = vmatprep.subr.bf16.mxu0 %v1892_v0  ;;  %1759 = vmatprep.subr.bf16.mxu1 %v1892_v0 }
  0x32   :  { %551 = vmatpush1.bf16.msra.mxu0 %v1792_v15  ;;  %1775 = vmatpush1.bf16.msra.mxu1 %v1792_v15  ;;  %v1867_v15 = vld [vmem:[%s2477_s0 + $0xf0] ss:$8 sps:$4 sm:$0xff]  }
  0x33   :  { %552 = vmatprep.subr.bf16.mxu0 %v1892_v0  ;;  %1760 = vmatprep.subr.bf16.mxu1 %v1892_v0 }
  0x36   :  { %553 = vmatpush1.bf16.msra.mxu0 %v1793_v16  ;;  %1776 = vmatpush1.bf16.msra.mxu1 %v1793_v16  ;;  %v1891_v16 = vld [vmem:[%s2477_s0 + $0x1f0] ss:$8 sps:$4 sm:$0xff]  }
  0x37   :  { %554 = vmatprep.subr.bf16.mxu0 %v1892_v0  ;;  %1761 = vmatprep.subr.bf16.mxu1 %v1892_v0 }
  0x3a   :  { %555 = vmatpush1.bf16.msra.mxu0 %v1794_v17  ;;  %1777 = vmatpush1.bf16.msra.mxu1 %v1794_v17 }
  0x3b   :  { %556 = vmatprep.subr.bf16.mxu0 %v1892_v0  ;;  %1762 = vmatprep.subr.bf16.mxu1 %v1892_v0  ;;  %v1879_v0 = vld [vmem:[%s2477_s0 + $0x1b0] ss:$8 sps:$4 sm:$0xff]  }
  0x3e   :  { %557 = vmatpush1.bf16.msra.mxu0 %v1795_v18  ;;  %1778 = vmatpush1.bf16.msra.mxu1 %v1795_v18 }
  0x41   :  { %559 = vmatmul.mubr.bf16.vlgmr.msra.gmra.mrb[0].mxu0 %v1796_v19  ;;  %687 = vmatmul.mubr.bf16.vlgmr.msra.gmra.mrb[0].mxu1 %v1820_v20 }
  0x42   :  { %566 = vmatprep.mubr.bf16.mxu0 %v1799_v21  ;;  %694 = vmatprep.mubr.bf16.mxu1 %v1826_v22 }
  0x49   :  { %567 = vmatmul.mubr.bf16.gmra.mrb[4].mxu0 %v1801_v23  ;;  %695 = vmatmul.mubr.bf16.gmra.mrb[4].mxu1 %v1828_v24 }
  0x4a   :  { %574 = vmatprep.mubr.bf16.mxu0 %v1802_v25  ;;  %702 = vmatprep.mubr.bf16.mxu1 %v1832_v26 }
  0x51   :  { %575 = vmatmul.mubr.bf16.gmra.mrb[8].mxu0 %v1804_v27  ;;  %703 = vmatmul.mubr.bf16.gmra.mrb[8].mxu1 %v1834_v28 }
  0x52   :  { %582 = vmatprep.mubr.bf16.mxu0 %v1805_v29  ;;  %710 = vmatprep.mubr.bf16.mxu1 %v1838_v30 }
  0x59   :  { %583 = vmatmul.mubr.bf16.gmra.mrb[12].mxu0 %v1807_v31  ;;  %711 = vmatmul.mubr.bf16.gmra.mrb[12].mxu1 %v1840_v32 }
  0x5a   :  { %590 = vmatprep.mubr.bf16.mxu0 %v1808_v33  ;;  %718 = vmatprep.mubr.bf16.mxu1 %v1844_v34 }
  0x61   :  { %591 = vmatmul.mubr.bf16.gmra.mrb[16].mxu0 %v1810_v35  ;;  %719 = vmatmul.mubr.bf16.gmra.mrb[16].mxu1 %v1846_v36 }
  0x62   :  { %598 = vmatprep.mubr.bf16.mxu0 %v1811_v37  ;;  %726 = vmatprep.mubr.bf16.mxu1 %v1850_v38 }
  0x69   :  { %599 = vmatmul.mubr.bf16.gmra.mrb[20].mxu0 %v1813_v39  ;;  %727 = vmatmul.mubr.bf16.gmra.mrb[20].mxu1 %v1852_v40 }
  0x6a   :  { %606 = vmatprep.mubr.bf16.mxu0 %v1814_v41  ;;  %734 = vmatprep.mubr.bf16.mxu1 %v1856_v42 }
  0x71   :  { %607 = vmatmul.mubr.bf16.gmra.mrb[24].mxu0 %v1816_v43  ;;  %735 = vmatmul.mubr.bf16.gmra.mrb[24].mxu1 %v1858_v44 }
  0x72   :  { %614 = vmatprep.mubr.bf16.mxu0 %v1817_v45  ;;  %742 = vmatprep.mubr.bf16.mxu1 %v1862_v46 }
  0x79   :  { %615 = vmatmul.mubr.bf16.gmra.mrb[28].mxu0 %v1819_v47  ;;  %743 = vmatmul.mubr.bf16.gmra.mrb[28].mxu1 %v1864_v48 }
  0x7a   :  { %622 = vmatprep.mubr.bf16.mxu0 %v1823_v49  ;;  %750 = vmatprep.mubr.bf16.mxu1 %v1868_v50 }
  0x81   :  { %623 = vmatmul.mubr.bf16.gmra.mrb[32].mxu0 %v1825_v51  ;;  %751 = vmatmul.mubr.bf16.gmra.mrb[32].mxu1 %v1870_v52 }
  0x82   :  { %630 = vmatprep.mubr.bf16.mxu0 %v1829_v53  ;;  %758 = vmatprep.mubr.bf16.mxu1 %v1871_v54 }
  0x89   :  { %631 = vmatmul.mubr.bf16.gmra.mrb[36].mxu0 %v1831_v55  ;;  %759 = vmatmul.mubr.bf16.gmra.mrb[36].mxu1 %v1873_v56 }
  0x8a   :  { %638 = vmatprep.mubr.bf16.mxu0 %v1835_v57  ;;  %766 = vmatprep.mubr.bf16.mxu1 %v1874_v58 }
  0x91   :  { %639 = vmatmul.mubr.bf16.gmra.mrb[40].mxu0 %v1837_v59  ;;  %767 = vmatmul.mubr.bf16.gmra.mrb[40].mxu1 %v1876_v60 }
  0x92   :  { %646 = vmatprep.mubr.bf16.mxu0 %v1841_v61  ;;  %774 = vmatprep.mubr.bf16.mxu1 %v1877_v62 }
  0x99   :  { %647 = vmatmul.mubr.bf16.gmra.mrb[44].mxu0 %v1843_v63  ;;  %775 = vmatmul.mubr.bf16.gmra.mrb[44].mxu1 %v1879_v0 }
  0x9a   :  { %654 = vmatprep.mubr.bf16.mxu0 %v1847_v1  ;;  %782 = vmatprep.mubr.bf16.mxu1 %v1880_v2 }
  0xa1   :  { %655 = vmatmul.mubr.bf16.gmra.mrb[48].mxu0 %v1849_v3  ;;  %783 = vmatmul.mubr.bf16.gmra.mrb[48].mxu1 %v1882_v4 }
  0xa2   :  { %662 = vmatprep.mubr.bf16.mxu0 %v1853_v5  ;;  %790 = vmatprep.mubr.bf16.mxu1 %v1883_v6 }
  0xa9   :  { %663 = vmatmul.mubr.bf16.gmra.mrb[52].mxu0 %v1855_v7  ;;  %791 = vmatmul.mubr.bf16.gmra.mrb[52].mxu1 %v1885_v8 }
  0xaa   :  { %670 = vmatprep.mubr.bf16.mxu0 %v1859_v9  ;;  %798 = vmatprep.mubr.bf16.mxu1 %v1886_v10 }
  0xb1   :  { %671 = vmatmul.mubr.bf16.gmra.mrb[56].mxu0 %v1861_v11  ;;  %799 = vmatmul.mubr.bf16.gmra.mrb[56].mxu1 %v1888_v12 }
  0xb2   :  { %678 = vmatprep.mubr.bf16.mxu0 %v1865_v13  ;;  %806 = vmatprep.mubr.bf16.mxu1 %v1889_v14 }
  0xb9   :  { %679 = vmatmul.mubr.bf16.gmra.mrb[60].mxu0 %v1867_v15  ;;  %807 = vmatmul.mubr.bf16.gmra.mrb[60].mxu1 %v1891_v16 }
 0x114   :  { %v560_v17 = vpop.f32.mrb[0].mxu0  ;;  %v2185_v18 = vpop.f32.mrb[0].mxu1 }
 0x115   :  { %v562_v19 = vpop.f32.mrb[1].mxu0  ;;  %v690_v20 = vpop.f32.mrb[1].mxu1  ;;  %v1204_v21 = vmul.f32 %v560_v17, %v560_v17 }
 0x116   :  { %v563_v22 = vpop.f32.mrb[2].mxu0  ;;  %v2187_v23 = vpop.f32.mrb[2].mxu1 }
 0x117   :  { %v1559_v24 = vpack.c.bf16 %v563_v22, %v560_v17  ;;  %v1135_v25 = vadd.f32 %v563_v22, %v560_v17  ;;  %v1205_v26 = vmul.f32 %v563_v22, %v563_v22  ;;  %v565_v27 = vpop.f32.mrb[3].mxu0  ;;  %v1639_v28 = vpack.c.bf16 %v2187_v23, %v2185_v18  ;;  %v693_v29 = vpop.f32.mrb[3].mxu1 }
 0x119   :  { %1560 = vst [vmem:[%s2478_s2] sm:$0xff] %v1559_v24   ;;  %v1268_v30 = vadd.f32 %v1205_v26, %v1204_v21  ;;  %1731 = vst [vmem:[%s2478_s2 + $0x80] sm:$0xff] %v1639_v28  }
 0x11c   :  { %v568_v31 = vpop.f32.mrb[4].mxu0  ;;  %v2197_v32 = vpop.f32.mrb[4].mxu1 }
 0x11d   :  { %v1136_v33 = vadd.f32 %v1135_v25, %v568_v31  ;;  %v1206_v34 = vmul.f32 %v568_v31, %v568_v31  ;;  %v570_v35 = vpop.f32.mrb[5].mxu0  ;;  %v698_v36 = vpop.f32.mrb[5].mxu1 }
 0x11e   :  { %v571_v37 = vpop.f32.mrb[6].mxu0  ;;  %v2199_v38 = vpop.f32.mrb[6].mxu1 }
 0x11f   :  { %v1269_v39 = vadd.f32 %v1268_v30, %v1206_v34  ;;  %v1564_v40 = vpack.c.bf16 %v571_v37, %v568_v31  ;;  %v1137_v41 = vadd.f32 %v1136_v33, %v571_v37  ;;  %v1207_v42 = vmul.f32 %v571_v37, %v571_v37  ;;  %v573_v43 = vpop.f32.mrb[7].mxu0  ;;  %v701_v44 = vpop.f32.mrb[7].mxu1 }
 0x120   :  { %v1644_v45 = vpack.c.bf16 %v2199_v38, %v2197_v32 }
 0x121   :  { %1716 = vst [vmem:[%s2478_s2 + $0x8] sm:$0xff] %v1564_v40   ;;  %v1270_v46 = vadd.f32 %v1269_v39, %v1207_v42 }
 0x122   :  { %1732 = vst [vmem:[%s2478_s2 + $0x88] sm:$0xff] %v1644_v45  }
 0x124   :  { %v576_v47 = vpop.f32.mrb[8].mxu0  ;;  %v2209_v48 = vpop.f32.mrb[8].mxu1 }
 0x125   :  { %v1138_v49 = vadd.f32 %v1137_v41, %v576_v47  ;;  %v1208_v50 = vmul.f32 %v576_v47, %v576_v47  ;;  %v578_v51 = vpop.f32.mrb[9].mxu0  ;;  %v706_v52 = vpop.f32.mrb[9].mxu1 }
 0x126   :  { %v579_v53 = vpop.f32.mrb[10].mxu0  ;;  %v2211_v54 = vpop.f32.mrb[10].mxu1 }
 0x127   :  { %v1271_v55 = vadd.f32 %v1270_v46, %v1208_v50  ;;  %v1569_v56 = vpack.c.bf16 %v579_v53, %v576_v47  ;;  %v1139_v57 = vadd.f32 %v1138_v49, %v579_v53  ;;  %v1209_v58 = vmul.f32 %v579_v53, %v579_v53  ;;  %v581_v59 = vpop.f32.mrb[11].mxu0  ;;  %v709_v60 = vpop.f32.mrb[11].mxu1 }
 0x128   :  { %v1649_v61 = vpack.c.bf16 %v2211_v54, %v2209_v48 }
 0x129   :  { %1717 = vst [vmem:[%s2478_s2 + $0x10] sm:$0xff] %v1569_v56   ;;  %v1272_v62 = vadd.f32 %v1271_v55, %v1209_v58 }
 0x12a   :  { %1733 = vst [vmem:[%s2478_s2 + $0x90] sm:$0xff] %v1649_v61  }
 0x12c   :  { %v584_v63 = vpop.f32.mrb[12].mxu0  ;;  %v2221_v0 = vpop.f32.mrb[12].mxu1 }
 0x12d   :  { %v1140_v1 = vadd.f32 %v1139_v57, %v584_v63  ;;  %v1210_v2 = vmul.f32 %v584_v63, %v584_v63  ;;  %v586_v3 = vpop.f32.mrb[13].mxu0  ;;  %v714_v4 = vpop.f32.mrb[13].mxu1 }
 0x12e   :  { %v587_v5 = vpop.f32.mrb[14].mxu0  ;;  %v2223_v6 = vpop.f32.mrb[14].mxu1 }
 0x12f   :  { %v1273_v7 = vadd.f32 %v1272_v62, %v1210_v2  ;;  %v1574_v8 = vpack.c.bf16 %v587_v5, %v584_v63  ;;  %v1141_v9 = vadd.f32 %v1140_v1, %v587_v5  ;;  %v1211_v10 = vmul.f32 %v587_v5, %v587_v5  ;;  %v589_v11 = vpop.f32.mrb[15].mxu0  ;;  %v717_v12 = vpop.f32.mrb[15].mxu1 }
 0x130   :  { %v1654_v13 = vpack.c.bf16 %v2223_v6, %v2221_v0 }
 0x131   :  { %1718 = vst [vmem:[%s2478_s2 + $0x18] sm:$0xff] %v1574_v8   ;;  %v1274_v14 = vadd.f32 %v1273_v7, %v1211_v10 }
 0x132   :  { %1734 = vst [vmem:[%s2478_s2 + $0x98] sm:$0xff] %v1654_v13  }
 0x134   :  { %v592_v15 = vpop.f32.mrb[16].mxu0  ;;  %v2233_v16 = vpop.f32.mrb[16].mxu1 }
 0x135   :  { %v1142_v17 = vadd.f32 %v1141_v9, %v592_v15  ;;  %v1212_v19 = vmul.f32 %v592_v15, %v592_v15  ;;  %v594_v20 = vpop.f32.mrb[17].mxu0  ;;  %v722_v21 = vpop.f32.mrb[17].mxu1 }
 0x136   :  { %v595_v22 = vpop.f32.mrb[18].mxu0  ;;  %v2235_v24 = vpop.f32.mrb[18].mxu1 }
 0x137   :  { %v1275_v25 = vadd.f32 %v1274_v14, %v1212_v19  ;;  %v1579_v26 = vpack.c.bf16 %v595_v22, %v592_v15  ;;  %v1143_v27 = vadd.f32 %v1142_v17, %v595_v22  ;;  %v1213_v28 = vmul.f32 %v595_v22, %v595_v22  ;;  %v597_v29 = vpop.f32.mrb[19].mxu0  ;;  %v725_v30 = vpop.f32.mrb[19].mxu1 }
 0x138   :  { %v1659_v31 = vpack.c.bf16 %v2235_v24, %v2233_v16 }
 0x139   :  { %1719 = vst [vmem:[%s2478_s2 + $0x20] sm:$0xff] %v1579_v26   ;;  %v1276_v33 = vadd.f32 %v1275_v25, %v1213_v28 }
 0x13a   :  { %1735 = vst [vmem:[%s2478_s2 + $0xa0] sm:$0xff] %v1659_v31  }
 0x13c   :  { %v600_v34 = vpop.f32.mrb[20].mxu0  ;;  %v2245_v35 = vpop.f32.mrb[20].mxu1 }
 0x13d   :  { %v1144_v36 = vadd.f32 %v1143_v27, %v600_v34  ;;  %v1214_v37 = vmul.f32 %v600_v34, %v600_v34  ;;  %v602_v39 = vpop.f32.mrb[21].mxu0  ;;  %v730_v40 = vpop.f32.mrb[21].mxu1 }
 0x13e   :  { %v603_v41 = vpop.f32.mrb[22].mxu0  ;;  %v2247_v42 = vpop.f32.mrb[22].mxu1 }
 0x13f   :  { %v1277_v43 = vadd.f32 %v1276_v33, %v1214_v37  ;;  %v1584_v44 = vpack.c.bf16 %v603_v41, %v600_v34  ;;  %v1145_v45 = vadd.f32 %v1144_v36, %v603_v41  ;;  %v1215_v46 = vmul.f32 %v603_v41, %v603_v41  ;;  %v605_v47 = vpop.f32.mrb[23].mxu0  ;;  %v733_v49 = vpop.f32.mrb[23].mxu1 }
 0x140   :  { %v1664_v50 = vpack.c.bf16 %v2247_v42, %v2245_v35 }
 0x141   :  { %1720 = vst [vmem:[%s2478_s2 + $0x28] sm:$0xff] %v1584_v44   ;;  %v1278_v51 = vadd.f32 %v1277_v43, %v1215_v46 }
 0x142   :  { %1736 = vst [vmem:[%s2478_s2 + $0xa8] sm:$0xff] %v1664_v50  }
 0x144   :  { %v608_v52 = vpop.f32.mrb[24].mxu0  ;;  %v2257_v53 = vpop.f32.mrb[24].mxu1 }
 0x145   :  { %v1146_v55 = vadd.f32 %v1145_v45, %v608_v52  ;;  %v1216_v56 = vmul.f32 %v608_v52, %v608_v52  ;;  %v610_v57 = vpop.f32.mrb[25].mxu0  ;;  %v738_v58 = vpop.f32.mrb[25].mxu1 }
 0x146   :  { %v611_v59 = vpop.f32.mrb[26].mxu0  ;;  %v2259_v60 = vpop.f32.mrb[26].mxu1 }
 0x147   :  { %v1279_v61 = vadd.f32 %v1278_v51, %v1216_v56  ;;  %v1589_v62 = vpack.c.bf16 %v611_v59, %v608_v52  ;;  %v1147_v63 = vadd.f32 %v1146_v55, %v611_v59  ;;  %v1217_v1 = vmul.f32 %v611_v59, %v611_v59  ;;  %v613_v2 = vpop.f32.mrb[27].mxu0  ;;  %v741_v3 = vpop.f32.mrb[27].mxu1 }
 0x148   :  { %v1669_v4 = vpack.c.bf16 %v2259_v60, %v2257_v53 }
 0x149   :  { %1721 = vst [vmem:[%s2478_s2 + $0x30] sm:$0xff] %v1589_v62   ;;  %v1280_v5 = vadd.f32 %v1279_v61, %v1217_v1 }
 0x14a   :  { %1737 = vst [vmem:[%s2478_s2 + $0xb0] sm:$0xff] %v1669_v4  }
 0x14c   :  { %v616_v7 = vpop.f32.mrb[28].mxu0  ;;  %v2269_v8 = vpop.f32.mrb[28].mxu1 }
 0x14d   :  { %v1148_v9 = vadd.f32 %v1147_v63, %v616_v7  ;;  %v1218_v10 = vmul.f32 %v616_v7, %v616_v7  ;;  %v618_v11 = vpop.f32.mrb[29].mxu0  ;;  %v746_v12 = vpop.f32.mrb[29].mxu1 }
 0x14e   :  { %v619_v13 = vpop.f32.mrb[30].mxu0  ;;  %v2271_v14 = vpop.f32.mrb[30].mxu1 }
 0x14f   :  { %v1281_v15 = vadd.f32 %v1280_v5, %v1218_v10  ;;  %v1594_v17 = vpack.c.bf16 %v619_v13, %v616_v7  ;;  %v1149_v19 = vadd.f32 %v1148_v9, %v619_v13  ;;  %v1219_v20 = vmul.f32 %v619_v13, %v619_v13  ;;  %v621_v21 = vpop.f32.mrb[31].mxu0  ;;  %v749_v22 = vpop.f32.mrb[31].mxu1 }
 0x150   :  { %v1674_v25 = vpack.c.bf16 %v2271_v14, %v2269_v8 }
 0x151   :  { %1722 = vst [vmem:[%s2478_s2 + $0x38] sm:$0xff] %v1594_v17   ;;  %v1282_v26 = vadd.f32 %v1281_v15, %v1219_v20 }
 0x152   :  { %1738 = vst [vmem:[%s2478_s2 + $0xb8] sm:$0xff] %v1674_v25  }
 0x154   :  { %v624_v27 = vpop.f32.mrb[32].mxu0  ;;  %v2281_v28 = vpop.f32.mrb[32].mxu1 }
 0x155   :  { %v1150_v29 = vadd.f32 %v1149_v19, %v624_v27  ;;  %v1220_v30 = vmul.f32 %v624_v27, %v624_v27  ;;  %v626_v31 = vpop.f32.mrb[33].mxu0  ;;  %v754_v33 = vpop.f32.mrb[33].mxu1 }
 0x156   :  { %v627_v34 = vpop.f32.mrb[34].mxu0  ;;  %v2283_v36 = vpop.f32.mrb[34].mxu1 }
 0x157   :  { %v1283_v37 = vadd.f32 %v1282_v26, %v1220_v30  ;;  %v1599_v39 = vpack.c.bf16 %v627_v34, %v624_v27  ;;  %v1151_v40 = vadd.f32 %v1150_v29, %v627_v34  ;;  %v1221_v41 = vmul.f32 %v627_v34, %v627_v34  ;;  %v629_v43 = vpop.f32.mrb[35].mxu0  ;;  %v757_v44 = vpop.f32.mrb[35].mxu1 }
 0x158   :  { %v1679_v45 = vpack.c.bf16 %v2283_v36, %v2281_v28 }
 0x159   :  { %1723 = vst [vmem:[%s2478_s2 + $0x40] sm:$0xff] %v1599_v39   ;;  %v1284_v46 = vadd.f32 %v1283_v37, %v1221_v41 }
 0x15a   :  { %1739 = vst [vmem:[%s2478_s2 + $0xc0] sm:$0xff] %v1679_v45  }
 0x15c   :  { %v632_v47 = vpop.f32.mrb[36].mxu0  ;;  %v2293_v49 = vpop.f32.mrb[36].mxu1 }
 0x15d   :  { %v1152_v50 = vadd.f32 %v1151_v40, %v632_v47  ;;  %v1222_v51 = vmul.f32 %v632_v47, %v632_v47  ;;  %v634_v52 = vpop.f32.mrb[37].mxu0  ;;  %v762_v55 = vpop.f32.mrb[37].mxu1 }
 0x15e   :  { %v635_v56 = vpop.f32.mrb[38].mxu0  ;;  %v2295_v57 = vpop.f32.mrb[38].mxu1 }
 0x15f   :  { %v1285_v58 = vadd.f32 %v1284_v46, %v1222_v51  ;;  %v1604_v59 = vpack.c.bf16 %v635_v56, %v632_v47  ;;  %v1153_v61 = vadd.f32 %v1152_v50, %v635_v56  ;;  %v1223_v62 = vmul.f32 %v635_v56, %v635_v56  ;;  %v637_v63 = vpop.f32.mrb[39].mxu0  ;;  %v765_v1 = vpop.f32.mrb[39].mxu1 }
 0x160   :  { %v1684_v2 = vpack.c.bf16 %v2295_v57, %v2293_v49 }
 0x161   :  { %1724 = vst [vmem:[%s2478_s2 + $0x48] sm:$0xff] %v1604_v59   ;;  %v1286_v3 = vadd.f32 %v1285_v58, %v1223_v62 }
 0x162   :  { %1740 = vst [vmem:[%s2478_s2 + $0xc8] sm:$0xff] %v1684_v2  }
 0x164   :  { %v640_v4 = vpop.f32.mrb[40].mxu0  ;;  %v2305_v5 = vpop.f32.mrb[40].mxu1 }
 0x165   :  { %v1154_v7 = vadd.f32 %v1153_v61, %v640_v4  ;;  %v1224_v9 = vmul.f32 %v640_v4, %v640_v4  ;;  %v642_v10 = vpop.f32.mrb[41].mxu0  ;;  %v770_v11 = vpop.f32.mrb[41].mxu1 }
 0x166   :  { %v643_v12 = vpop.f32.mrb[42].mxu0  ;;  %v2307_v13 = vpop.f32.mrb[42].mxu1 }
 0x167   :  { %v1287_v15 = vadd.f32 %v1286_v3, %v1224_v9  ;;  %v1609_v17 = vpack.c.bf16 %v643_v12, %v640_v4  ;;  %v1155_v19 = vadd.f32 %v1154_v7, %v643_v12  ;;  %v1225_v20 = vmul.f32 %v643_v12, %v643_v12  ;;  %v645_v21 = vpop.f32.mrb[43].mxu0  ;;  %v773_v22 = vpop.f32.mrb[43].mxu1 }
 0x168   :  { %v1689_v25 = vpack.c.bf16 %v2307_v13, %v2305_v5 }
 0x169   :  { %1725 = vst [vmem:[%s2478_s2 + $0x50] sm:$0xff] %v1609_v17   ;;  %v1288_v26 = vadd.f32 %v1287_v15, %v1225_v20 }
 0x16a   :  { %1741 = vst [vmem:[%s2478_s2 + $0xd0] sm:$0xff] %v1689_v25  }
 0x16c   :  { %v648_v27 = vpop.f32.mrb[44].mxu0  ;;  %v2317_v29 = vpop.f32.mrb[44].mxu1 }
 0x16d   :  { %v1156_v30 = vadd.f32 %v1155_v19, %v648_v27  ;;  %v1226_v31 = vmul.f32 %v648_v27, %v648_v27  ;;  %v650_v33 = vpop.f32.mrb[45].mxu0  ;;  %v778_v34 = vpop.f32.mrb[45].mxu1 }
 0x16e   :  { %v651_v37 = vpop.f32.mrb[46].mxu0  ;;  %v2319_v39 = vpop.f32.mrb[46].mxu1 }
 0x16f   :  { %v1289_v40 = vadd.f32 %v1288_v26, %v1226_v31  ;;  %v1614_v41 = vpack.c.bf16 %v651_v37, %v648_v27  ;;  %v1157_v43 = vadd.f32 %v1156_v30, %v651_v37  ;;  %v1227_v44 = vmul.f32 %v651_v37, %v651_v37  ;;  %v653_v45 = vpop.f32.mrb[47].mxu0  ;;  %v781_v46 = vpop.f32.mrb[47].mxu1 }
 0x170   :  { %v1694_v47 = vpack.c.bf16 %v2319_v39, %v2317_v29 }
 0x171   :  { %1726 = vst [vmem:[%s2478_s2 + $0x58] sm:$0xff] %v1614_v41   ;;  %v1290_v50 = vadd.f32 %v1289_v40, %v1227_v44 }
 0x172   :  { %1742 = vst [vmem:[%s2478_s2 + $0xd8] sm:$0xff] %v1694_v47  }
 0x174   :  { %v656_v51 = vpop.f32.mrb[48].mxu0  ;;  %v2329_v52 = vpop.f32.mrb[48].mxu1 }
 0x175   :  { %v1158_v55 = vadd.f32 %v1157_v43, %v656_v51  ;;  %v1228_v56 = vmul.f32 %v656_v51, %v656_v51  ;;  %v658_v58 = vpop.f32.mrb[49].mxu0  ;;  %v786_v59 = vpop.f32.mrb[49].mxu1 }
 0x176   :  { %v659_v61 = vpop.f32.mrb[50].mxu0  ;;  %v2331_v62 = vpop.f32.mrb[50].mxu1 }
 0x177   :  { %v1291_v63 = vadd.f32 %v1290_v50, %v1228_v56  ;;  %v1619_v1 = vpack.c.bf16 %v659_v61, %v656_v51  ;;  %v1159_v2 = vadd.f32 %v1158_v55, %v659_v61  ;;  %v1229_v3 = vmul.f32 %v659_v61, %v659_v61  ;;  %v661_v4 = vpop.f32.mrb[51].mxu0  ;;  %v789_v7 = vpop.f32.mrb[51].mxu1 }
 0x178   :  { %v1699_v9 = vpack.c.bf16 %v2331_v62, %v2329_v52 }
 0x179   :  { %1727 = vst [vmem:[%s2478_s2 + $0x60] sm:$0xff] %v1619_v1   ;;  %v1292_v10 = vadd.f32 %v1291_v63, %v1229_v3 }
 0x17a   :  { %1743 = vst [vmem:[%s2478_s2 + $0xe0] sm:$0xff] %v1699_v9  }
 0x17c   :  { %v664_v11 = vpop.f32.mrb[52].mxu0  ;;  %v2341_v12 = vpop.f32.mrb[52].mxu1 }
 0x17d   :  { %v1160_v15 = vadd.f32 %v1159_v2, %v664_v11  ;;  %v1230_v17 = vmul.f32 %v664_v11, %v664_v11  ;;  %v666_v19 = vpop.f32.mrb[53].mxu0  ;;  %v794_v20 = vpop.f32.mrb[53].mxu1 }
 0x17e   :  { %v667_v21 = vpop.f32.mrb[54].mxu0  ;;  %v2343_v22 = vpop.f32.mrb[54].mxu1 }
 0x17f   :  { %v1293_v25 = vadd.f32 %v1292_v10, %v1230_v17  ;;  %v1624_v26 = vpack.c.bf16 %v667_v21, %v664_v11  ;;  %v1161_v27 = vadd.f32 %v1160_v15, %v667_v21  ;;  %v1231_v30 = vmul.f32 %v667_v21, %v667_v21  ;;  %v669_v31 = vpop.f32.mrb[55].mxu0  ;;  %v797_v33 = vpop.f32.mrb[55].mxu1 }
 0x180   :  { %v1704_v34 = vpack.c.bf16 %v2343_v22, %v2341_v12 }
 0x181   :  { %1728 = vst [vmem:[%s2478_s2 + $0x68] sm:$0xff] %v1624_v26   ;;  %v1294_v37 = vadd.f32 %v1293_v25, %v1231_v30  ;;  %v1236_v30 = vmul.f32 %v2185_v18, %v2185_v18 }
 0x182   :  { %1744 = vst [vmem:[%s2478_s2 + $0xe8] sm:$0xff] %v1704_v34   ;;  %v1237_v34 = vmul.f32 %v2187_v23, %v2187_v23 }
 0x184   :  { %v672_v40 = vpop.f32.mrb[56].mxu0  ;;  %v2353_v41 = vpop.f32.mrb[56].mxu1 }
 0x185   :  { %v1162_v43 = vadd.f32 %v1161_v27, %v672_v40  ;;  %v1232_v44 = vmul.f32 %v672_v40, %v672_v40  ;;  %v674_v45 = vpop.f32.mrb[57].mxu0  ;;  %v802_v46 = vpop.f32.mrb[57].mxu1 }
 0x186   :  { %v675_v47 = vpop.f32.mrb[58].mxu0  ;;  %v2355_v50 = vpop.f32.mrb[58].mxu1 }
 0x187   :  { %v1295_v51 = vadd.f32 %v1294_v37, %v1232_v44  ;;  %v1629_v55 = vpack.c.bf16 %v675_v47, %v672_v40  ;;  %v1163_v56 = vadd.f32 %v1162_v43, %v675_v47  ;;  %v1233_v58 = vmul.f32 %v675_v47, %v675_v47  ;;  %v677_v59 = vpop.f32.mrb[59].mxu0  ;;  %v805_v61 = vpop.f32.mrb[59].mxu1 }
 0x188   :  { %v1709_v63 = vpack.c.bf16 %v2355_v50, %v2353_v41  ;;  %v1238_v43 = vmul.f32 %v2197_v32, %v2197_v32 }
 0x189   :  { %1729 = vst [vmem:[%s2478_s2 + $0x70] sm:$0xff] %v1629_v55   ;;  %v1296_v1 = vadd.f32 %v1295_v51, %v1233_v58  ;;  %v1240_v51 = vmul.f32 %v2209_v48, %v2209_v48 }
 0x18a   :  { %1745 = vst [vmem:[%s2478_s2 + $0xf0] sm:$0xff] %v1709_v63  }
 0x18c   :  { %v680_v2 = vpop.f32.mrb[60].mxu0  ;;  %v2365_v3 = vpop.f32.mrb[60].mxu1 }
 0x18d   :  { %v1164_v4 = vadd.f32 %v1163_v56, %v680_v2  ;;  %v1234_v7 = vmul.f32 %v680_v2, %v680_v2  ;;  %v682_v9 = vpop.f32.mrb[61].mxu0  ;;  %v810_v10 = vpop.f32.mrb[61].mxu1 }
 0x18e   :  { %v683_v11 = vpop.f32.mrb[62].mxu0  ;;  %v2367_v15 = vpop.f32.mrb[62].mxu1 }
 0x18f   :  { %v1297_v17 = vadd.f32 %v1296_v1, %v1234_v7  ;;  %v1634_v19 = vpack.c.bf16 %v683_v11, %v680_v2  ;;  %v1165_v20 = vadd.f32 %v1164_v4, %v683_v11  ;;  %v1235_v21 = vmul.f32 %v683_v11, %v683_v11  ;;  %v685_v25 = vpop.f32.mrb[63].mxu0  ;;  %v813_v26 = vpop.f32.mrb[63].mxu1 }
 0x190   :  { %v1714_v27 = vpack.c.bf16 %v2367_v15, %v2365_v3 }
 0x191   :  { %1730 = vst [vmem:[%s2478_s2 + $0x78] sm:$0xff] %v1634_v19   ;;  %v1166_v31 = vadd.f32 %v1165_v20, %v2185_v18  ;;  %v1298_v33 = vadd.f32 %v1297_v17, %v1235_v21  ;;  %v1239_v18 = vmul.f32 %v2199_v38, %v2199_v38 }
 0x192   :  { %1746 = vst [vmem:[%s2478_s2 + $0xf8] sm:$0xff] %v1714_v27  }
 0x193   :  { %v1167_v37 = vadd.f32 %v1166_v31, %v2187_v23  ;;  %v1299_v40 = vadd.f32 %v1298_v33, %v1236_v30  ;;  %v1241_v23 = vmul.f32 %v2211_v54, %v2211_v54 }
 0x195   :  { %v1168_v44 = vadd.f32 %v1167_v37, %v2197_v32  ;;  %v1300_v45 = vadd.f32 %v1299_v40, %v1237_v34  ;;  %v1242_v32 = vmul.f32 %v2221_v0, %v2221_v0  ;;  %v1252_v37 = vmul.f32 %v2281_v28, %v2281_v28 }
 0x197   :  { %v1169_v46 = vadd.f32 %v1168_v44, %v2199_v38  ;;  %v1301_v47 = vadd.f32 %v1300_v45, %v1238_v43  ;;  %v1243_v38 = vmul.f32 %v2223_v6, %v2223_v6  ;;  %v1253_v44 = vmul.f32 %v2283_v36, %v2283_v36 }
 0x199   :  { %v1170_v55 = vadd.f32 %v1169_v46, %v2209_v48  ;;  %v1302_v56 = vadd.f32 %v1301_v47, %v1239_v18  ;;  %v1244_v48 = vmul.f32 %v2233_v16, %v2233_v16  ;;  %v1254_v18 = vmul.f32 %v2293_v49, %v2293_v49 }
 0x19a   :  { %v1255_v47 = vmul.f32 %v2295_v57, %v2295_v57 }
 0x19b   :  { %v1171_v58 = vadd.f32 %v1170_v55, %v2211_v54  ;;  %v1303_v59 = vadd.f32 %v1302_v56, %v1240_v51  ;;  %v1245_v54 = vmul.f32 %v2235_v24, %v2235_v24  ;;  %v1256_v55 = vmul.f32 %v2305_v5, %v2305_v5 }
 0x19d   :  { %v1172_v61 = vadd.f32 %v1171_v58, %v2221_v0  ;;  %v1304_v63 = vadd.f32 %v1303_v59, %v1241_v23  ;;  %v1246_v0 = vmul.f32 %v2245_v35, %v2245_v35  ;;  %v1257_v23 = vmul.f32 %v2307_v13, %v2307_v13 }
 0x19e   :  { %v1258_v59 = vmul.f32 %v2317_v29, %v2317_v29 }
 0x19f   :  { %v1173_v1 = vadd.f32 %v1172_v61, %v2223_v6  ;;  %v1305_v2 = vadd.f32 %v1304_v63, %v1242_v32  ;;  %v1247_v6 = vmul.f32 %v2247_v42, %v2247_v42  ;;  %v1259_v61 = vmul.f32 %v2319_v39, %v2319_v39 }
 0x1a1   :  { %v1306_v4 = vadd.f32 %v1305_v2, %v1243_v38  ;;  %v1174_v7 = vadd.f32 %v1173_v1, %v2233_v16  ;;  %v1248_v16 = vmul.f32 %v2257_v53, %v2257_v53  ;;  %v1260_v38 = vmul.f32 %v2329_v52, %v2329_v52 }
 0x1a2   :  { %v1261_v2 = vmul.f32 %v2331_v62, %v2331_v62 }
 0x1a3   :  { %v1175_v9 = vadd.f32 %v1174_v7, %v2235_v24  ;;  %v1307_v10 = vadd.f32 %v1306_v4, %v1244_v48  ;;  %v1249_v24 = vmul.f32 %v2259_v60, %v2259_v60  ;;  %v1262_v4 = vmul.f32 %v2341_v12, %v2341_v12 }
 0x1a5   :  { %v1176_v11 = vadd.f32 %v1175_v9, %v2245_v35  ;;  %v1308_v17 = vadd.f32 %v1307_v10, %v1245_v54  ;;  %v1250_v35 = vmul.f32 %v2269_v8, %v2269_v8  ;;  %v1263_v54 = vmul.f32 %v2343_v22, %v2343_v22 }
 0x1a6   :  { %v1264_v10 = vmul.f32 %v2353_v41, %v2353_v41 }
 0x1a7   :  { %v1177_v19 = vadd.f32 %v1176_v11, %v2247_v42  ;;  %v1309_v20 = vadd.f32 %v1308_v17, %v1246_v0  ;;  %v1251_v42 = vmul.f32 %v2271_v14, %v2271_v14  ;;  %v1265_v11 = vmul.f32 %v2355_v50, %v2355_v50 }
 0x1a9   :  { %v1178_v21 = vadd.f32 %v1177_v19, %v2257_v53  ;;  %v1310_v25 = vadd.f32 %v1309_v20, %v1247_v6  ;;  %v1267_v20 = vmul.f32 %v2367_v15, %v2367_v15 }
 0x1ab   :  { %v1179_v26 = vadd.f32 %v1178_v21, %v2259_v60  ;;  %v1311_v27 = vadd.f32 %v1310_v25, %v1248_v16 }
 0x1ad   :  { %v1180_v30 = vadd.f32 %v1179_v26, %v2269_v8  ;;  %v1312_v31 = vadd.f32 %v1311_v27, %v1249_v24 }
 0x1af   :  { %v1181_v33 = vadd.f32 %v1180_v30, %v2271_v14  ;;  %v1313_v34 = vadd.f32 %v1312_v31, %v1250_v35 }
 0x1b1   :  { %v1182_v53 = vadd.f32 %v1181_v33, %v2281_v28  ;;  %v1314_v40 = vadd.f32 %v1313_v34, %v1251_v42 }
 0x1b3   :  { %v1315_v60 = vadd.f32 %v1314_v40, %v1252_v37  ;;  %v1183_v43 = vadd.f32 %v1182_v53, %v2283_v36 }
 0x1b5   :  { %v1316_v8 = vadd.f32 %v1315_v60, %v1253_v44  ;;  %v1184_v45 = vadd.f32 %v1183_v43, %v2293_v49 }
 0x1b7   :  { %v1317_v14 = vadd.f32 %v1316_v8, %v1254_v18  ;;  %v1185_v46 = vadd.f32 %v1184_v45, %v2295_v57 }
 0x1b9   :  { %v1318_v28 = vadd.f32 %v1317_v14, %v1255_v47  ;;  %v1186_v51 = vadd.f32 %v1185_v46, %v2305_v5 }
 0x1bb   :  { %v1319_v56 = vadd.f32 %v1318_v28, %v1256_v55  ;;  %v1187_v36 = vadd.f32 %v1186_v51, %v2307_v13 }
 0x1bd   :  { %v1320_v58 = vadd.f32 %v1319_v56, %v1257_v23  ;;  %v1188_v49 = vadd.f32 %v1187_v36, %v2317_v29 }
 0x1bf   :  { %v1321_v32 = vadd.f32 %v1320_v58, %v1258_v59  ;;  %v1189_v57 = vadd.f32 %v1188_v49, %v2319_v39 }
 0x1c1   :  { %v1322_v63 = vadd.f32 %v1321_v32, %v1259_v61  ;;  %v1190_v5 = vadd.f32 %v1189_v57, %v2329_v52 }
 0x1c3   :  { %v1323_v1 = vadd.f32 %v1322_v63, %v1260_v38  ;;  %v1191_v13 = vadd.f32 %v1190_v5, %v2331_v62 }
 0x1c5   :  { %v1324_v48 = vadd.f32 %v1323_v1, %v1261_v2  ;;  %v1192_v29 = vadd.f32 %v1191_v13, %v2341_v12  ;;  %v1266_v12 = vmul.f32 %v2365_v3, %v2365_v3 }
 0x1c7   :  { %v1325_v7 = vadd.f32 %v1324_v48, %v1262_v4  ;;  %v1193_v39 = vadd.f32 %v1192_v29, %v2343_v22 }
 0x1c9   :  { %v1326_v9 = vadd.f32 %v1325_v7, %v1263_v54  ;;  %v1194_v52 = vadd.f32 %v1193_v39, %v2353_v41 }
 0x1cb   :  { %v1327_v0 = vadd.f32 %v1326_v9, %v1264_v10  ;;  %v1195_v62 = vadd.f32 %v1194_v52, %v2355_v50 }
 0x1cd   :  { %v1328_v17 = vadd.f32 %v1327_v0, %v1265_v11  ;;  %v1196_v6 = vadd.f32 %v1195_v62, %v2365_v3 }
 0x1cf   :  { %v1329_v19 = vadd.f32 %v1328_v17, %v1266_v12  ;;  %v1197_v22 = vadd.f32 %v1196_v6, %v2367_v15 }
 0x1d1   :  { %v1198_v16 = vrot.slane %v1197_v22, 4  ;;  %v1330_v41 = vadd.f32 %v1329_v19, %v1267_v20 }
 0x1d3   :  { %v1199_v21 = vadd.f32 %v1198_v16, %v1197_v22  ;;  %v1331_v25 = vrot.slane %v1330_v41, 4 }
 0x1d5   :  { %v1200_v24 = vrot.slane %v1199_v21, 2  ;;  %v1332_v26 = vadd.f32 %v1331_v25, %v1330_v41 }
 0x1d7   :  { %v1201_v27 = vadd.f32 %v1200_v24, %v1199_v21  ;;  %v1333_v50 = vrot.slane %v1332_v26, 2 }
 0x1d9   :  { %v1202_v35 = vrot.slane %v1201_v27, 1  ;;  %v1334_v30 = vadd.f32 %v1333_v50, %v1332_v26 }
 0x1db   :  { %v1335_v31 = vrot.slane %v1334_v30, 1  ;;  %v1203_v42 = vadd.f32 %v1202_v35, %v1201_v27 }
 0x1dd   :  { %v1336_v3 = vadd.f32 %v1335_v31, %v1334_v30 }
 0x1df   :  { %v1338_v33 = vsel %vm1337_vm0, %v1203_v42, %v1336_v3 }
 0x1e0   :  { %1339 = vst [vmem:[%s2479_s3] sm:$0x3] %v1338_v33 }

// kernel: discriminator_forward.9
= control target key start
LH: loop header
LB: loop body
LE: loop exit
PB: predicated region body
PF: predicated region fallthrough
CT: control target
= control target key end

     0   :  { %vm794_vm0 = vcmask 1040384   ;;  %s1395_s1 = inlined_call_operand.vmem [shape: bf16[512,128], index: 1, kind: input, shape index: {}]   ;;  %s1396_s0 = inlined_call_operand.vmem [shape: bf16[128,512], index: 0, kind: input, shape index: {}]   ;;  %s1397_s2 = inlined_call_operand.vmem [shape: bf16[128,128], index: 2, kind: output, shape index: {0}]   ;;  %s1398_s3 = inlined_call_operand.vmem [shape: f32[1,2,128], index: 3, kind: output, shape index: {1}]  }
   0x1   :  { %v1076_v0 = vld [vmem:[%s1395_s1 + $0x40] sm:$0xff]   ;;  %v1080_v4 = vld [vmem:[%s1395_s1 + $0x48] sm:$0xff]   ;;  %v1084_v8 = vld [vmem:[%s1395_s1 + $0x50] sm:$0xff]  }
   0x2   :  { %v1077_v1 = vld [vmem:[%s1395_s1 + $0xc0] sm:$0xff]   ;;  %948 = vmatprep.subr.bf16.mxu0 %v1076_v0  ;;  %v1081_v5 = vld [vmem:[%s1395_s1 + $0xc8] sm:$0xff]   ;;  %v1085_v9 = vld [vmem:[%s1395_s1 + $0xd0] sm:$0xff]  }
   0x3   :  { %v1078_v2 = vld [vmem:[%s1395_s1] sm:$0xff]   ;;  %1012 = vmatprep.subr.bf16.mxu1 %v1077_v1  ;;  %v1082_v6 = vld [vmem:[%s1395_s1 + $0x8] sm:$0xff]   ;;  %v1086_v10 = vld [vmem:[%s1395_s1 + $0x10] sm:$0xff]  }
   0x4   :  { %v1079_v3 = vld [vmem:[%s1395_s1 + $0x80] sm:$0xff]   ;;  %949 = vmatpush3.bf16.msra.mxu0 %v1078_v2  ;;  %v1083_v7 = vld [vmem:[%s1395_s1 + $0x88] sm:$0xff]   ;;  %v1087_v11 = vld [vmem:[%s1395_s1 + $0x90] sm:$0xff]  }
   0x5   :  { %1013 = vmatpush3.bf16.msra.mxu1 %v1079_v3  ;;  %950 = vmatprep.subr.bf16.mxu0 %v1080_v4  ;;  %v1088_v12 = vld [vmem:[%s1395_s1 + $0x58] sm:$0xff]   ;;  %v1092_v16 = vld [vmem:[%s1395_s1 + $0x60] sm:$0xff]   ;;  %v1096_v20 = vld [vmem:[%s1395_s1 + $0x68] sm:$0xff]  }
   0x6   :  { %1014 = vmatprep.subr.bf16.mxu1 %v1081_v5  ;;  %v1089_v13 = vld [vmem:[%s1395_s1 + $0xd8] sm:$0xff]   ;;  %v1093_v17 = vld [vmem:[%s1395_s1 + $0xe0] sm:$0xff]   ;;  %v1097_v21 = vld [vmem:[%s1395_s1 + $0xe8] sm:$0xff]  }
   0x7   :  { %v1090_v14 = vld [vmem:[%s1395_s1 + $0x18] sm:$0xff]   ;;  %v1094_v18 = vld [vmem:[%s1395_s1 + $0x20] sm:$0xff]   ;;  %v1098_v22 = vld [vmem:[%s1395_s1 + $0x28] sm:$0xff]  }
   0x8   :  { %951 = vmatpush3.bf16.msra.mxu0 %v1082_v6  ;;  %v1091_v15 = vld [vmem:[%s1395_s1 + $0x98] sm:$0xff]   ;;  %v1095_v19 = vld [vmem:[%s1395_s1 + $0xa0] sm:$0xff]   ;;  %v1099_v23 = vld [vmem:[%s1395_s1 + $0xa8] sm:$0xff]  }
   0x9   :  { %1015 = vmatpush3.bf16.msra.mxu1 %v1083_v7  ;;  %952 = vmatprep.subr.bf16.mxu0 %v1084_v8  ;;  %v1100_v24 = vld [vmem:[%s1395_s1 + $0x70] sm:$0xff]   ;;  %v1104_v28 = vld [vmem:[%s1395_s1 + $0x78] sm:$0xff]  }
   0xa   :  { %1016 = vmatprep.subr.bf16.mxu1 %v1085_v9  ;;  %v1101_v25 = vld [vmem:[%s1395_s1 + $0xf0] sm:$0xff]   ;;  %v1105_v29 = vld [vmem:[%s1395_s1 + $0xf8] sm:$0xff]  }
   0xb   :  { %v1102_v26 = vld [vmem:[%s1395_s1 + $0x30] sm:$0xff]   ;;  %v1106_v30 = vld [vmem:[%s1395_s1 + $0x38] sm:$0xff]  }
   0xc   :  { %953 = vmatpush3.bf16.msra.mxu0 %v1086_v10  ;;  %v1103_v27 = vld [vmem:[%s1395_s1 + $0xb0] sm:$0xff]   ;;  %v1107_v31 = vld [vmem:[%s1395_s1 + $0xb8] sm:$0xff]  }
   0xd   :  { %1017 = vmatpush3.bf16.msra.mxu1 %v1087_v11  ;;  %954 = vmatprep.subr.bf16.mxu0 %v1088_v12  ;;  %v1108_v32 = vld [vmem:[%s1396_s0] ss:$16 sps:$4 sm:$0xff]   ;;  %v1110_v33 = vld [vmem:[%s1396_s0 + $0x4] ss:$16 sps:$4 sm:$0xff]   ;;  %v1111_v34 = vld [vmem:[%s1396_s0 + $0x8] ss:$16 sps:$4 sm:$0xff]  }
   0xe   :  { %1018 = vmatprep.subr.bf16.mxu1 %v1089_v13  ;;  %v1113_v35 = vld [vmem:[%s1396_s0 + $0xc] ss:$16 sps:$4 sm:$0xff]   ;;  %494 = vmatprep.mubr.bf16.mxu0 %v1110_v33  ;;  %v1114_v36 = vld [vmem:[%s1396_s0 + $0x24] ss:$16 sps:$4 sm:$0xff]   ;;  %v1118_v38 = vld [vmem:[%s1396_s0 + $0x20] ss:$16 sps:$4 sm:$0xff]  }
   0xf   :  { %591 = vmatprep.mubr.bf16.mxu1 %v1113_v35  ;;  %v1116_v37 = vld [vmem:[%s1396_s0 + $0x2c] ss:$16 sps:$4 sm:$0xff]   ;;  %v1119_v39 = vld [vmem:[%s1396_s0 + $0x28] ss:$16 sps:$4 sm:$0xff]   ;;  %v1120_v40 = vld [vmem:[%s1396_s0 + $0x44] ss:$16 sps:$4 sm:$0xff]  }
  0x10   :  { %955 = vmatpush3.bf16.msra.mxu0 %v1090_v14  ;;  %v1122_v41 = vld [vmem:[%s1396_s0 + $0x4c] ss:$16 sps:$4 sm:$0xff]   ;;  %v1124_v42 = vld [vmem:[%s1396_s0 + $0x40] ss:$16 sps:$4 sm:$0xff]   ;;  %v1125_v43 = vld [vmem:[%s1396_s0 + $0x48] ss:$16 sps:$4 sm:$0xff]  }
  0x11   :  { %1019 = vmatpush3.bf16.msra.mxu1 %v1091_v15  ;;  %956 = vmatprep.subr.bf16.mxu0 %v1092_v16  ;;  %v1126_v44 = vld [vmem:[%s1396_s0 + $0x64] ss:$16 sps:$4 sm:$0xff]   ;;  %v1128_v45 = vld [vmem:[%s1396_s0 + $0x6c] ss:$16 sps:$4 sm:$0xff]   ;;  %v1130_v46 = vld [vmem:[%s1396_s0 + $0x60] ss:$16 sps:$4 sm:$0xff]  }
  0x12   :  { %1020 = vmatprep.subr.bf16.mxu1 %v1093_v17  ;;  %v1131_v47 = vld [vmem:[%s1396_s0 + $0x68] ss:$16 sps:$4 sm:$0xff]   ;;  %v1132_v48 = vld [vmem:[%s1396_s0 + $0x84] ss:$16 sps:$4 sm:$0xff]   ;;  %v1134_v49 = vld [vmem:[%s1396_s0 + $0x8c] ss:$16 sps:$4 sm:$0xff]  }
  0x13   :  { %v1136_v50 = vld [vmem:[%s1396_s0 + $0x80] ss:$16 sps:$4 sm:$0xff]   ;;  %v1137_v51 = vld [vmem:[%s1396_s0 + $0x88] ss:$16 sps:$4 sm:$0xff]   ;;  %v1138_v52 = vld [vmem:[%s1396_s0 + $0xa4] ss:$16 sps:$4 sm:$0xff]  }
  0x14   :  { %957 = vmatpush3.bf16.msra.mxu0 %v1094_v18  ;;  %v1140_v53 = vld [vmem:[%s1396_s0 + $0xac] ss:$16 sps:$4 sm:$0xff]   ;;  %v1142_v54 = vld [vmem:[%s1396_s0 + $0xa0] ss:$16 sps:$4 sm:$0xff]   ;;  %v1143_v55 = vld [vmem:[%s1396_s0 + $0xa8] ss:$16 sps:$4 sm:$0xff]  }
  0x15   :  { %1021 = vmatpush3.bf16.msra.mxu1 %v1095_v19  ;;  %958 = vmatprep.subr.bf16.mxu0 %v1096_v20  ;;  %v1144_v56 = vld [vmem:[%s1396_s0 + $0xc4] ss:$16 sps:$4 sm:$0xff]   ;;  %v1146_v57 = vld [vmem:[%s1396_s0 + $0xcc] ss:$16 sps:$4 sm:$0xff]   ;;  %v1148_v58 = vld [vmem:[%s1396_s0 + $0xc0] ss:$16 sps:$4 sm:$0xff]  }
  0x16   :  { %1022 = vmatprep.subr.bf16.mxu1 %v1097_v21  ;;  %v1149_v59 = vld [vmem:[%s1396_s0 + $0xc8] ss:$16 sps:$4 sm:$0xff]   ;;  %v1150_v60 = vld [vmem:[%s1396_s0 + $0xe4] ss:$16 sps:$4 sm:$0xff]   ;;  %v1152_v61 = vld [vmem:[%s1396_s0 + $0xec] ss:$16 sps:$4 sm:$0xff]  }
  0x17   :  { %v1154_v62 = vld [vmem:[%s1396_s0 + $0xe0] ss:$16 sps:$4 sm:$0xff]   ;;  %v1155_v63 = vld [vmem:[%s1396_s0 + $0xe8] ss:$16 sps:$4 sm:$0xff]  }
  0x18   :  { %959 = vmatpush3.bf16.msra.mxu0 %v1098_v22 }
  0x19   :  { %1023 = vmatpush3.bf16.msra.mxu1 %v1099_v23  ;;  %960 = vmatprep.subr.bf16.mxu0 %v1100_v24 }
  0x1a   :  { %1024 = vmatprep.subr.bf16.mxu1 %v1101_v25 }
  0x1c   :  { %961 = vmatpush3.bf16.msra.mxu0 %v1102_v26 }
  0x1d   :  { %1025 = vmatpush3.bf16.msra.mxu1 %v1103_v27  ;;  %962 = vmatprep.subr.bf16.mxu0 %v1104_v28 }
  0x1e   :  { %1026 = vmatprep.subr.bf16.mxu1 %v1105_v29 }
  0x20   :  { %963 = vmatpush3.bf16.msra.mxu0 %v1106_v30 }
  0x21   :  { %1027 = vmatpush3.bf16.msra.mxu1 %v1107_v31 }
  0x23   :  { %495 = vmatmul.mubr.bf16.vlgmr.msra.gmra.mrb[0].mxu0 %v1108_v32 }
  0x24   :  { %592 = vmatmul.mubr.bf16.vlgmr.msra.gmra.mrb[0].mxu1 %v1111_v34  ;;  %502 = vmatprep.mubr.bf16.mxu0 %v1114_v36 }
  0x25   :  { %599 = vmatprep.mubr.bf16.mxu1 %v1116_v37 }
  0x2b   :  { %503 = vmatmul.mubr.bf16.gmra.mrb[4].mxu0 %v1118_v38 }
  0x2c   :  { %600 = vmatmul.mubr.bf16.gmra.mrb[4].mxu1 %v1119_v39  ;;  %510 = vmatprep.mubr.bf16.mxu0 %v1120_v40 }
  0x2d   :  { %607 = vmatprep.mubr.bf16.mxu1 %v1122_v41 }
  0x33   :  { %511 = vmatmul.mubr.bf16.gmra.mrb[8].mxu0 %v1124_v42 }
  0x34   :  { %608 = vmatmul.mubr.bf16.gmra.mrb[8].mxu1 %v1125_v43  ;;  %518 = vmatprep.mubr.bf16.mxu0 %v1126_v44 }
  0x35   :  { %615 = vmatprep.mubr.bf16.mxu1 %v1128_v45 }
  0x3b   :  { %519 = vmatmul.mubr.bf16.gmra.mrb[12].mxu0 %v1130_v46 }
  0x3c   :  { %616 = vmatmul.mubr.bf16.gmra.mrb[12].mxu1 %v1131_v47  ;;  %526 = vmatprep.mubr.bf16.mxu0 %v1132_v48 }
  0x3d   :  { %623 = vmatprep.mubr.bf16.mxu1 %v1134_v49 }
  0x43   :  { %527 = vmatmul.mubr.bf16.gmra.mrb[16].mxu0 %v1136_v50 }
  0x44   :  { %624 = vmatmul.mubr.bf16.gmra.mrb[16].mxu1 %v1137_v51  ;;  %534 = vmatprep.mubr.bf16.mxu0 %v1138_v52 }
  0x45   :  { %631 = vmatprep.mubr.bf16.mxu1 %v1140_v53 }
  0x4b   :  { %535 = vmatmul.mubr.bf16.gmra.mrb[20].mxu0 %v1142_v54 }
  0x4c   :  { %632 = vmatmul.mubr.bf16.gmra.mrb[20].mxu1 %v1143_v55  ;;  %542 = vmatprep.mubr.bf16.mxu0 %v1144_v56 }
  0x4d   :  { %639 = vmatprep.mubr.bf16.mxu1 %v1146_v57 }
  0x53   :  { %543 = vmatmul.mubr.bf16.gmra.mrb[24].mxu0 %v1148_v58 }
  0x54   :  { %640 = vmatmul.mubr.bf16.gmra.mrb[24].mxu1 %v1149_v59  ;;  %550 = vmatprep.mubr.bf16.mxu0 %v1150_v60 }
  0x55   :  { %647 = vmatprep.mubr.bf16.mxu1 %v1152_v61 }
  0x5b   :  { %551 = vmatmul.mubr.bf16.gmra.mrb[28].mxu0 %v1154_v62 }
  0x5c   :  { %648 = vmatmul.mubr.bf16.gmra.mrb[28].mxu1 %v1155_v63 }
  0xf6   :  { %v964_v0 = vpop.f32.mrb[0].mxu0 }
  0xf7   :  { %v1028_v1 = vpop.f32.mrb[0].mxu1  ;;  %v965_v2 = vpop.f32.mrb[1].mxu0 }
  0xf8   :  { %v966_v3 = vadd.f32 %v965_v2, %v964_v0  ;;  %v1029_v4 = vpop.f32.mrb[1].mxu1  ;;  %v967_v5 = vpop.f32.mrb[2].mxu0 }
  0xf9   :  { %v1030_v6 = vadd.f32 %v1029_v4, %v1028_v1  ;;  %v1031_v7 = vpop.f32.mrb[2].mxu1  ;;  %v968_v8 = vpop.f32.mrb[3].mxu0 }
  0xfa   :  { %v969_v9 = vadd.f32 %v968_v8, %v967_v5  ;;  %v1032_v10 = vpop.f32.mrb[3].mxu1 }
  0xfb   :  { %v594_v11 = vadd.f32 %v1030_v6, %v966_v3  ;;  %v1033_v12 = vadd.f32 %v1032_v10, %v1031_v7 }
  0xfd   :  { %v597_v13 = vadd.f32 %v1033_v12, %v969_v9  ;;  %v757_v15 = vmul.f32 %v594_v11, %v594_v11 }
  0xfe   :  { %v970_v14 = vpop.f32.mrb[4].mxu0 }
  0xff   :  { %v904_v16 = vpack.c.bf16 %v597_v13, %v594_v11  ;;  %v736_v17 = vadd.f32 %v597_v13, %v594_v11  ;;  %v758_v18 = vmul.f32 %v597_v13, %v597_v13  ;;  %v1034_v19 = vpop.f32.mrb[4].mxu1  ;;  %v971_v20 = vpop.f32.mrb[5].mxu0 }
 0x100   :  { %v972_v21 = vadd.f32 %v971_v20, %v970_v14  ;;  %v1035_v22 = vpop.f32.mrb[5].mxu1  ;;  %v973_v23 = vpop.f32.mrb[6].mxu0 }
 0x101   :  { %905 = vst [vmem:[%s1397_s2] sm:$0xff] %v904_v16   ;;  %v773_v24 = vadd.f32 %v758_v18, %v757_v15  ;;  %v1036_v25 = vadd.f32 %v1035_v22, %v1034_v19  ;;  %v1037_v26 = vpop.f32.mrb[6].mxu1  ;;  %v974_v27 = vpop.f32.mrb[7].mxu0 }
 0x102   :  { %v975_v28 = vadd.f32 %v974_v27, %v973_v23  ;;  %v1038_v29 = vpop.f32.mrb[7].mxu1 }
 0x103   :  { %v602_v30 = vadd.f32 %v1036_v25, %v972_v21  ;;  %v1039_v31 = vadd.f32 %v1038_v29, %v1037_v26 }
 0x105   :  { %v737_v32 = vadd.f32 %v736_v17, %v602_v30  ;;  %v759_v33 = vmul.f32 %v602_v30, %v602_v30  ;;  %v605_v34 = vadd.f32 %v1039_v31, %v975_v28 }
 0x106   :  { %v976_v35 = vpop.f32.mrb[8].mxu0 }
 0x107   :  { %v774_v36 = vadd.f32 %v773_v24, %v759_v33  ;;  %v909_v37 = vpack.c.bf16 %v605_v34, %v602_v30  ;;  %v738_v38 = vadd.f32 %v737_v32, %v605_v34  ;;  %v760_v39 = vmul.f32 %v605_v34, %v605_v34  ;;  %v1040_v40 = vpop.f32.mrb[8].mxu1  ;;  %v977_v41 = vpop.f32.mrb[9].mxu0 }
 0x108   :  { %v978_v42 = vadd.f32 %v977_v41, %v976_v35  ;;  %v1041_v43 = vpop.f32.mrb[9].mxu1  ;;  %v979_v44 = vpop.f32.mrb[10].mxu0 }
 0x109   :  { %941 = vst [vmem:[%s1397_s2 + $0x8] sm:$0xff] %v909_v37   ;;  %v775_v45 = vadd.f32 %v774_v36, %v760_v39  ;;  %v1042_v46 = vadd.f32 %v1041_v43, %v1040_v40  ;;  %v1043_v47 = vpop.f32.mrb[10].mxu1  ;;  %v980_v48 = vpop.f32.mrb[11].mxu0 }
 0x10a   :  { %v981_v49 = vadd.f32 %v980_v48, %v979_v44  ;;  %v1044_v50 = vpop.f32.mrb[11].mxu1 }
 0x10b   :  { %v610_v51 = vadd.f32 %v1042_v46, %v978_v42  ;;  %v1045_v52 = vadd.f32 %v1044_v50, %v1043_v47 }
 0x10d   :  { %v739_v53 = vadd.f32 %v738_v38, %v610_v51  ;;  %v761_v54 = vmul.f32 %v610_v51, %v610_v51  ;;  %v613_v55 = vadd.f32 %v1045_v52, %v981_v49 }
 0x10e   :  { %v982_v56 = vpop.f32.mrb[12].mxu0 }
 0x10f   :  { %v776_v57 = vadd.f32 %v775_v45, %v761_v54  ;;  %v914_v58 = vpack.c.bf16 %v613_v55, %v610_v51  ;;  %v740_v59 = vadd.f32 %v739_v53, %v613_v55  ;;  %v762_v60 = vmul.f32 %v613_v55, %v613_v55  ;;  %v1046_v61 = vpop.f32.mrb[12].mxu1  ;;  %v983_v62 = vpop.f32.mrb[13].mxu0 }
 0x110   :  { %v984_v63 = vadd.f32 %v983_v62, %v982_v56  ;;  %v1047_v0 = vpop.f32.mrb[13].mxu1  ;;  %v985_v1 = vpop.f32.mrb[14].mxu0 }
 0x111   :  { %942 = vst [vmem:[%s1397_s2 + $0x10] sm:$0xff] %v914_v58   ;;  %v777_v2 = vadd.f32 %v776_v57, %v762_v60  ;;  %v1048_v3 = vadd.f32 %v1047_v0, %v1046_v61  ;;  %v1049_v4 = vpop.f32.mrb[14].mxu1  ;;  %v986_v5 = vpop.f32.mrb[15].mxu0 }
 0x112   :  { %v987_v6 = vadd.f32 %v986_v5, %v985_v1  ;;  %v1050_v7 = vpop.f32.mrb[15].mxu1 }
 0x113   :  { %v618_v8 = vadd.f32 %v1048_v3, %v984_v63  ;;  %v1051_v9 = vadd.f32 %v1050_v7, %v1049_v4 }
 0x115   :  { %v741_v10 = vadd.f32 %v740_v59, %v618_v8  ;;  %v763_v11 = vmul.f32 %v618_v8, %v618_v8  ;;  %v621_v12 = vadd.f32 %v1051_v9, %v987_v6 }
 0x116   :  { %v988_v13 = vpop.f32.mrb[16].mxu0 }
 0x117   :  { %v778_v14 = vadd.f32 %v777_v2, %v763_v11  ;;  %v919_v15 = vpack.c.bf16 %v621_v12, %v618_v8  ;;  %v742_v16 = vadd.f32 %v741_v10, %v621_v12  ;;  %v764_v17 = vmul.f32 %v621_v12, %v621_v12  ;;  %v1052_v18 = vpop.f32.mrb[16].mxu1  ;;  %v989_v19 = vpop.f32.mrb[17].mxu0 }
 0x118   :  { %v990_v20 = vadd.f32 %v989_v19, %v988_v13  ;;  %v1053_v21 = vpop.f32.mrb[17].mxu1  ;;  %v991_v22 = vpop.f32.mrb[18].mxu0 }
 0x119   :  { %943 = vst [vmem:[%s1397_s2 + $0x18] sm:$0xff] %v919_v15   ;;  %v779_v23 = vadd.f32 %v778_v14, %v764_v17  ;;  %v1054_v24 = vadd.f32 %v1053_v21, %v1052_v18  ;;  %v1055_v25 = vpop.f32.mrb[18].mxu1  ;;  %v992_v26 = vpop.f32.mrb[19].mxu0 }
 0x11a   :  { %v993_v27 = vadd.f32 %v992_v26, %v991_v22  ;;  %v1056_v28 = vpop.f32.mrb[19].mxu1 }
 0x11b   :  { %v626_v29 = vadd.f32 %v1054_v24, %v990_v20  ;;  %v1057_v30 = vadd.f32 %v1056_v28, %v1055_v25 }
 0x11d   :  { %v743_v31 = vadd.f32 %v742_v16, %v626_v29  ;;  %v765_v32 = vmul.f32 %v626_v29, %v626_v29  ;;  %v629_v33 = vadd.f32 %v1057_v30, %v993_v27 }
 0x11e   :  { %v994_v34 = vpop.f32.mrb[20].mxu0 }
 0x11f   :  { %v780_v35 = vadd.f32 %v779_v23, %v765_v32  ;;  %v924_v36 = vpack.c.bf16 %v629_v33, %v626_v29  ;;  %v744_v37 = vadd.f32 %v743_v31, %v629_v33  ;;  %v766_v38 = vmul.f32 %v629_v33, %v629_v33  ;;  %v1058_v39 = vpop.f32.mrb[20].mxu1  ;;  %v995_v40 = vpop.f32.mrb[21].mxu0 }
 0x120   :  { %v996_v41 = vadd.f32 %v995_v40, %v994_v34  ;;  %v1059_v42 = vpop.f32.mrb[21].mxu1  ;;  %v997_v43 = vpop.f32.mrb[22].mxu0 }
 0x121   :  { %944 = vst [vmem:[%s1397_s2 + $0x20] sm:$0xff] %v924_v36   ;;  %v781_v44 = vadd.f32 %v780_v35, %v766_v38  ;;  %v1060_v45 = vadd.f32 %v1059_v42, %v1058_v39  ;;  %v1061_v46 = vpop.f32.mrb[22].mxu1  ;;  %v998_v47 = vpop.f32.mrb[23].mxu0 }
 0x122   :  { %v999_v48 = vadd.f32 %v998_v47, %v997_v43  ;;  %v1062_v49 = vpop.f32.mrb[23].mxu1 }
 0x123   :  { %v634_v50 = vadd.f32 %v1060_v45, %v996_v41  ;;  %v1063_v51 = vadd.f32 %v1062_v49, %v1061_v46 }
 0x125   :  { %v745_v52 = vadd.f32 %v744_v37, %v634_v50  ;;  %v767_v53 = vmul.f32 %v634_v50, %v634_v50  ;;  %v637_v54 = vadd.f32 %v1063_v51, %v999_v48 }
 0x126   :  { %v1000_v55 = vpop.f32.mrb[24].mxu0 }
 0x127   :  { %v782_v56 = vadd.f32 %v781_v44, %v767_v53  ;;  %v929_v57 = vpack.c.bf16 %v637_v54, %v634_v50  ;;  %v746_v58 = vadd.f32 %v745_v52, %v637_v54  ;;  %v768_v59 = vmul.f32 %v637_v54, %v637_v54  ;;  %v1064_v60 = vpop.f32.mrb[24].mxu1  ;;  %v1001_v61 = vpop.f32.mrb[25].mxu0 }
 0x128   :  { %v1002_v62 = vadd.f32 %v1001_v61, %v1000_v55  ;;  %v1065_v63 = vpop.f32.mrb[25].mxu1  ;;  %v1003_v0 = vpop.f32.mrb[26].mxu0 }
 0x129   :  { %945 = vst [vmem:[%s1397_s2 + $0x28] sm:$0xff] %v929_v57   ;;  %v783_v1 = vadd.f32 %v782_v56, %v768_v59  ;;  %v1066_v2 = vadd.f32 %v1065_v63, %v1064_v60  ;;  %v1067_v3 = vpop.f32.mrb[26].mxu1  ;;  %v1004_v4 = vpop.f32.mrb[27].mxu0 }
 0x12a   :  { %v1005_v5 = vadd.f32 %v1004_v4, %v1003_v0  ;;  %v1068_v6 = vpop.f32.mrb[27].mxu1 }
 0x12b   :  { %v642_v7 = vadd.f32 %v1066_v2, %v1002_v62  ;;  %v1069_v8 = vadd.f32 %v1068_v6, %v1067_v3 }
 0x12d   :  { %v747_v9 = vadd.f32 %v746_v58, %v642_v7  ;;  %v769_v10 = vmul.f32 %v642_v7, %v642_v7  ;;  %v645_v11 = vadd.f32 %v1069_v8, %v1005_v5 }
 0x12e   :  { %v1006_v12 = vpop.f32.mrb[28].mxu0 }
 0x12f   :  { %v784_v13 = vadd.f32 %v783_v1, %v769_v10  ;;  %v934_v14 = vpack.c.bf16 %v645_v11, %v642_v7  ;;  %v748_v15 = vadd.f32 %v747_v9, %v645_v11  ;;  %v770_v16 = vmul.f32 %v645_v11, %v645_v11  ;;  %v1070_v17 = vpop.f32.mrb[28].mxu1  ;;  %v1007_v18 = vpop.f32.mrb[29].mxu0 }
 0x130   :  { %v1008_v19 = vadd.f32 %v1007_v18, %v1006_v12  ;;  %v1071_v20 = vpop.f32.mrb[29].mxu1  ;;  %v1009_v21 = vpop.f32.mrb[30].mxu0 }
 0x131   :  { %946 = vst [vmem:[%s1397_s2 + $0x30] sm:$0xff] %v934_v14   ;;  %v785_v22 = vadd.f32 %v784_v13, %v770_v16  ;;  %v1072_v23 = vadd.f32 %v1071_v20, %v1070_v17  ;;  %v1073_v24 = vpop.f32.mrb[30].mxu1  ;;  %v1010_v25 = vpop.f32.mrb[31].mxu0 }
 0x132   :  { %v1011_v26 = vadd.f32 %v1010_v25, %v1009_v21  ;;  %v1074_v27 = vpop.f32.mrb[31].mxu1 }
 0x133   :  { %v650_v28 = vadd.f32 %v1072_v23, %v1008_v19  ;;  %v1075_v29 = vadd.f32 %v1074_v27, %v1073_v24 }
 0x135   :  { %v749_v30 = vadd.f32 %v748_v15, %v650_v28  ;;  %v771_v31 = vmul.f32 %v650_v28, %v650_v28  ;;  %v653_v32 = vadd.f32 %v1075_v29, %v1011_v26 }
 0x137   :  { %v786_v33 = vadd.f32 %v785_v22, %v771_v31  ;;  %v939_v34 = vpack.c.bf16 %v653_v32, %v650_v28  ;;  %v750_v35 = vadd.f32 %v749_v30, %v653_v32  ;;  %v772_v36 = vmul.f32 %v653_v32, %v653_v32 }
 0x139   :  { %947 = vst [vmem:[%s1397_s2 + $0x38] sm:$0xff] %v939_v34   ;;  %v751_v37 = vrot.slane %v750_v35, 4  ;;  %v787_v38 = vadd.f32 %v786_v33, %v772_v36 }
 0x13b   :  { %v752_v39 = vadd.f32 %v751_v37, %v750_v35  ;;  %v788_v40 = vrot.slane %v787_v38, 4 }
 0x13d   :  { %v753_v41 = vrot.slane %v752_v39, 2  ;;  %v789_v42 = vadd.f32 %v788_v40, %v787_v38 }
 0x13f   :  { %v754_v43 = vadd.f32 %v753_v41, %v752_v39  ;;  %v790_v44 = vrot.slane %v789_v42, 2 }
 0x141   :  { %v755_v45 = vrot.slane %v754_v43, 1  ;;  %v791_v46 = vadd.f32 %v790_v44, %v789_v42 }
 0x143   :  { %v792_v47 = vrot.slane %v791_v46, 1  ;;  %v756_v48 = vadd.f32 %v755_v45, %v754_v43 }
 0x145   :  { %v793_v49 = vadd.f32 %v792_v47, %v791_v46 }
 0x147   :  { %v795_v50 = vsel %vm794_vm0, %v756_v48, %v793_v49 }
 0x148   :  { %796 = vst [vmem:[%s1398_s3] sm:$0x3] %v795_v50 }

// kernel: discriminator_forward.10
= control target key start
LH: loop header
LB: loop body
LE: loop exit
PB: predicated region body
PF: predicated region fallthrough
CT: control target
= control target key end

     0   :  { %vm860_vm0 = vcmask 1040384   ;;  %s1415_s1 = inlined_call_operand.vmem [shape: bf16[1024,128], index: 1, kind: input, shape index: {}]   ;;  %s1416_s0 = inlined_call_operand.vmem [shape: bf16[32,1024], index: 0, kind: input, shape index: {}]   ;;  %s1417_s2 = inlined_call_operand.vmem [shape: bf16[32,128], index: 2, kind: output, shape index: {0}]   ;;  %s1418_s3 = inlined_call_operand.vmem [shape: f32[1,2,128], index: 3, kind: output, shape index: {1}]  }
   0x1   :  { %v1082_v0 = vld [vmem:[%s1415_s1 + $0x40] sm:$0xff]   ;;  %v1086_v4 = vld [vmem:[%s1415_s1 + $0x48] sm:$0xff]   ;;  %v1090_v8 = vld [vmem:[%s1415_s1 + $0x50] sm:$0xff]  }
   0x2   :  { %v1083_v1 = vld [vmem:[%s1415_s1 + $0xc0] sm:$0xff]   ;;  %970 = vmatprep.subr.bf16.mxu0 %v1082_v0  ;;  %v1087_v5 = vld [vmem:[%s1415_s1 + $0xc8] sm:$0xff]   ;;  %v1091_v9 = vld [vmem:[%s1415_s1 + $0xd0] sm:$0xff]  }
   0x3   :  { %v1084_v2 = vld [vmem:[%s1415_s1] sm:$0xff]   ;;  %998 = vmatprep.subr.bf16.mxu1 %v1083_v1  ;;  %v1088_v6 = vld [vmem:[%s1415_s1 + $0x8] sm:$0xff]   ;;  %v1092_v10 = vld [vmem:[%s1415_s1 + $0x10] sm:$0xff]  }
   0x4   :  { %v1085_v3 = vld [vmem:[%s1415_s1 + $0x80] sm:$0xff]   ;;  %971 = vmatpush3.bf16.msra.mxu0 %v1084_v2  ;;  %v1089_v7 = vld [vmem:[%s1415_s1 + $0x88] sm:$0xff]   ;;  %v1093_v11 = vld [vmem:[%s1415_s1 + $0x90] sm:$0xff]  }
   0x5   :  { %999 = vmatpush3.bf16.msra.mxu1 %v1085_v3  ;;  %972 = vmatprep.subr.bf16.mxu0 %v1086_v4  ;;  %v1094_v12 = vld [vmem:[%s1415_s1 + $0x58] sm:$0xff]   ;;  %v1098_v16 = vld [vmem:[%s1415_s1 + $0x60] sm:$0xff]   ;;  %v1102_v20 = vld [vmem:[%s1415_s1 + $0x68] sm:$0xff]  }
   0x6   :  { %1000 = vmatprep.subr.bf16.mxu1 %v1087_v5  ;;  %v1095_v13 = vld [vmem:[%s1415_s1 + $0xd8] sm:$0xff]   ;;  %v1099_v17 = vld [vmem:[%s1415_s1 + $0xe0] sm:$0xff]   ;;  %v1103_v21 = vld [vmem:[%s1415_s1 + $0xe8] sm:$0xff]  }
   0x7   :  { %v1096_v14 = vld [vmem:[%s1415_s1 + $0x18] sm:$0xff]   ;;  %v1100_v18 = vld [vmem:[%s1415_s1 + $0x20] sm:$0xff]   ;;  %v1104_v22 = vld [vmem:[%s1415_s1 + $0x28] sm:$0xff]  }
   0x8   :  { %973 = vmatpush3.bf16.msra.mxu0 %v1088_v6  ;;  %v1097_v15 = vld [vmem:[%s1415_s1 + $0x98] sm:$0xff]   ;;  %v1101_v19 = vld [vmem:[%s1415_s1 + $0xa0] sm:$0xff]   ;;  %v1105_v23 = vld [vmem:[%s1415_s1 + $0xa8] sm:$0xff]  }
   0x9   :  { %1001 = vmatpush3.bf16.msra.mxu1 %v1089_v7  ;;  %974 = vmatprep.subr.bf16.mxu0 %v1090_v8  ;;  %v1106_v24 = vld [vmem:[%s1415_s1 + $0x70] sm:$0xff]   ;;  %v1110_v28 = vld [vmem:[%s1415_s1 + $0x78] sm:$0xff]   ;;  %v14_v32 = vld [vmem:[%s1416_s0] sm:$0xff] }
   0xa   :  { %1002 = vmatprep.subr.bf16.mxu1 %v1091_v9  ;;  %v1107_v25 = vld [vmem:[%s1415_s1 + $0xf0] sm:$0xff]   ;;  %v1111_v29 = vld [vmem:[%s1415_s1 + $0xf8] sm:$0xff]   ;;  %v18_v33 = vld [vmem:[%s1416_s0 + $0x20] sm:$0xff] }
   0xb   :  { %v1108_v26 = vld [vmem:[%s1415_s1 + $0x30] sm:$0xff]   ;;  %v1112_v30 = vld [vmem:[%s1415_s1 + $0x38] sm:$0xff]   ;;  %v15_v34 = vld [vmem:[%s1416_s0 + $0x8] sm:$0xff]  ;;  %v871_v35 = vcombine.low %v14_v32, %v18_v33  ;;  %v872_v36 = vcombine.high %v14_v32, %v18_v33 }
   0xc   :  { %975 = vmatpush3.bf16.msra.mxu0 %v1092_v10  ;;  %v1109_v27 = vld [vmem:[%s1415_s1 + $0xb0] sm:$0xff]   ;;  %v1113_v31 = vld [vmem:[%s1415_s1 + $0xb8] sm:$0xff]   ;;  %v19_v37 = vld [vmem:[%s1416_s0 + $0x28] sm:$0xff] }
   0xd   :  { %1003 = vmatpush3.bf16.msra.mxu1 %v1093_v11  ;;  %976 = vmatprep.subr.bf16.mxu0 %v1094_v12  ;;  %v873_v38 = vcombine.low %v15_v34, %v19_v37  ;;  %v874_v39 = vcombine.high %v15_v34, %v19_v37  ;;  %v1114_v40 = vld [vmem:[%s1415_s1 + $0x140] sm:$0xff]   ;;  %v1118_v44 = vld [vmem:[%s1415_s1 + $0x148] sm:$0xff]   ;;  %v1122_v48 = vld [vmem:[%s1415_s1 + $0x150] sm:$0xff]  }
   0xe   :  { %1004 = vmatprep.subr.bf16.mxu1 %v1095_v13  ;;  %654 = vmatprep.mubr.bf16.mxu0 %v872_v36  ;;  %v1115_v41 = vld [vmem:[%s1415_s1 + $0x1c0] sm:$0xff]   ;;  %v1119_v45 = vld [vmem:[%s1415_s1 + $0x1c8] sm:$0xff]   ;;  %v1123_v49 = vld [vmem:[%s1415_s1 + $0x1d0] sm:$0xff]  }
   0xf   :  { %703 = vmatprep.mubr.bf16.mxu1 %v874_v39  ;;  %v1116_v42 = vld [vmem:[%s1415_s1 + $0x100] sm:$0xff]   ;;  %v1120_v46 = vld [vmem:[%s1415_s1 + $0x108] sm:$0xff]   ;;  %v1124_v50 = vld [vmem:[%s1415_s1 + $0x110] sm:$0xff]  }
  0x10   :  { %977 = vmatpush3.bf16.msra.mxu0 %v1096_v14  ;;  %v1117_v43 = vld [vmem:[%s1415_s1 + $0x180] sm:$0xff]   ;;  %v1121_v47 = vld [vmem:[%s1415_s1 + $0x188] sm:$0xff]   ;;  %v1125_v51 = vld [vmem:[%s1415_s1 + $0x190] sm:$0xff]  }
  0x11   :  { %1005 = vmatpush3.bf16.msra.mxu1 %v1097_v15  ;;  %978 = vmatprep.subr.bf16.mxu0 %v1098_v16  ;;  %v1126_v52 = vld [vmem:[%s1415_s1 + $0x158] sm:$0xff]   ;;  %v1130_v56 = vld [vmem:[%s1415_s1 + $0x160] sm:$0xff]   ;;  %v23_v63 = vld [vmem:[%s1416_s0 + $0x48] sm:$0xff] }
  0x12   :  { %1006 = vmatprep.subr.bf16.mxu1 %v1099_v17  ;;  %v1127_v53 = vld [vmem:[%s1415_s1 + $0x1d8] sm:$0xff]   ;;  %v1131_v57 = vld [vmem:[%s1415_s1 + $0x1e0] sm:$0xff]   ;;  %v27_v0 = vld [vmem:[%s1416_s0 + $0x68] sm:$0xff] }
  0x13   :  { %v1128_v54 = vld [vmem:[%s1415_s1 + $0x118] sm:$0xff]   ;;  %v1132_v58 = vld [vmem:[%s1415_s1 + $0x120] sm:$0xff]   ;;  %v882_v2 = vcombine.high %v23_v63, %v27_v0  ;;  %v1134_v3 = vld [vmem:[%s1415_s1 + $0x168] sm:$0xff]   ;;  %v881_v4 = vcombine.low %v23_v63, %v27_v0 }
  0x14   :  { %979 = vmatpush3.bf16.msra.mxu0 %v1100_v18  ;;  %v1129_v55 = vld [vmem:[%s1415_s1 + $0x198] sm:$0xff]   ;;  %v1133_v59 = vld [vmem:[%s1415_s1 + $0x1a0] sm:$0xff]   ;;  %v1135_v5 = vld [vmem:[%s1415_s1 + $0x1e8] sm:$0xff]  }
  0x15   :  { %1007 = vmatpush3.bf16.msra.mxu1 %v1101_v19  ;;  %980 = vmatprep.subr.bf16.mxu0 %v1102_v20  ;;  %v22_v60 = vld [vmem:[%s1416_s0 + $0x40] sm:$0xff]  ;;  %v1136_v6 = vld [vmem:[%s1415_s1 + $0x128] sm:$0xff]   ;;  %v1138_v8 = vld [vmem:[%s1415_s1 + $0x170] sm:$0xff]  }
  0x16   :  { %1008 = vmatprep.subr.bf16.mxu1 %v1103_v21  ;;  %v26_v61 = vld [vmem:[%s1416_s0 + $0x60] sm:$0xff]  ;;  %v1137_v7 = vld [vmem:[%s1415_s1 + $0x1a8] sm:$0xff]   ;;  %v1139_v9 = vld [vmem:[%s1415_s1 + $0x1f0] sm:$0xff]  }
  0x17   :  { %v880_v62 = vcombine.high %v22_v60, %v26_v61  ;;  %v879_v1 = vcombine.low %v22_v60, %v26_v61  ;;  %v1140_v10 = vld [vmem:[%s1415_s1 + $0x130] sm:$0xff]   ;;  %v1142_v12 = vld [vmem:[%s1415_s1 + $0x178] sm:$0xff]  }
  0x18   :  { %981 = vmatpush3.bf16.msra.mxu0 %v1104_v22  ;;  %v1141_v11 = vld [vmem:[%s1415_s1 + $0x1b0] sm:$0xff]   ;;  %v1143_v13 = vld [vmem:[%s1415_s1 + $0x1f8] sm:$0xff]  }
  0x19   :  { %1009 = vmatpush3.bf16.msra.mxu1 %v1105_v23  ;;  %982 = vmatprep.subr.bf16.mxu0 %v1106_v24  ;;  %v1144_v14 = vld [vmem:[%s1415_s1 + $0x138] sm:$0xff]   ;;  %v16_v16 = vld [vmem:[%s1416_s0 + $0x10] sm:$0xff] }
  0x1a   :  { %1010 = vmatprep.subr.bf16.mxu1 %v1107_v25  ;;  %v1145_v15 = vld [vmem:[%s1415_s1 + $0x1b8] sm:$0xff]   ;;  %v20_v17 = vld [vmem:[%s1416_s0 + $0x30] sm:$0xff] }
  0x1b   :  { %v17_v18 = vld [vmem:[%s1416_s0 + $0x18] sm:$0xff]  ;;  %v875_v20 = vcombine.low %v16_v16, %v20_v17  ;;  %v876_v21 = vcombine.high %v16_v16, %v20_v17  ;;  %v24_v24 = vld [vmem:[%s1416_s0 + $0x50] sm:$0xff] }
  0x1c   :  { %983 = vmatpush3.bf16.msra.mxu0 %v1108_v26  ;;  %v21_v19 = vld [vmem:[%s1416_s0 + $0x38] sm:$0xff]  ;;  %v28_v25 = vld [vmem:[%s1416_s0 + $0x70] sm:$0xff] }
  0x1d   :  { %1011 = vmatpush3.bf16.msra.mxu1 %v1109_v27  ;;  %984 = vmatprep.subr.bf16.mxu0 %v1110_v28  ;;  %v877_v22 = vcombine.low %v17_v18, %v21_v19  ;;  %v878_v23 = vcombine.high %v17_v18, %v21_v19  ;;  %v25_v26 = vld [vmem:[%s1416_s0 + $0x58] sm:$0xff]  ;;  %v884_v27 = vcombine.high %v24_v24, %v28_v25 }
  0x1e   :  { %1012 = vmatprep.subr.bf16.mxu1 %v1111_v29  ;;  %v29_v28 = vld [vmem:[%s1416_s0 + $0x78] sm:$0xff] }
  0x1f   :  { %v886_v29 = vcombine.high %v25_v26, %v29_v28 }
  0x20   :  { %985 = vmatpush3.bf16.msra.mxu0 %v1112_v30  ;;  %v883_v30 = vcombine.low %v24_v24, %v28_v25 }
  0x21   :  { %1013 = vmatpush3.bf16.msra.mxu1 %v1113_v31  ;;  %1026 = vmatprep.subr.bf16.mxu0 %v1114_v40  ;;  %v885_v31 = vcombine.low %v25_v26, %v29_v28 }
  0x22   :  { %1054 = vmatprep.subr.bf16.mxu1 %v1115_v41 }
  0x23   :  { %655 = vmatmul.mubr.bf16.vlgmr.msra.gmra.mrb[0].mxu0 %v871_v35 }
  0x24   :  { %704 = vmatmul.mubr.bf16.vlgmr.msra.gmra.mrb[0].mxu1 %v873_v38  ;;  %1027 = vmatpush3.bf16.msra.mxu0 %v1116_v42 }
  0x25   :  { %1055 = vmatpush3.bf16.msra.mxu1 %v1117_v43  ;;  %1028 = vmatprep.subr.bf16.mxu0 %v1118_v44 }
  0x26   :  { %1056 = vmatprep.subr.bf16.mxu1 %v1119_v45  ;;  %662 = vmatprep.mubr.bf16.mxu0 %v880_v62 }
  0x27   :  { %711 = vmatprep.mubr.bf16.mxu1 %v882_v2 }
  0x28   :  { %1029 = vmatpush3.bf16.msra.mxu0 %v1120_v46 }
  0x29   :  { %1057 = vmatpush3.bf16.msra.mxu1 %v1121_v47  ;;  %1030 = vmatprep.subr.bf16.mxu0 %v1122_v48 }
  0x2a   :  { %1058 = vmatprep.subr.bf16.mxu1 %v1123_v49 }
  0x2b   :  { %663 = vmatmul.mubr.bf16.gmra.mrb[4].mxu0 %v879_v1 }
  0x2c   :  { %1031 = vmatpush3.bf16.msra.mxu0 %v1124_v50  ;;  %712 = vmatmul.mubr.bf16.gmra.mrb[4].mxu1 %v881_v4 }
  0x2d   :  { %1059 = vmatpush3.bf16.msra.mxu1 %v1125_v51  ;;  %1032 = vmatprep.subr.bf16.mxu0 %v1126_v52 }
  0x2e   :  { %1060 = vmatprep.subr.bf16.mxu1 %v1127_v53  ;;  %752 = vmatprep.mubr.bf16.mxu0 %v876_v21 }
  0x2f   :  { %801 = vmatprep.mubr.bf16.mxu1 %v878_v23 }
  0x30   :  { %1033 = vmatpush3.bf16.msra.mxu0 %v1128_v54 }
  0x31   :  { %1061 = vmatpush3.bf16.msra.mxu1 %v1129_v55  ;;  %1034 = vmatprep.subr.bf16.mxu0 %v1130_v56 }
  0x32   :  { %1062 = vmatprep.subr.bf16.mxu1 %v1131_v57 }
  0x34   :  { %1035 = vmatpush3.bf16.msra.mxu0 %v1132_v58 }
  0x35   :  { %1063 = vmatpush3.bf16.msra.mxu1 %v1133_v59  ;;  %1036 = vmatprep.subr.bf16.mxu0 %v1134_v3 }
  0x36   :  { %1064 = vmatprep.subr.bf16.mxu1 %v1135_v5 }
  0x38   :  { %1037 = vmatpush3.bf16.msra.mxu0 %v1136_v6 }
  0x39   :  { %1065 = vmatpush3.bf16.msra.mxu1 %v1137_v7  ;;  %1038 = vmatprep.subr.bf16.mxu0 %v1138_v8 }
  0x3a   :  { %1066 = vmatprep.subr.bf16.mxu1 %v1139_v9 }
  0x3c   :  { %1039 = vmatpush3.bf16.msra.mxu0 %v1140_v10 }
  0x3d   :  { %1067 = vmatpush3.bf16.msra.mxu1 %v1141_v11  ;;  %1040 = vmatprep.subr.bf16.mxu0 %v1142_v12 }
  0x3e   :  { %1068 = vmatprep.subr.bf16.mxu1 %v1143_v13 }
  0x40   :  { %1041 = vmatpush3.bf16.msra.mxu0 %v1144_v14 }
  0x41   :  { %1069 = vmatpush3.bf16.msra.mxu1 %v1145_v15 }
  0x43   :  { %753 = vmatmul.mubr.bf16.vlgmr.msra.gmra.mrb[8].mxu0 %v875_v20 }
  0x44   :  { %802 = vmatmul.mubr.bf16.vlgmr.msra.gmra.mrb[8].mxu1 %v877_v22  ;;  %760 = vmatprep.mubr.bf16.mxu0 %v884_v27 }
  0x45   :  { %809 = vmatprep.mubr.bf16.mxu1 %v886_v29 }
  0x4b   :  { %761 = vmatmul.mubr.bf16.gmra.mrb[12].mxu0 %v883_v30 }
  0x4c   :  { %810 = vmatmul.mubr.bf16.gmra.mrb[12].mxu1 %v885_v31 }
  0xf6   :  { %v986_v32 = vpop.f32.mrb[0].mxu0 }
  0xf7   :  { %v1014_v33 = vpop.f32.mrb[0].mxu1  ;;  %v987_v34 = vpop.f32.mrb[1].mxu0 }
  0xf8   :  { %v988_v35 = vadd.f32 %v987_v34, %v986_v32  ;;  %v1015_v36 = vpop.f32.mrb[1].mxu1  ;;  %v989_v37 = vpop.f32.mrb[2].mxu0 }
  0xf9   :  { %v1016_v38 = vadd.f32 %v1015_v36, %v1014_v33  ;;  %v1017_v39 = vpop.f32.mrb[2].mxu1  ;;  %v990_v40 = vpop.f32.mrb[3].mxu0 }
  0xfa   :  { %v991_v41 = vadd.f32 %v990_v40, %v989_v37  ;;  %v1018_v42 = vpop.f32.mrb[3].mxu1 }
  0xfb   :  { %v706_v43 = vadd.f32 %v1016_v38, %v988_v35  ;;  %v1019_v44 = vadd.f32 %v1018_v42, %v1017_v39 }
  0xfd   :  { %v709_v45 = vadd.f32 %v1019_v44, %v991_v41 }
  0xfe   :  { %v992_v46 = vpop.f32.mrb[4].mxu0 }
  0xff   :  { %v1020_v47 = vpop.f32.mrb[4].mxu1  ;;  %v993_v48 = vpop.f32.mrb[5].mxu0 }
 0x100   :  { %v994_v49 = vadd.f32 %v993_v48, %v992_v46  ;;  %v1021_v50 = vpop.f32.mrb[5].mxu1  ;;  %v995_v51 = vpop.f32.mrb[6].mxu0 }
 0x101   :  { %v1022_v52 = vadd.f32 %v1021_v50, %v1020_v47  ;;  %v1023_v53 = vpop.f32.mrb[6].mxu1  ;;  %v996_v54 = vpop.f32.mrb[7].mxu0 }
 0x102   :  { %v997_v55 = vadd.f32 %v996_v54, %v995_v51  ;;  %v1024_v56 = vpop.f32.mrb[7].mxu1 }
 0x103   :  { %v714_v57 = vadd.f32 %v1022_v52, %v994_v49  ;;  %v1025_v58 = vadd.f32 %v1024_v56, %v1023_v53 }
 0x105   :  { %v717_v59 = vadd.f32 %v1025_v58, %v997_v55 }
 0x116   :  { %v1042_v60 = vpop.f32.mrb[8].mxu0 }
 0x117   :  { %v1070_v61 = vpop.f32.mrb[8].mxu1  ;;  %v1043_v62 = vpop.f32.mrb[9].mxu0 }
 0x118   :  { %v1071_v63 = vpop.f32.mrb[9].mxu1  ;;  %v1044_v0 = vadd.f32 %v1043_v62, %v1042_v60  ;;  %v1045_v2 = vpop.f32.mrb[10].mxu0 }
 0x119   :  { %v1072_v1 = vadd.f32 %v1071_v63, %v1070_v61  ;;  %v1073_v3 = vpop.f32.mrb[10].mxu1  ;;  %v1046_v4 = vpop.f32.mrb[11].mxu0 }
 0x11a   :  { %v1074_v5 = vpop.f32.mrb[11].mxu1  ;;  %v755_v6 = vadd.f32 %v1044_v0, %v706_v43  ;;  %v1047_v7 = vadd.f32 %v1046_v4, %v1045_v2 }
 0x11b   :  { %v1075_v8 = vadd.f32 %v1074_v5, %v1073_v3 }
 0x11c   :  { %v804_v9 = vadd.f32 %v1072_v1, %v755_v6  ;;  %v758_v10 = vadd.f32 %v1047_v7, %v709_v45 }
 0x11e   :  { %v807_v11 = vadd.f32 %v1075_v8, %v758_v10  ;;  %v1048_v12 = vpop.f32.mrb[12].mxu0  ;;  %v847_v14 = vmul.f32 %v804_v9, %v804_v9 }
 0x11f   :  { %v1076_v13 = vpop.f32.mrb[12].mxu1  ;;  %v1049_v15 = vpop.f32.mrb[13].mxu0 }
 0x120   :  { %v1077_v16 = vpop.f32.mrb[13].mxu1  ;;  %v962_v17 = vpack.c.bf16 %v807_v11, %v804_v9  ;;  %v838_v18 = vadd.f32 %v807_v11, %v804_v9  ;;  %v848_v19 = vmul.f32 %v807_v11, %v807_v11  ;;  %v1050_v20 = vadd.f32 %v1049_v15, %v1048_v12  ;;  %v1051_v21 = vpop.f32.mrb[14].mxu0 }
 0x121   :  { %v1079_v22 = vpop.f32.mrb[14].mxu1  ;;  %v1078_v23 = vadd.f32 %v1077_v16, %v1076_v13  ;;  %v1052_v24 = vpop.f32.mrb[15].mxu0 }
 0x122   :  { %v1080_v25 = vpop.f32.mrb[15].mxu1  ;;  %963 = vst [vmem:[%s1417_s2] sm:$0xff] %v962_v17   ;;  %v851_v26 = vadd.f32 %v848_v19, %v847_v14  ;;  %v763_v27 = vadd.f32 %v1050_v20, %v714_v57  ;;  %v1053_v28 = vadd.f32 %v1052_v24, %v1051_v21 }
 0x123   :  { %v1081_v29 = vadd.f32 %v1080_v25, %v1079_v22 }
 0x124   :  { %v812_v30 = vadd.f32 %v1078_v23, %v763_v27  ;;  %v766_v31 = vadd.f32 %v1053_v28, %v717_v59 }
 0x126   :  { %v839_v32 = vadd.f32 %v838_v18, %v812_v30  ;;  %v849_v33 = vmul.f32 %v812_v30, %v812_v30  ;;  %v815_v34 = vadd.f32 %v1081_v29, %v766_v31 }
 0x128   :  { %v852_v35 = vadd.f32 %v851_v26, %v849_v33  ;;  %v967_v36 = vpack.c.bf16 %v815_v34, %v812_v30  ;;  %v840_v37 = vadd.f32 %v839_v32, %v815_v34  ;;  %v850_v38 = vmul.f32 %v815_v34, %v815_v34 }
 0x12a   :  { %969 = vst [vmem:[%s1417_s2 + $0x8] sm:$0xff] %v967_v36   ;;  %v841_v39 = vrot.slane %v840_v37, 4  ;;  %v853_v40 = vadd.f32 %v852_v35, %v850_v38 }
 0x12c   :  { %v842_v41 = vadd.f32 %v841_v39, %v840_v37  ;;  %v854_v42 = vrot.slane %v853_v40, 4 }
 0x12e   :  { %v843_v43 = vrot.slane %v842_v41, 2  ;;  %v855_v44 = vadd.f32 %v854_v42, %v853_v40 }
 0x130   :  { %v844_v45 = vadd.f32 %v843_v43, %v842_v41  ;;  %v856_v46 = vrot.slane %v855_v44, 2 }
 0x132   :  { %v845_v47 = vrot.slane %v844_v45, 1  ;;  %v857_v48 = vadd.f32 %v856_v46, %v855_v44 }
 0x134   :  { %v858_v49 = vrot.slane %v857_v48, 1  ;;  %v846_v50 = vadd.f32 %v845_v47, %v844_v45 }
 0x136   :  { %v859_v51 = vadd.f32 %v858_v49, %v857_v48 }
 0x138   :  { %v861_v52 = vsel %vm860_vm0, %v846_v50, %v859_v51 }
 0x139   :  { %862 = vst [vmem:[%s1418_s3] sm:$0x3] %v861_v52 }

// kernel: discriminator_forward.11
= control target key start
LH: loop header
LB: loop body
LE: loop exit
PB: predicated region body
PF: predicated region fallthrough
CT: control target
= control target key end

     0   :  { %s2325_s1 = inlined_call_operand.vmem [shape: bf16[2048,128], index: 1, kind: input, shape index: {}]   ;;  %s2326_s0 = inlined_call_operand.vmem [shape: bf16[8,2048], index: 0, kind: input, shape index: {}]   ;;  %s2327_s2 = inlined_call_operand.vmem [shape: f32[8,128], index: 2, kind: output, shape index: {}]  }
   0x1   :  { %v1751_v0 = vld [vmem:[%s2325_s1 + $0x40] sm:$0xff]   ;;  %v1755_v4 = vld [vmem:[%s2325_s1 + $0x48] sm:$0xff]   ;;  %v1759_v8 = vld [vmem:[%s2325_s1 + $0x50] sm:$0xff]  }
   0x2   :  { %v1752_v1 = vld [vmem:[%s2325_s1 + $0xc0] sm:$0xff]   ;;  %1575 = vmatprep.subr.bf16.mxu0 %v1751_v0  ;;  %v1756_v5 = vld [vmem:[%s2325_s1 + $0xc8] sm:$0xff]   ;;  %v1760_v9 = vld [vmem:[%s2325_s1 + $0xd0] sm:$0xff]  }
   0x3   :  { %v1753_v2 = vld [vmem:[%s2325_s1] sm:$0xff]   ;;  %1597 = vmatprep.subr.bf16.mxu1 %v1752_v1  ;;  %v1757_v6 = vld [vmem:[%s2325_s1 + $0x8] sm:$0xff]   ;;  %v1761_v10 = vld [vmem:[%s2325_s1 + $0x10] sm:$0xff]  }
   0x4   :  { %v1754_v3 = vld [vmem:[%s2325_s1 + $0x80] sm:$0xff]   ;;  %1576 = vmatpush3.bf16.msra.mxu0 %v1753_v2  ;;  %v1758_v7 = vld [vmem:[%s2325_s1 + $0x88] sm:$0xff]   ;;  %v1762_v11 = vld [vmem:[%s2325_s1 + $0x90] sm:$0xff]  }
   0x5   :  { %1598 = vmatpush3.bf16.msra.mxu1 %v1754_v3  ;;  %1577 = vmatprep.subr.bf16.mxu0 %v1755_v4  ;;  %v1763_v12 = vld [vmem:[%s2325_s1 + $0x58] sm:$0xff]   ;;  %v1767_v16 = vld [vmem:[%s2325_s1 + $0x60] sm:$0xff]   ;;  %v1771_v20 = vld [vmem:[%s2325_s1 + $0x68] sm:$0xff]  }
   0x6   :  { %1599 = vmatprep.subr.bf16.mxu1 %v1756_v5  ;;  %v1764_v13 = vld [vmem:[%s2325_s1 + $0xd8] sm:$0xff]   ;;  %v1768_v17 = vld [vmem:[%s2325_s1 + $0xe0] sm:$0xff]   ;;  %v1772_v21 = vld [vmem:[%s2325_s1 + $0xe8] sm:$0xff]  }
   0x7   :  { %v1765_v14 = vld [vmem:[%s2325_s1 + $0x18] sm:$0xff]   ;;  %v1769_v18 = vld [vmem:[%s2325_s1 + $0x20] sm:$0xff]   ;;  %v1773_v22 = vld [vmem:[%s2325_s1 + $0x28] sm:$0xff]  }
   0x8   :  { %1578 = vmatpush3.bf16.msra.mxu0 %v1757_v6  ;;  %v1766_v15 = vld [vmem:[%s2325_s1 + $0x98] sm:$0xff]   ;;  %v1770_v19 = vld [vmem:[%s2325_s1 + $0xa0] sm:$0xff]   ;;  %v1774_v23 = vld [vmem:[%s2325_s1 + $0xa8] sm:$0xff]  }
   0x9   :  { %1600 = vmatpush3.bf16.msra.mxu1 %v1758_v7  ;;  %1579 = vmatprep.subr.bf16.mxu0 %v1759_v8  ;;  %v1775_v24 = vld [vmem:[%s2325_s1 + $0x70] sm:$0xff]   ;;  %v1779_v28 = vld [vmem:[%s2325_s1 + $0x78] sm:$0xff]   ;;  %v12_v32 = vld [vmem:[%s2326_s0] sm:$0xff] }
   0xa   :  { %1601 = vmatprep.subr.bf16.mxu1 %v1760_v9  ;;  %v1776_v25 = vld [vmem:[%s2325_s1 + $0xf0] sm:$0xff]   ;;  %v1780_v29 = vld [vmem:[%s2325_s1 + $0xf8] sm:$0xff]   ;;  %v13_v33 = vld [vmem:[%s2326_s0 + $0x8] sm:$0xff]  ;;  %v1431_v34 = vcombine.low %v12_v32, %v12_v32  ;;  %v1432_v35 = vcombine.high %v12_v32, %v12_v32 }
   0xb   :  { %v1777_v26 = vld [vmem:[%s2325_s1 + $0x30] sm:$0xff]   ;;  %v1781_v30 = vld [vmem:[%s2325_s1 + $0x38] sm:$0xff]   ;;  %v1433_v36 = vcombine.low %v13_v33, %v13_v33  ;;  %v1434_v37 = vcombine.high %v13_v33, %v13_v33  ;;  %v1787_v38 = vld [vmem:[%s2325_s1 + $0x140] sm:$0xff]  }
   0xc   :  { %1580 = vmatpush3.bf16.msra.mxu0 %v1761_v10  ;;  %v1778_v27 = vld [vmem:[%s2325_s1 + $0xb0] sm:$0xff]   ;;  %v1782_v31 = vld [vmem:[%s2325_s1 + $0xb8] sm:$0xff]   ;;  %v1788_v39 = vld [vmem:[%s2325_s1 + $0x1c0] sm:$0xff]   ;;  %1132 = vmatprep.mubr.bf16.mxu0 %v1432_v35 }
   0xd   :  { %1602 = vmatpush3.bf16.msra.mxu1 %v1762_v11  ;;  %1581 = vmatprep.subr.bf16.mxu0 %v1763_v12  ;;  %v1789_v40 = vld [vmem:[%s2325_s1 + $0x100] sm:$0xff]   ;;  %v1791_v42 = vld [vmem:[%s2325_s1 + $0x148] sm:$0xff]   ;;  %v1795_v46 = vld [vmem:[%s2325_s1 + $0x150] sm:$0xff]  }
   0xe   :  { %1603 = vmatprep.subr.bf16.mxu1 %v1764_v13  ;;  %1172 = vmatprep.mubr.bf16.mxu1 %v1434_v37  ;;  %v1790_v41 = vld [vmem:[%s2325_s1 + $0x180] sm:$0xff]   ;;  %v1792_v43 = vld [vmem:[%s2325_s1 + $0x1c8] sm:$0xff]   ;;  %v1796_v47 = vld [vmem:[%s2325_s1 + $0x1d0] sm:$0xff]  }
   0xf   :  { %v1793_v44 = vld [vmem:[%s2325_s1 + $0x108] sm:$0xff]   ;;  %v1797_v48 = vld [vmem:[%s2325_s1 + $0x110] sm:$0xff]   ;;  %v1799_v50 = vld [vmem:[%s2325_s1 + $0x158] sm:$0xff]  }
  0x10   :  { %1582 = vmatpush3.bf16.msra.mxu0 %v1765_v14  ;;  %v1794_v45 = vld [vmem:[%s2325_s1 + $0x188] sm:$0xff]   ;;  %v1798_v49 = vld [vmem:[%s2325_s1 + $0x190] sm:$0xff]   ;;  %v1800_v51 = vld [vmem:[%s2325_s1 + $0x1d8] sm:$0xff]  }
  0x11   :  { %1604 = vmatpush3.bf16.msra.mxu1 %v1766_v15  ;;  %1583 = vmatprep.subr.bf16.mxu0 %v1767_v16  ;;  %v1801_v52 = vld [vmem:[%s2325_s1 + $0x118] sm:$0xff]   ;;  %v1803_v54 = vld [vmem:[%s2325_s1 + $0x160] sm:$0xff]   ;;  %v1807_v58 = vld [vmem:[%s2325_s1 + $0x168] sm:$0xff]  }
  0x12   :  { %1605 = vmatprep.subr.bf16.mxu1 %v1768_v17  ;;  %v1802_v53 = vld [vmem:[%s2325_s1 + $0x198] sm:$0xff]   ;;  %v1804_v55 = vld [vmem:[%s2325_s1 + $0x1e0] sm:$0xff]   ;;  %v1808_v59 = vld [vmem:[%s2325_s1 + $0x1e8] sm:$0xff]  }
  0x13   :  { %v1805_v56 = vld [vmem:[%s2325_s1 + $0x120] sm:$0xff]   ;;  %v1809_v60 = vld [vmem:[%s2325_s1 + $0x128] sm:$0xff]   ;;  %v1811_v62 = vld [vmem:[%s2325_s1 + $0x170] sm:$0xff]  }
  0x14   :  { %1584 = vmatpush3.bf16.msra.mxu0 %v1769_v18  ;;  %v1806_v57 = vld [vmem:[%s2325_s1 + $0x1a0] sm:$0xff]   ;;  %v1810_v61 = vld [vmem:[%s2325_s1 + $0x1a8] sm:$0xff]   ;;  %v1812_v63 = vld [vmem:[%s2325_s1 + $0x1f0] sm:$0xff]  }
  0x15   :  { %1606 = vmatpush3.bf16.msra.mxu1 %v1770_v19  ;;  %1585 = vmatprep.subr.bf16.mxu0 %v1771_v20  ;;  %v1813_v0 = vld [vmem:[%s2325_s1 + $0x130] sm:$0xff]   ;;  %v1815_v2 = vld [vmem:[%s2325_s1 + $0x178] sm:$0xff]   ;;  %v1823_v12 = vld [vmem:[%s2325_s1 + $0x240] sm:$0xff]  }
  0x16   :  { %1607 = vmatprep.subr.bf16.mxu1 %v1772_v21  ;;  %v1814_v1 = vld [vmem:[%s2325_s1 + $0x1b0] sm:$0xff]   ;;  %v1816_v3 = vld [vmem:[%s2325_s1 + $0x1f8] sm:$0xff]   ;;  %v1824_v13 = vld [vmem:[%s2325_s1 + $0x2c0] sm:$0xff]  }
  0x17   :  { %v1817_v4 = vld [vmem:[%s2325_s1 + $0x138] sm:$0xff]   ;;  %v14_v6 = vld [vmem:[%s2326_s0 + $0x10] sm:$0xff]  ;;  %v1825_v14 = vld [vmem:[%s2325_s1 + $0x200] sm:$0xff]  }
  0x18   :  { %1586 = vmatpush3.bf16.msra.mxu0 %v1773_v22  ;;  %v1818_v5 = vld [vmem:[%s2325_s1 + $0x1b8] sm:$0xff]   ;;  %v1435_v7 = vcombine.low %v14_v6, %v14_v6  ;;  %v1436_v8 = vcombine.high %v14_v6, %v14_v6  ;;  %v1826_v15 = vld [vmem:[%s2325_s1 + $0x280] sm:$0xff]   ;;  %v1827_v16 = vld [vmem:[%s2325_s1 + $0x248] sm:$0xff]  }
  0x19   :  { %1608 = vmatpush3.bf16.msra.mxu1 %v1774_v23  ;;  %1587 = vmatprep.subr.bf16.mxu0 %v1775_v24  ;;  %v15_v9 = vld [vmem:[%s2326_s0 + $0x18] sm:$0xff]  ;;  %v1828_v17 = vld [vmem:[%s2325_s1 + $0x2c8] sm:$0xff]   ;;  %v1831_v20 = vld [vmem:[%s2325_s1 + $0x250] sm:$0xff]  }
  0x1a   :  { %1609 = vmatprep.subr.bf16.mxu1 %v1776_v25  ;;  %v1437_v10 = vcombine.low %v15_v9, %v15_v9  ;;  %v1438_v11 = vcombine.high %v15_v9, %v15_v9  ;;  %v1829_v18 = vld [vmem:[%s2325_s1 + $0x208] sm:$0xff]   ;;  %v1832_v21 = vld [vmem:[%s2325_s1 + $0x2d0] sm:$0xff]   ;;  %v1835_v24 = vld [vmem:[%s2325_s1 + $0x258] sm:$0xff]  }
  0x1b   :  { %v1830_v19 = vld [vmem:[%s2325_s1 + $0x288] sm:$0xff]   ;;  %v1833_v22 = vld [vmem:[%s2325_s1 + $0x210] sm:$0xff]   ;;  %v1836_v25 = vld [vmem:[%s2325_s1 + $0x2d8] sm:$0xff]  }
  0x1c   :  { %1588 = vmatpush3.bf16.msra.mxu0 %v1777_v26  ;;  %v1834_v23 = vld [vmem:[%s2325_s1 + $0x290] sm:$0xff]   ;;  %v1837_v26 = vld [vmem:[%s2325_s1 + $0x218] sm:$0xff]   ;;  %v1843_v32 = vld [vmem:[%s2325_s1 + $0x268] sm:$0xff]  }
  0x1d   :  { %1610 = vmatpush3.bf16.msra.mxu1 %v1778_v27  ;;  %1589 = vmatprep.subr.bf16.mxu0 %v1779_v28  ;;  %v1838_v27 = vld [vmem:[%s2325_s1 + $0x298] sm:$0xff]   ;;  %v1839_v28 = vld [vmem:[%s2325_s1 + $0x260] sm:$0xff]   ;;  %v1844_v33 = vld [vmem:[%s2325_s1 + $0x2e8] sm:$0xff]  }
  0x1e   :  { %1611 = vmatprep.subr.bf16.mxu1 %v1780_v29  ;;  %v1840_v29 = vld [vmem:[%s2325_s1 + $0x2e0] sm:$0xff]   ;;  %v1846_v35 = vld [vmem:[%s2325_s1 + $0x2a8] sm:$0xff]   ;;  %v1848_v37 = vld [vmem:[%s2325_s1 + $0x2f0] sm:$0xff]  }
  0x1f   :  { %v1879_v6 = vld [vmem:[%s2325_s1 + $0x368] sm:$0xff]  }
  0x20   :  { %1590 = vmatpush3.bf16.msra.mxu0 %v1781_v30  ;;  %v1841_v30 = vld [vmem:[%s2325_s1 + $0x220] sm:$0xff]   ;;  %v1882_v9 = vld [vmem:[%s2325_s1 + $0x3a8] sm:$0xff]  }
  0x21   :  { %1612 = vmatpush3.bf16.msra.mxu1 %v1782_v31  ;;  %1619 = vmatprep.subr.bf16.mxu0 %v1787_v38  ;;  %v1842_v31 = vld [vmem:[%s2325_s1 + $0x2a0] sm:$0xff]   ;;  %v1849_v38 = vld [vmem:[%s2325_s1 + $0x230] sm:$0xff]  }
  0x22   :  { %1641 = vmatprep.subr.bf16.mxu1 %v1788_v39  ;;  %v1850_v39 = vld [vmem:[%s2325_s1 + $0x2b0] sm:$0xff]  }
  0x23   :  { %1133 = vmatmul.mubr.bf16.vlgmr.msra.gmra.mrb[0].mxu0 %v1431_v34  ;;  %v1845_v34 = vld [vmem:[%s2325_s1 + $0x228] sm:$0xff]  }
  0x24   :  { %1173 = vmatmul.mubr.bf16.vlgmr.msra.gmra.mrb[0].mxu1 %v1433_v36  ;;  %1620 = vmatpush3.bf16.msra.mxu0 %v1789_v40  ;;  %v1847_v36 = vld [vmem:[%s2325_s1 + $0x270] sm:$0xff]   ;;  %v1851_v40 = vld [vmem:[%s2325_s1 + $0x278] sm:$0xff]  }
  0x25   :  { %1642 = vmatpush3.bf16.msra.mxu1 %v1790_v41  ;;  %1621 = vmatprep.subr.bf16.mxu0 %v1791_v42  ;;  %v1852_v41 = vld [vmem:[%s2325_s1 + $0x2f8] sm:$0xff]  }
  0x26   :  { %1643 = vmatprep.subr.bf16.mxu1 %v1792_v43  ;;  %1212 = vmatprep.mubr.bf16.mxu0 %v1436_v8  ;;  %v1853_v42 = vld [vmem:[%s2325_s1 + $0x238] sm:$0xff]   ;;  %v1881_v8 = vld [vmem:[%s2325_s1 + $0x328] sm:$0xff]  }
  0x27   :  { %1252 = vmatprep.mubr.bf16.mxu1 %v1438_v11  ;;  %v1854_v43 = vld [vmem:[%s2325_s1 + $0x2b8] sm:$0xff]   ;;  %v1884_v11 = vld [vmem:[%s2325_s1 + $0x3f0] sm:$0xff]  }
  0x28   :  { %1622 = vmatpush3.bf16.msra.mxu0 %v1793_v44  ;;  %v16_v44 = vld [vmem:[%s2326_s0 + $0x20] sm:$0xff] }
  0x29   :  { %1644 = vmatpush3.bf16.msra.mxu1 %v1794_v45  ;;  %1623 = vmatprep.subr.bf16.mxu0 %v1795_v46  ;;  %v17_v45 = vld [vmem:[%s2326_s0 + $0x28] sm:$0xff]  ;;  %v1439_v46 = vcombine.low %v16_v44, %v16_v44 }
  0x2a   :  { %1645 = vmatprep.subr.bf16.mxu1 %v1796_v47  ;;  %v1440_v47 = vcombine.high %v16_v44, %v16_v44 }
  0x2c   :  { %1624 = vmatpush3.bf16.msra.mxu0 %v1797_v48  ;;  %v1441_v48 = vcombine.low %v17_v45, %v17_v45 }
  0x2d   :  { %1646 = vmatpush3.bf16.msra.mxu1 %v1798_v49  ;;  %1625 = vmatprep.subr.bf16.mxu0 %v1799_v50  ;;  %v1442_v49 = vcombine.high %v17_v45, %v17_v45  ;;  %v1859_v50 = vld [vmem:[%s2325_s1 + $0x340] sm:$0xff]  }
  0x2e   :  { %1647 = vmatprep.subr.bf16.mxu1 %v1800_v51  ;;  %v1860_v51 = vld [vmem:[%s2325_s1 + $0x3c0] sm:$0xff]  }
  0x30   :  { %1626 = vmatpush3.bf16.msra.mxu0 %v1801_v52  ;;  %v1861_v52 = vld [vmem:[%s2325_s1 + $0x300] sm:$0xff]  }
  0x31   :  { %1648 = vmatpush3.bf16.msra.mxu1 %v1802_v53  ;;  %1627 = vmatprep.subr.bf16.mxu0 %v1803_v54  ;;  %v1862_v53 = vld [vmem:[%s2325_s1 + $0x380] sm:$0xff]   ;;  %v1863_v54 = vld [vmem:[%s2325_s1 + $0x348] sm:$0xff]  }
  0x32   :  { %1649 = vmatprep.subr.bf16.mxu1 %v1804_v55  ;;  %v1864_v55 = vld [vmem:[%s2325_s1 + $0x3c8] sm:$0xff]  }
  0x34   :  { %1628 = vmatpush3.bf16.msra.mxu0 %v1805_v56  ;;  %v1865_v56 = vld [vmem:[%s2325_s1 + $0x308] sm:$0xff]  }
  0x35   :  { %1650 = vmatpush3.bf16.msra.mxu1 %v1806_v57  ;;  %1629 = vmatprep.subr.bf16.mxu0 %v1807_v58  ;;  %v1866_v57 = vld [vmem:[%s2325_s1 + $0x388] sm:$0xff]   ;;  %v1867_v58 = vld [vmem:[%s2325_s1 + $0x350] sm:$0xff]  }
  0x36   :  { %1651 = vmatprep.subr.bf16.mxu1 %v1808_v59  ;;  %v1868_v59 = vld [vmem:[%s2325_s1 + $0x3d0] sm:$0xff]  }
  0x38   :  { %1630 = vmatpush3.bf16.msra.mxu0 %v1809_v60  ;;  %v1869_v60 = vld [vmem:[%s2325_s1 + $0x310] sm:$0xff]  }
  0x39   :  { %1652 = vmatpush3.bf16.msra.mxu1 %v1810_v61  ;;  %1631 = vmatprep.subr.bf16.mxu0 %v1811_v62  ;;  %v1870_v61 = vld [vmem:[%s2325_s1 + $0x390] sm:$0xff]   ;;  %v1871_v62 = vld [vmem:[%s2325_s1 + $0x358] sm:$0xff]  }
  0x3a   :  { %1653 = vmatprep.subr.bf16.mxu1 %v1812_v63  ;;  %v1872_v63 = vld [vmem:[%s2325_s1 + $0x3d8] sm:$0xff]  }
  0x3c   :  { %1632 = vmatpush3.bf16.msra.mxu0 %v1813_v0  ;;  %v1873_v0 = vld [vmem:[%s2325_s1 + $0x318] sm:$0xff]  }
  0x3d   :  { %1654 = vmatpush3.bf16.msra.mxu1 %v1814_v1  ;;  %1633 = vmatprep.subr.bf16.mxu0 %v1815_v2  ;;  %v1874_v1 = vld [vmem:[%s2325_s1 + $0x398] sm:$0xff]   ;;  %v1875_v2 = vld [vmem:[%s2325_s1 + $0x360] sm:$0xff]  }
  0x3e   :  { %1655 = vmatprep.subr.bf16.mxu1 %v1816_v3  ;;  %v1876_v3 = vld [vmem:[%s2325_s1 + $0x3e0] sm:$0xff]  }
  0x40   :  { %1634 = vmatpush3.bf16.msra.mxu0 %v1817_v4  ;;  %v1877_v4 = vld [vmem:[%s2325_s1 + $0x320] sm:$0xff]  }
  0x41   :  { %1656 = vmatpush3.bf16.msra.mxu1 %v1818_v5  ;;  %1663 = vmatprep.subr.bf16.mxu0 %v1823_v12  ;;  %v1878_v5 = vld [vmem:[%s2325_s1 + $0x3a0] sm:$0xff]   ;;  %v1885_v12 = vld [vmem:[%s2325_s1 + $0x330] sm:$0xff]  }
  0x42   :  { %1685 = vmatprep.subr.bf16.mxu1 %v1824_v13  ;;  %v1886_v13 = vld [vmem:[%s2325_s1 + $0x3b0] sm:$0xff]  }
  0x43   :  { %1213 = vmatmul.mubr.bf16.vlgmr.msra.gmra.mrb[4].mxu0 %v1435_v7  ;;  %v1880_v7 = vld [vmem:[%s2325_s1 + $0x3e8] sm:$0xff]  }
  0x44   :  { %1253 = vmatmul.mubr.bf16.vlgmr.msra.gmra.mrb[4].mxu1 %v1437_v10  ;;  %1664 = vmatpush3.bf16.msra.mxu0 %v1825_v14  ;;  %v1883_v10 = vld [vmem:[%s2325_s1 + $0x370] sm:$0xff]   ;;  %v1887_v14 = vld [vmem:[%s2325_s1 + $0x378] sm:$0xff]  }
  0x45   :  { %1686 = vmatpush3.bf16.msra.mxu1 %v1826_v15  ;;  %1665 = vmatprep.subr.bf16.mxu0 %v1827_v16  ;;  %v1888_v15 = vld [vmem:[%s2325_s1 + $0x3f8] sm:$0xff]  }
  0x46   :  { %1687 = vmatprep.subr.bf16.mxu1 %v1828_v17  ;;  %1292 = vmatprep.mubr.bf16.mxu0 %v1440_v47  ;;  %v1889_v16 = vld [vmem:[%s2325_s1 + $0x338] sm:$0xff]  }
  0x47   :  { %1332 = vmatprep.mubr.bf16.mxu1 %v1442_v49  ;;  %v1890_v17 = vld [vmem:[%s2325_s1 + $0x3b8] sm:$0xff]  }
  0x48   :  { %1666 = vmatpush3.bf16.msra.mxu0 %v1829_v18  ;;  %v18_v18 = vld [vmem:[%s2326_s0 + $0x30] sm:$0xff] }
  0x49   :  { %1688 = vmatpush3.bf16.msra.mxu1 %v1830_v19  ;;  %1667 = vmatprep.subr.bf16.mxu0 %v1831_v20  ;;  %v19_v19 = vld [vmem:[%s2326_s0 + $0x38] sm:$0xff]  ;;  %v1443_v20 = vcombine.low %v18_v18, %v18_v18 }
  0x4a   :  { %1689 = vmatprep.subr.bf16.mxu1 %v1832_v21  ;;  %v1444_v21 = vcombine.high %v18_v18, %v18_v18 }
  0x4c   :  { %1668 = vmatpush3.bf16.msra.mxu0 %v1833_v22  ;;  %v1445_v22 = vcombine.low %v19_v19, %v19_v19 }
  0x4d   :  { %1690 = vmatpush3.bf16.msra.mxu1 %v1834_v23  ;;  %1669 = vmatprep.subr.bf16.mxu0 %v1835_v24  ;;  %v1446_v23 = vcombine.high %v19_v19, %v19_v19 }
  0x4e   :  { %1691 = vmatprep.subr.bf16.mxu1 %v1836_v25 }
  0x50   :  { %1670 = vmatpush3.bf16.msra.mxu0 %v1837_v26 }
  0x51   :  { %1692 = vmatpush3.bf16.msra.mxu1 %v1838_v27  ;;  %1671 = vmatprep.subr.bf16.mxu0 %v1839_v28 }
  0x52   :  { %1693 = vmatprep.subr.bf16.mxu1 %v1840_v29 }
  0x54   :  { %1672 = vmatpush3.bf16.msra.mxu0 %v1841_v30 }
  0x55   :  { %1694 = vmatpush3.bf16.msra.mxu1 %v1842_v31  ;;  %1673 = vmatprep.subr.bf16.mxu0 %v1843_v32 }
  0x56   :  { %1695 = vmatprep.subr.bf16.mxu1 %v1844_v33 }
  0x58   :  { %1674 = vmatpush3.bf16.msra.mxu0 %v1845_v34 }
  0x59   :  { %1696 = vmatpush3.bf16.msra.mxu1 %v1846_v35  ;;  %1675 = vmatprep.subr.bf16.mxu0 %v1847_v36 }
  0x5a   :  { %1697 = vmatprep.subr.bf16.mxu1 %v1848_v37 }
  0x5c   :  { %1676 = vmatpush3.bf16.msra.mxu0 %v1849_v38 }
  0x5d   :  { %1698 = vmatpush3.bf16.msra.mxu1 %v1850_v39  ;;  %1677 = vmatprep.subr.bf16.mxu0 %v1851_v40 }
  0x5e   :  { %1699 = vmatprep.subr.bf16.mxu1 %v1852_v41 }
  0x60   :  { %1678 = vmatpush3.bf16.msra.mxu0 %v1853_v42 }
  0x61   :  { %1700 = vmatpush3.bf16.msra.mxu1 %v1854_v43  ;;  %1707 = vmatprep.subr.bf16.mxu0 %v1859_v50 }
  0x62   :  { %1729 = vmatprep.subr.bf16.mxu1 %v1860_v51 }
  0x63   :  { %1293 = vmatmul.mubr.bf16.vlgmr.msra.gmra.mrb[8].mxu0 %v1439_v46 }
  0x64   :  { %1333 = vmatmul.mubr.bf16.vlgmr.msra.gmra.mrb[8].mxu1 %v1441_v48  ;;  %1708 = vmatpush3.bf16.msra.mxu0 %v1861_v52 }
  0x65   :  { %1730 = vmatpush3.bf16.msra.mxu1 %v1862_v53  ;;  %1709 = vmatprep.subr.bf16.mxu0 %v1863_v54 }
  0x66   :  { %1731 = vmatprep.subr.bf16.mxu1 %v1864_v55  ;;  %1372 = vmatprep.mubr.bf16.mxu0 %v1444_v21 }
  0x67   :  { %1412 = vmatprep.mubr.bf16.mxu1 %v1446_v23 }
  0x68   :  { %1710 = vmatpush3.bf16.msra.mxu0 %v1865_v56 }
  0x69   :  { %1732 = vmatpush3.bf16.msra.mxu1 %v1866_v57  ;;  %1711 = vmatprep.subr.bf16.mxu0 %v1867_v58 }
  0x6a   :  { %1733 = vmatprep.subr.bf16.mxu1 %v1868_v59 }
  0x6c   :  { %1712 = vmatpush3.bf16.msra.mxu0 %v1869_v60 }
  0x6d   :  { %1734 = vmatpush3.bf16.msra.mxu1 %v1870_v61  ;;  %1713 = vmatprep.subr.bf16.mxu0 %v1871_v62 }
  0x6e   :  { %1735 = vmatprep.subr.bf16.mxu1 %v1872_v63 }
  0x70   :  { %1714 = vmatpush3.bf16.msra.mxu0 %v1873_v0 }
  0x71   :  { %1736 = vmatpush3.bf16.msra.mxu1 %v1874_v1  ;;  %1715 = vmatprep.subr.bf16.mxu0 %v1875_v2 }
  0x72   :  { %1737 = vmatprep.subr.bf16.mxu1 %v1876_v3 }
  0x74   :  { %1716 = vmatpush3.bf16.msra.mxu0 %v1877_v4 }
  0x75   :  { %1738 = vmatpush3.bf16.msra.mxu1 %v1878_v5  ;;  %1717 = vmatprep.subr.bf16.mxu0 %v1879_v6 }
  0x76   :  { %1739 = vmatprep.subr.bf16.mxu1 %v1880_v7 }
  0x78   :  { %1718 = vmatpush3.bf16.msra.mxu0 %v1881_v8 }
  0x79   :  { %1740 = vmatpush3.bf16.msra.mxu1 %v1882_v9  ;;  %1719 = vmatprep.subr.bf16.mxu0 %v1883_v10 }
  0x7a   :  { %1741 = vmatprep.subr.bf16.mxu1 %v1884_v11 }
  0x7c   :  { %1720 = vmatpush3.bf16.msra.mxu0 %v1885_v12 }
  0x7d   :  { %1742 = vmatpush3.bf16.msra.mxu1 %v1886_v13  ;;  %1721 = vmatprep.subr.bf16.mxu0 %v1887_v14 }
  0x7e   :  { %1743 = vmatprep.subr.bf16.mxu1 %v1888_v15 }
  0x80   :  { %1722 = vmatpush3.bf16.msra.mxu0 %v1889_v16 }
  0x81   :  { %1744 = vmatpush3.bf16.msra.mxu1 %v1890_v17 }
  0x83   :  { %1373 = vmatmul.mubr.bf16.vlgmr.msra.gmra.mrb[12].mxu0 %v1443_v20 }
  0x84   :  { %1413 = vmatmul.mubr.bf16.vlgmr.msra.gmra.mrb[12].mxu1 %v1445_v22 }
  0xf6   :  { %v1591_v24 = vpop.f32.mrb[0].mxu0 }
  0xf7   :  { %v1613_v25 = vpop.f32.mrb[0].mxu1  ;;  %v1592_v26 = vpop.f32.mrb[1].mxu0 }
  0xf8   :  { %v1614_v27 = vpop.f32.mrb[1].mxu1  ;;  %v1593_v28 = vadd.f32 %v1592_v26, %v1591_v24  ;;  %v1594_v30 = vpop.f32.mrb[2].mxu0 }
  0xf9   :  { %v1615_v29 = vadd.f32 %v1614_v27, %v1613_v25  ;;  %v1616_v31 = vpop.f32.mrb[2].mxu1  ;;  %v1595_v32 = vpop.f32.mrb[3].mxu0 }
  0xfa   :  { %v1617_v33 = vpop.f32.mrb[3].mxu1 }
  0xfb   :  { %v1175_v34 = vadd.f32 %v1615_v29, %v1593_v28 }
 0x116   :  { %v1635_v35 = vpop.f32.mrb[4].mxu0 }
 0x117   :  { %v1657_v36 = vpop.f32.mrb[4].mxu1  ;;  %v1636_v37 = vpop.f32.mrb[5].mxu0 }
 0x118   :  { %v1658_v38 = vpop.f32.mrb[5].mxu1  ;;  %v1637_v39 = vadd.f32 %v1636_v37, %v1635_v35  ;;  %v1638_v41 = vpop.f32.mrb[6].mxu0 }
 0x119   :  { %v1659_v40 = vadd.f32 %v1658_v38, %v1657_v36  ;;  %v1660_v42 = vpop.f32.mrb[6].mxu1  ;;  %v1639_v43 = vpop.f32.mrb[7].mxu0 }
 0x11a   :  { %v1661_v44 = vpop.f32.mrb[7].mxu1  ;;  %v1215_v45 = vadd.f32 %v1637_v39, %v1175_v34 }
 0x11c   :  { %v1255_v46 = vadd.f32 %v1659_v40, %v1215_v45 }
 0x136   :  { %v1679_v47 = vpop.f32.mrb[8].mxu0 }
 0x137   :  { %v1701_v48 = vpop.f32.mrb[8].mxu1  ;;  %v1680_v49 = vpop.f32.mrb[9].mxu0 }
 0x138   :  { %v1681_v50 = vadd.f32 %v1680_v49, %v1679_v47  ;;  %v1702_v51 = vpop.f32.mrb[9].mxu1  ;;  %v1682_v52 = vpop.f32.mrb[10].mxu0 }
 0x139   :  { %v1703_v53 = vadd.f32 %v1702_v51, %v1701_v48  ;;  %v1704_v54 = vpop.f32.mrb[10].mxu1  ;;  %v1683_v55 = vpop.f32.mrb[11].mxu0 }
 0x13a   :  { %v1295_v56 = vadd.f32 %v1681_v50, %v1255_v46  ;;  %v1705_v57 = vpop.f32.mrb[11].mxu1 }
 0x13c   :  { %v1335_v58 = vadd.f32 %v1703_v53, %v1295_v56 }
 0x156   :  { %v1723_v59 = vpop.f32.mrb[12].mxu0 }
 0x157   :  { %v1745_v60 = vpop.f32.mrb[12].mxu1  ;;  %v1724_v61 = vpop.f32.mrb[13].mxu0 }
 0x158   :  { %v1725_v62 = vadd.f32 %v1724_v61, %v1723_v59  ;;  %v1746_v63 = vpop.f32.mrb[13].mxu1  ;;  %v1726_v0 = vpop.f32.mrb[14].mxu0 }
 0x159   :  { %v1747_v1 = vadd.f32 %v1746_v63, %v1745_v60  ;;  %v1748_v2 = vpop.f32.mrb[14].mxu1  ;;  %v1727_v3 = vpop.f32.mrb[15].mxu0 }
 0x15a   :  { %v1375_v4 = vadd.f32 %v1725_v62, %v1335_v58  ;;  %v1749_v5 = vpop.f32.mrb[15].mxu1 }
 0x15c   :  { %v1415_v6 = vadd.f32 %v1747_v1, %v1375_v4 }
 0x15e   :  { %v1420_v7 = vsub.f32 0.0, %v1415_v6 }
 0x160   :  { %v1421_v8 = vmul.f32 1.442695, %v1420_v7 }
 0x162   :  { %1895 = vpow2.f32 %v1421_v8 }
 0x16c   :  { %v1896_v9 = vpop.eup %1895 }
 0x16d   :  { %v1423_v10 = vadd.f32 1.0, %v1896_v9 }
 0x16f   :  { %1897 = vrcp.f32 %v1423_v10 }
 0x179   :  { %v1898_v11 = vpop.eup %1897 }
 0x17a   :  { %1426 = vst [vmem:[%s2327_s2] sm:$0xff] %v1898_v11 }

</bundles_post_ra>
